<compile_context>
chip_gen: v6e
topology: v6e:2x2x1
jax: 0.10.0
libtpu: 0.0.40
codegen_flags: <defaults>
</compile_context>

<pallas_src>
import functools

import jax
import jax.numpy as jnp
from jax.experimental import pallas as pl
from jax.experimental.pallas import tpu as pltpu

GENERATOR_OUTPUT_IMAGE_SHAPE = 33 * 3          # 99
N_CLASSES = 3
N_LIMB_CONNECTIONS = 35                         # len(BODY_POSE_CONNECTIONS)

_K_RAW = 10 + N_LIMB_CONNECTIONS + GENERATOR_OUTPUT_IMAGE_SHAPE   # 144 real features
_BIAS_COL = _K_RAW                              # ones-column position (b1 fold)
K_PAD = 256                                     # lane-dense fused input width
OUT_PAD = 128                                   # lane-dense padded last-layer width


def _leaky_relu(x, slope=0.25):
    # max-form (valid for 0 < slope < 1): one max instead of compare+select.
    return jnp.maximum(x, slope * x)


def disc_kernel(x_ref, w1_ref, w2_ref, b2_ref, w3_ref, b3_ref,
                w4_ref, b4_ref, out_ref):
    f32 = jnp.float32
    bf16 = jnp.bfloat16

    # Fused first layer (bias folded into row 144 of w1 via the ones column).
    h = jnp.dot(x_ref[...], w1_ref[...], preferred_element_type=f32)     # (tb, 1024)
    h = _leaky_relu(h)

    h = jnp.dot(h.astype(bf16), w2_ref[...], preferred_element_type=f32) + b2_ref[...]
    h = _leaky_relu(h)

    h = jnp.dot(h.astype(bf16), w3_ref[...], preferred_element_type=f32) + b3_ref[...]
    h = _leaky_relu(h)

    # Padded last layer: (tb, 256) @ (256, 128); the real logit is column 0.
    logit = jnp.dot(h.astype(bf16), w4_ref[...], preferred_element_type=f32) + b4_ref[...]

    # Lane-dense output: transpose the slab (XLU), keep row 0 = real logits,
    # exact & stable sigmoid via tanh (single EUP transcendental).
    logit_t = logit.T                                   # (128, tb)
    out_ref[...] = 0.5 * jnp.tanh(0.5 * logit_t[0:1, :]) + 0.5          # (1, tb)


def init_params(key):
    """Deterministic synthetic parameters matching the module's shapes."""
    ks = jax.random.split(key, 12)
    G = GENERATOR_OUTPUT_IMAGE_SHAPE
    scale = 0.05
    return {
        "emb_table": jax.random.normal(ks[0], (N_CLASSES, 10), jnp.float32),
        "w_lab": scale * jax.random.normal(ks[1], (10, G), jnp.float32),
        "b_lab": scale * jax.random.normal(ks[2], (1, G), jnp.float32),
        "w_ll": scale * jax.random.normal(ks[3], (N_LIMB_CONNECTIONS, G), jnp.float32),
        "b_ll": scale * jax.random.normal(ks[4], (1, G), jnp.float32),
        "w1": scale * jax.random.normal(ks[5], (3 * G, 1024), jnp.float32),
        "b1": scale * jax.random.normal(ks[6], (1, 1024), jnp.float32),
        "w2": scale * jax.random.normal(ks[7], (1024, 512), jnp.float32),
        "b2": scale * jax.random.normal(ks[8], (1, 512), jnp.float32),
        "w3": scale * jax.random.normal(ks[9], (512, 256), jnp.float32),
        "b3": scale * jax.random.normal(ks[10], (1, 256), jnp.float32),
        "w4": scale * jax.random.normal(ks[11], (256, 1), jnp.float32),
        "b4": jnp.zeros((1, 1), jnp.float32),
    }


def _split_w1(w1):
    """Permute rows of W1 (297,1024) into label/limb/coord slabs (99,1024) each,
    matching the interleaved concat order along dim=2 of (B, 33, 9)."""
    j = jnp.arange(33)[:, None] * 9
    k = jnp.arange(3)[None, :]
    rows_label = (j + k).reshape(-1)        # positions 0..2 within each joint block
    rows_limb = rows_label + 3              # positions 3..5
    rows_coord = rows_label + 6             # positions 6..8
    return w1[rows_label], w1[rows_limb], w1[rows_coord]


def prepare_params(params):
    """One-time parameter prep (run once, outside the forward path).

    Folds the two tiny projection layers *and* b1 into a single lane-dense
    (256, 1024) first-layer weight:
        h1 = [emb | limb | coord | 1 | 0...] @ W1_fused
    Row 144 of W1_fused is b1 + b_lab@Wa + b_ll@Wb; the wrapper supplies the
    matching ones-column.  Last layer is padded to 256x128 (lane-dense MXU N).
    """
    wa, wb, wc = _split_w1(params["w1"])                       # each (99, 1024)
    w_emb = params["w_lab"] @ wa                               # (10, 1024)
    w_limb = params["w_ll"] @ wb                               # (35, 1024)
    b1_fused = params["b1"] + params["b_lab"] @ wa + params["b_ll"] @ wb   # (1, 1024)
    w1_fused = jnp.concatenate(
        [w_emb, w_limb, wc, b1_fused,
         jnp.zeros((K_PAD - _K_RAW - 1, 1024), jnp.float32)], axis=0)      # (256, 1024)

    w4_pad = jnp.zeros((256, OUT_PAD), jnp.float32).at[:, :1].set(params["w4"])
    b4_pad = jnp.zeros((1, OUT_PAD), jnp.float32).at[:, :1].set(params["b4"])

    return {
        "emb_table": params["emb_table"],                      # f32 (3, 10)
        "w1": w1_fused.astype(jnp.bfloat16),
        "w2": params["w2"].astype(jnp.bfloat16),
        "b2": params["b2"].astype(jnp.float32),
        "w3": params["w3"].astype(jnp.bfloat16),
        "b3": params["b3"].astype(jnp.float32),
        "w4": w4_pad.astype(jnp.bfloat16),
        "b4": b4_pad,
    }


def _round_up(x, m):
    return (x + m - 1) // m * m


def _cdiv(a, b):
    return -(-a // b)


def _choose_batch_tile(B, block_b):
    """Batch tile selection (static, Python ints).

    * tile is a multiple of 128 -> full MXU M rows, clean bf16 packing, and a
      lane-dense transposed output row.
    * tile is capped at block_b; padding is bounded by < one tile.
    * whenever there is more than one 128-row chunk of real work, use >=2 grid
      steps so the "parallel" axis can feed both v7x TensorCores.
    """
    block_b = max(128, _round_up(block_b, 128))
    chunks = _cdiv(B, 128)                    # 128-row chunks of real work
    n_tiles = max(1, _cdiv(B, block_b))
    if chunks >= 2:
        n_tiles = max(n_tiles, 2)
    tb = _cdiv(chunks, n_tiles) * 128
    n_tiles = _cdiv(B, tb)
    return tb, n_tiles


@functools.partial(jax.jit, static_argnames=("block_b",))
def limb_length_discriminator(prepared, coordinates, label, limb_lengths, *,
                              block_b=256):
    """coordinates: (B, 33, 3) f32; label: (B,) int32; limb_lengths: (B, 35)."""
    B = coordinates.shape[0]
    tb, n_tiles = _choose_batch_tile(B, block_b)
    bp = tb * n_tiles

    # Layout glue: embedding gather + flatten + fused-input concat (+ the
    # ones-column that carries the folded b1) + pad to (bp, 256) bf16.
    emb = jnp.take(prepared["emb_table"], label, axis=0)                # (B, 10)
    feats = jnp.concatenate(
        [emb,
         limb_lengths.astype(jnp.float32),                              # (B, 35)
         coordinates.reshape(B, -1).astype(jnp.float32),                # (B, 99)
         jnp.ones((B, 1), jnp.float32)],                                # bias col @144
        axis=1)                                                         # (B, 145)
    x = jnp.pad(feats, ((0, bp - B), (0, K_PAD - feats.shape[1])))      # (bp, 256)
    x = x.astype(jnp.bfloat16)

    batch_map = lambda i: (i, 0)
    out_map = lambda i: (0, i)
    const_map = lambda i: (0, 0)
    w_spec = lambda shape: pl.BlockSpec(shape, const_map)

    out = pl.pallas_call(
        disc_kernel,
        out_shape=jax.ShapeDtypeStruct((1, bp), jnp.float32),
        grid=(n_tiles,),
        in_specs=[
            pl.BlockSpec((tb, K_PAD), batch_map),
            w_spec((K_PAD, 1024)),
            w_spec((1024, 512)), w_spec((1, 512)),
            w_spec((512, 256)), w_spec((1, 256)),
            w_spec((256, OUT_PAD)), w_spec((1, OUT_PAD)),
        ],
        out_specs=pl.BlockSpec((1, tb), out_map),
        compiler_params=pltpu.CompilerParams(
            dimension_semantics=("parallel",)),
    )(x, prepared["w1"], prepared["w2"], prepared["b2"],
      prepared["w3"], prepared["b3"], prepared["w4"], prepared["b4"])

    # Lane-dense (1, bp) row -> (B, 1) column (tiny slice, not a slab re-read).
    return out[0, :B, None]


def _reference(params, coordinates, label, limb_lengths):
    """Pure-JAX f32 reference following the PyTorch forward literally."""
    B = coordinates.shape[0]
    emb = jnp.take(params["emb_table"], label, axis=0)
    label_out = (emb @ params["w_lab"] + params["b_lab"]).reshape(B, 33, 3)
    limb_out = (limb_lengths.astype(jnp.float32) @ params["w_ll"]
                + params["b_ll"]).reshape(B, 33, 3)
    combined = jnp.concatenate((label_out, limb_out, coordinates), axis=2)
    x = combined.reshape(B, -1).astype(jnp.float32)
    lrelu = lambda v: jnp.where(v >= 0, v, 0.25 * v)
    x = lrelu(x @ params["w1"] + params["b1"])
    x = lrelu(x @ params["w2"] + params["b2"])
    x = lrelu(x @ params["w3"] + params["b3"])
    return jax.nn.sigmoid(x @ params["w4"] + params["b4"])


if __name__ == "__main__":
    key = jax.random.PRNGKey(0)
    kp, kdata = jax.random.split(key, 2)

    params = init_params(kp)
    prepared = prepare_params(params)       # one-time weight prep (not per call)

    # B=16 exercises the single-tile path; B=160 exercises the multi-tile
    # (grid=(2,), tb=128) pipelined / parallel path.
    for B in (16, 160):
        kc, kl, kll = jax.random.split(jax.random.fold_in(kdata, B), 3)
        coordinates = jax.random.normal(kc, (B, 33, 3), jnp.float32)
        label = jax.random.randint(kl, (B,), 0, N_CLASSES, jnp.int32)
        limb_lengths = jax.random.uniform(kll, (B, N_LIMB_CONNECTIONS), jnp.float32)

        out = limb_length_discriminator(prepared, coordinates, label, limb_lengths)
        out = jax.block_until_ready(out)

        ref = _reference(params, coordinates, label, limb_lengths)
        assert out.shape == (B, 1)
        # bf16 weights/activations between matmuls -> small tolerance vs f32 ref.
        assert jnp.allclose(out, ref, atol=1e-2, rtol=1e-2), (B, out, ref)

    print("KERNEL_OK")
</pallas_src>

<mosaic_0001>
module attributes {stable_mosaic.version = 11 : i64} {
  func.func @disc_kernel(%arg0: i32, %arg1: memref<128x256xbf16, #tpu.memory_space<vmem>>, %arg2: memref<256x1024xbf16, #tpu.memory_space<vmem>>, %arg3: memref<1024x512xbf16, #tpu.memory_space<vmem>>, %arg4: memref<1x512xf32, #tpu.memory_space<vmem>>, %arg5: memref<512x256xbf16, #tpu.memory_space<vmem>>, %arg6: memref<1x256xf32, #tpu.memory_space<vmem>>, %arg7: memref<256x128xbf16, #tpu.memory_space<vmem>>, %arg8: memref<1x128xf32, #tpu.memory_space<vmem>>, %arg9: memref<1x128xf32, #tpu.memory_space<vmem>>) attributes {dimension_semantics = [#tpu.dimension_semantics<parallel>], iteration_bounds = array<i64: 1>, scalar_prefetch = 0 : i64, scratch_operands = 0 : i64, tpu.core_type = #tpu.core_type<tc>, window_params = [{transform_indices = @transform_0, window_bounds = array<i64: 128, 256>}, {pipeline_mode = #tpu.pipeline_mode<synchronous>, transform_indices = @transform_1, window_bounds = array<i64: 256, 1024>}, {pipeline_mode = #tpu.pipeline_mode<synchronous>, transform_indices = @transform_2, window_bounds = array<i64: 1024, 512>}, {pipeline_mode = #tpu.pipeline_mode<synchronous>, transform_indices = @transform_3, window_bounds = array<i64: 1, 512>}, {pipeline_mode = #tpu.pipeline_mode<synchronous>, transform_indices = @transform_4, window_bounds = array<i64: 512, 256>}, {pipeline_mode = #tpu.pipeline_mode<synchronous>, transform_indices = @transform_5, window_bounds = array<i64: 1, 256>}, {pipeline_mode = #tpu.pipeline_mode<synchronous>, transform_indices = @transform_6, window_bounds = array<i64: 256, 128>}, {pipeline_mode = #tpu.pipeline_mode<synchronous>, transform_indices = @transform_7, window_bounds = array<i64: 1, 128>}, {transform_indices = @transform_8, window_bounds = array<i64: 1, 128>}]} {
    %c0 = arith.constant 0 : index
    %c0_0 = arith.constant 0 : index
    %0 = vector.load %arg1[%c0, %c0_0] : memref<128x256xbf16, #tpu.memory_space<vmem>>, vector<128x256xbf16>
    %c0_1 = arith.constant 0 : index
    %c0_2 = arith.constant 0 : index
    %1 = vector.load %arg2[%c0_1, %c0_2] : memref<256x1024xbf16, #tpu.memory_space<vmem>>, vector<256x1024xbf16>
    %cst = arith.constant dense<0.000000e+00> : vector<128x1024xf32>
    %2 = tpu.matmul %0, %1, %cst {dimension_numbers = #tpu.dot_dimension_numbers<[1], [0], [0], [1], [0, 0, 1, 1], [], []>} : vector<128x256xbf16>, vector<256x1024xbf16>, vector<128x1024xf32> -> vector<128x1024xf32>
    %cst_3 = arith.constant 2.500000e-01 : f32
    %3 = vector.broadcast %cst_3 : f32 to vector<128x1024xf32>
    %4 = arith.mulf %3, %2 : vector<128x1024xf32>
    %5 = arith.maximumf %2, %4 : vector<128x1024xf32>
    %6 = arith.truncf %5 : vector<128x1024xf32> to vector<128x1024xbf16>
    %c0_4 = arith.constant 0 : index
    %c0_5 = arith.constant 0 : index
    %7 = vector.load %arg3[%c0_4, %c0_5] : memref<1024x512xbf16, #tpu.memory_space<vmem>>, vector<1024x512xbf16>
    %cst_6 = arith.constant dense<0.000000e+00> : vector<128x512xf32>
    %8 = tpu.matmul %6, %7, %cst_6 {dimension_numbers = #tpu.dot_dimension_numbers<[1], [0], [0], [1], [0, 0, 1, 1], [], []>} : vector<128x1024xbf16>, vector<1024x512xbf16>, vector<128x512xf32> -> vector<128x512xf32>
    %c0_7 = arith.constant 0 : index
    %c0_8 = arith.constant 0 : index
    %9 = vector.load %arg4[%c0_7, %c0_8] : memref<1x512xf32, #tpu.memory_space<vmem>>, vector<1x512xf32>
    %10 = vector.broadcast %9 : vector<1x512xf32> to vector<128x512xf32>
    %11 = arith.addf %8, %10 : vector<128x512xf32>
    %cst_9 = arith.constant 2.500000e-01 : f32
    %12 = vector.broadcast %cst_9 : f32 to vector<128x512xf32>
    %13 = arith.mulf %12, %11 : vector<128x512xf32>
    %14 = arith.maximumf %11, %13 : vector<128x512xf32>
    %15 = arith.truncf %14 : vector<128x512xf32> to vector<128x512xbf16>
    %c0_10 = arith.constant 0 : index
    %c0_11 = arith.constant 0 : index
    %16 = vector.load %arg5[%c0_10, %c0_11] : memref<512x256xbf16, #tpu.memory_space<vmem>>, vector<512x256xbf16>
    %cst_12 = arith.constant dense<0.000000e+00> : vector<128x256xf32>
    %17 = tpu.matmul %15, %16, %cst_12 {dimension_numbers = #tpu.dot_dimension_numbers<[1], [0], [0], [1], [0, 0, 1, 1], [], []>} : vector<128x512xbf16>, vector<512x256xbf16>, vector<128x256xf32> -> vector<128x256xf32>
    %c0_13 = arith.constant 0 : index
    %c0_14 = arith.constant 0 : index
    %18 = vector.load %arg6[%c0_13, %c0_14] : memref<1x256xf32, #tpu.memory_space<vmem>>, vector<1x256xf32>
    %19 = vector.broadcast %18 : vector<1x256xf32> to vector<128x256xf32>
    %20 = arith.addf %17, %19 : vector<128x256xf32>
    %cst_15 = arith.constant 2.500000e-01 : f32
    %21 = vector.broadcast %cst_15 : f32 to vector<128x256xf32>
    %22 = arith.mulf %21, %20 : vector<128x256xf32>
    %23 = arith.maximumf %20, %22 : vector<128x256xf32>
    %24 = arith.truncf %23 : vector<128x256xf32> to vector<128x256xbf16>
    %c0_16 = arith.constant 0 : index
    %c0_17 = arith.constant 0 : index
    %25 = vector.load %arg7[%c0_16, %c0_17] : memref<256x128xbf16, #tpu.memory_space<vmem>>, vector<256x128xbf16>
    %cst_18 = arith.constant dense<0.000000e+00> : vector<128x128xf32>
    %26 = tpu.matmul %24, %25, %cst_18 {dimension_numbers = #tpu.dot_dimension_numbers<[1], [0], [0], [1], [0, 0, 1, 1], [], []>} : vector<128x256xbf16>, vector<256x128xbf16>, vector<128x128xf32> -> vector<128x128xf32>
    %c0_19 = arith.constant 0 : index
    %c0_20 = arith.constant 0 : index
    %27 = vector.load %arg8[%c0_19, %c0_20] : memref<1x128xf32, #tpu.memory_space<vmem>>, vector<1x128xf32>
    %28 = vector.broadcast %27 : vector<1x128xf32> to vector<128x128xf32>
    %29 = arith.addf %26, %28 : vector<128x128xf32>
    %30 = tpu.transpose %29, [1, 0] : vector<128x128xf32> -> vector<128x128xf32>
    %31 = vector.extract_strided_slice %30 {offsets = [0, 0], sizes = [1, 128], strides = [1, 1]} : vector<128x128xf32> to vector<1x128xf32>
    %cst_21 = arith.constant 5.000000e-01 : f32
    %32 = vector.broadcast %cst_21 : f32 to vector<1x128xf32>
    %33 = arith.mulf %32, %31 : vector<1x128xf32>
    %34 = math.tanh %33 : vector<1x128xf32>
    %cst_22 = arith.constant 5.000000e-01 : f32
    %35 = vector.broadcast %cst_22 : f32 to vector<1x128xf32>
    %36 = arith.mulf %35, %34 : vector<1x128xf32>
    %cst_23 = arith.constant 5.000000e-01 : f32
    %37 = vector.broadcast %cst_23 : f32 to vector<1x128xf32>
    %38 = arith.addf %36, %37 : vector<1x128xf32>
    %c0_24 = arith.constant 0 : index
    %c0_25 = arith.constant 0 : index
    %39 = vector.load %arg9[%c0_24, %c0_25] : memref<1x128xf32, #tpu.memory_space<vmem>>, vector<1x128xf32>
    tpu.vector_store %arg9[%c0_24, %c0_25], %38 {strides = array<i32>} : memref<1x128xf32, #tpu.memory_space<vmem>>, vector<1x128xf32>,
    return
  }
  func.func @transform_0(%arg0: i32) -> (i32, i32) {
    %c0_i32 = arith.constant 0 : i32
    %c0_i32_0 = arith.constant 0 : i32
    return %arg0, %c0_i32 : i32, i32
  }
  func.func @transform_1(%arg0: i32) -> (i32, i32) {
    %c0_i32 = arith.constant 0 : i32
    %c0_i32_0 = arith.constant 0 : i32
    %c0_i32_1 = arith.constant 0 : i32
    return %c0_i32, %c0_i32_0 : i32, i32
  }
  func.func @transform_2(%arg0: i32) -> (i32, i32) {
    %c0_i32 = arith.constant 0 : i32
    %c0_i32_0 = arith.constant 0 : i32
    %c0_i32_1 = arith.constant 0 : i32
    return %c0_i32, %c0_i32_0 : i32, i32
  }
  func.func @transform_3(%arg0: i32) -> (i32, i32) {
    %c0_i32 = arith.constant 0 : i32
    %c0_i32_0 = arith.constant 0 : i32
    %c0_i32_1 = arith.constant 0 : i32
    return %c0_i32, %c0_i32_0 : i32, i32
  }
  func.func @transform_4(%arg0: i32) -> (i32, i32) {
    %c0_i32 = arith.constant 0 : i32
    %c0_i32_0 = arith.constant 0 : i32
    %c0_i32_1 = arith.constant 0 : i32
    return %c0_i32, %c0_i32_0 : i32, i32
  }
  func.func @transform_5(%arg0: i32) -> (i32, i32) {
    %c0_i32 = arith.constant 0 : i32
    %c0_i32_0 = arith.constant 0 : i32
    %c0_i32_1 = arith.constant 0 : i32
    return %c0_i32, %c0_i32_0 : i32, i32
  }
  func.func @transform_6(%arg0: i32) -> (i32, i32) {
    %c0_i32 = arith.constant 0 : i32
    %c0_i32_0 = arith.constant 0 : i32
    %c0_i32_1 = arith.constant 0 : i32
    return %c0_i32, %c0_i32_0 : i32, i32
  }
  func.func @transform_7(%arg0: i32) -> (i32, i32) {
    %c0_i32 = arith.constant 0 : i32
    %c0_i32_0 = arith.constant 0 : i32
    %c0_i32_1 = arith.constant 0 : i32
    return %c0_i32, %c0_i32_0 : i32, i32
  }
  func.func @transform_8(%arg0: i32) -> (i32, i32) {
    %c0_i32 = arith.constant 0 : i32
    %c0_i32_0 = arith.constant 0 : i32
    return %c0_i32, %arg0 : i32, i32
  }
}

</mosaic_0001>

<bundles_post_ra>
// kernel: limb_length_discriminator.1
= control target key start
LH: loop header
LB: loop body
LE: loop exit
PB: predicated region body
PF: predicated region fallthrough
CT: control target
= control target key end

     0   :  { %13 = vsyncpa [#allocation3], 0  ;;  %s7672_s0 = inlined_call_operand.vmem [shape: bf16[128,256], index: 0, kind: input, shape index: {}]   ;;  %s7673_s1 = inlined_call_operand.hbm [shape: bf16[256,1024], index: 1, kind: input, shape index: {}]   ;;  %s7674_s2 = inlined_call_operand.hbm [shape: bf16[1024,512], index: 2, kind: input, shape index: {}]   ;;  %s7675_s3 = inlined_call_operand.vmem [shape: f32[1,512], index: 3, kind: input, shape index: {}]   ;;  %s7676_s4 = inlined_call_operand.vmem [shape: bf16[512,256], index: 4, kind: input, shape index: {}]   ;;  %s7677_s5 = inlined_call_operand.vmem [shape: f32[1,256], index: 5, kind: input, shape index: {}]   ;;  %s7678_s6 = inlined_call_operand.vmem [shape: bf16[256,128], index: 6, kind: input, shape index: {}]   ;;  %s7679_s7 = inlined_call_operand.vmem [shape: f32[1,128], index: 7, kind: input, shape index: {}]   ;;  %s7680_s8 = inlined_call_operand.vmem [shape: f32[1,128], index: 8, kind: output, shape index: {}]  }
   0x1   :  { %14 = vsyncpa [#allocation5], 0  ;;  %s6427_s27 = smov [#allocation2]  }
   0x2   :  { %s22_s28 = sshll.u32 %s6427_s27, 4  ;;  %s23_s28 = int_to_ptr.vmem [resolvable:$true] %s22_s28 }
   0x3   :  { %s6391_s29 = scalar_lea.vmem %s23_s28, 16384  ;;  %p6396_p1 = scmp.lt.s32.totalorder %s23_s28, %s23_s28 }
   0x4   :  { %p6392_p0 = scmp.ne.s32.totalorder %s23_s28, %s6391_s29  ;;  %p6397_p2 = scmp.lt.s32.totalorder %s6391_s29, %s6391_s29 }
   0x6   :  { %p6398_p3 = por %p6397_p2, %p6396_p1 }
   0x8   :  { %p6399_p4 = pnand %p6398_p3, %p6392_p0 }
   0xa   :  { %6402 = shalt.err (!%p6399_p4)
}
   0xb   :  { %s6428_s30 = smov 512   ;;  %s6429_s9 = smov 32  }
   0xc   :  { %28 = dma.hbm_to_vmem [thread:$0]  %s7673_s1, 16384, %s23_s28, [#allocation3], %s6428_s30, %s6428_s30, %s6429_s9  }
   0xd   :  { %s6430_s12 = smov [#allocation4]  }
   0xe   :  { %s34_s13 = sshll.u32 %s6430_s12, 4  ;;  %s35_s13 = int_to_ptr.vmem [resolvable:$true] %s34_s13 }
   0xf   :  { %s6411_s14 = scalar_lea.vmem %s35_s13, 32768  ;;  %p6416_p6 = scmp.lt.s32.totalorder %s35_s13, %s35_s13 }
  0x10   :  { %p6412_p5 = scmp.ne.s32.totalorder %s35_s13, %s6411_s14  ;;  %p6417_p7 = scmp.lt.s32.totalorder %s6411_s14, %s6411_s14 }
  0x12   :  { %p6418_p8 = por %p6417_p7, %p6416_p6 }
  0x14   :  { %p6419_p9 = pnand %p6418_p8, %p6412_p5 }
  0x16   :  { %6422 = shalt.err (!%p6419_p9)
}
  0x17   :  { %s6431_s15 = smov 256   ;;  %s6432_s16 = smov 16  }
  0x18   :  { %40 = dma.hbm_to_vmem [thread:$0]  %s7674_s2, 32768, %s35_s13, [#allocation5], %s6431_s15, %s6431_s15, %s6432_s16  }
  0x19   :  { %6423 = dma.done.wait [#allocation3], 16384  }
  0x1a   :  { %6424 = vsyncadd [#allocation3], 4294950912 }
  0x1b   :  { %6425 = dma.done.wait [#allocation5], 32768  }
  0x1c   :  { %6426 = vsyncadd [#allocation5], 4294934528  ;;  %v130_v0 = vld [vmem:[#allocation2 + $0x1c0] sm:$0xff]  ;;  %v131_v2 = vld [vmem:[#allocation2 + $0x1c8] sm:$0xff] }
  0x1d   :  { %v134_v1 = vld [vmem:[#allocation2 + $0x1e0] sm:$0xff]  ;;  %v135_v4 = vld [vmem:[#allocation2 + $0x1e8] sm:$0xff] }
  0x1e   :  { %v5366_v3 = vcombine.high %v130_v0, %v134_v1  ;;  %v5365_v5 = vcombine.low %v130_v0, %v134_v1  ;;  %v122_v6 = vld [vmem:[#allocation2 + $0x180] sm:$0xff]  ;;  %v5368_v8 = vcombine.high %v131_v2, %v135_v4  ;;  %v5367_v9 = vcombine.low %v131_v2, %v135_v4  ;;  %v123_v11 = vld [vmem:[#allocation2 + $0x188] sm:$0xff] }
  0x1f   :  { %v126_v7 = vld [vmem:[#allocation2 + $0x1a0] sm:$0xff]  ;;  %v127_v12 = vld [vmem:[#allocation2 + $0x1a8] sm:$0xff] }
  0x20   :  { %v5358_v10 = vcombine.high %v122_v6, %v126_v7  ;;  %v114_v13 = vld [vmem:[#allocation2 + $0x140] sm:$0xff]  ;;  %922 = vmatprep.subr.bf16.mxu0 %v5366_v3  ;;  %v5360_v14 = vcombine.high %v123_v11, %v127_v12  ;;  %v115_v16 = vld [vmem:[#allocation2 + $0x148] sm:$0xff]  ;;  %1035 = vmatprep.subr.bf16.mxu1 %v5368_v8  ;;  %v5357_v18 = vcombine.low %v122_v6, %v126_v7 }
  0x21   :  { %v118_v15 = vld [vmem:[#allocation2 + $0x160] sm:$0xff]  ;;  %v119_v17 = vld [vmem:[#allocation2 + $0x168] sm:$0xff]  ;;  %923 = vmatpush1.bf16.msra.mxu0 %v5365_v5  ;;  %1036 = vmatpush1.bf16.msra.mxu1 %v5367_v9  ;;  %v5359_v19 = vcombine.low %v123_v11, %v127_v12 }
  0x22   :  { %924 = vmatprep.subr.bf16.mxu0 %v5358_v10  ;;  %v5350_v20 = vcombine.high %v114_v13, %v118_v15  ;;  %1037 = vmatprep.subr.bf16.mxu1 %v5360_v14  ;;  %v5352_v21 = vcombine.high %v115_v16, %v119_v17  ;;  %v106_v22 = vld [vmem:[#allocation2 + $0x100] sm:$0xff]  ;;  %v107_v24 = vld [vmem:[#allocation2 + $0x108] sm:$0xff]  ;;  %v5349_v26 = vcombine.low %v114_v13, %v118_v15 }
  0x23   :  { %v110_v23 = vld [vmem:[#allocation2 + $0x120] sm:$0xff]  ;;  %v111_v25 = vld [vmem:[#allocation2 + $0x128] sm:$0xff]  ;;  %v5351_v27 = vcombine.low %v115_v16, %v119_v17 }
  0x24   :  { %v5342_v28 = vcombine.high %v106_v22, %v110_v23  ;;  %v5344_v29 = vcombine.high %v107_v24, %v111_v25  ;;  %v98_v30 = vld [vmem:[#allocation2 + $0xc0] sm:$0xff]  ;;  %v99_v32 = vld [vmem:[#allocation2 + $0xc8] sm:$0xff]  ;;  %v5341_v34 = vcombine.low %v106_v22, %v110_v23  ;;  %v5343_v35 = vcombine.low %v107_v24, %v111_v25 }
  0x25   :  { %925 = vmatpush1.bf16.msra.mxu0 %v5357_v18  ;;  %1038 = vmatpush1.bf16.msra.mxu1 %v5359_v19  ;;  %v102_v31 = vld [vmem:[#allocation2 + $0xe0] sm:$0xff]  ;;  %v103_v33 = vld [vmem:[#allocation2 + $0xe8] sm:$0xff] }
  0x26   :  { %926 = vmatprep.subr.bf16.mxu0 %v5350_v20  ;;  %1039 = vmatprep.subr.bf16.mxu1 %v5352_v21  ;;  %v5334_v36 = vcombine.high %v98_v30, %v102_v31  ;;  %v5336_v37 = vcombine.high %v99_v32, %v103_v33  ;;  %v90_v38 = vld [vmem:[#allocation2 + $0x80] sm:$0xff]  ;;  %v91_v40 = vld [vmem:[#allocation2 + $0x88] sm:$0xff]  ;;  %v5333_v42 = vcombine.low %v98_v30, %v102_v31 }
  0x27   :  { %v94_v39 = vld [vmem:[#allocation2 + $0xa0] sm:$0xff]  ;;  %v95_v41 = vld [vmem:[#allocation2 + $0xa8] sm:$0xff]  ;;  %v5335_v43 = vcombine.low %v99_v32, %v103_v33 }
  0x28   :  { %v5326_v44 = vcombine.high %v90_v38, %v94_v39  ;;  %v5328_v45 = vcombine.high %v91_v40, %v95_v41  ;;  %v82_v46 = vld [vmem:[#allocation2 + $0x40] sm:$0xff]  ;;  %v83_v48 = vld [vmem:[#allocation2 + $0x48] sm:$0xff]  ;;  %v5325_v50 = vcombine.low %v90_v38, %v94_v39  ;;  %v5327_v51 = vcombine.low %v91_v40, %v95_v41 }
  0x29   :  { %927 = vmatpush1.bf16.msra.mxu0 %v5349_v26  ;;  %1040 = vmatpush1.bf16.msra.mxu1 %v5351_v27  ;;  %v86_v47 = vld [vmem:[#allocation2 + $0x60] sm:$0xff]  ;;  %v87_v49 = vld [vmem:[#allocation2 + $0x68] sm:$0xff] }
  0x2a   :  { %928 = vmatprep.subr.bf16.mxu0 %v5342_v28  ;;  %1041 = vmatprep.subr.bf16.mxu1 %v5344_v29  ;;  %v5318_v52 = vcombine.high %v82_v46, %v86_v47  ;;  %v5320_v53 = vcombine.high %v83_v48, %v87_v49  ;;  %v74_v54 = vld [vmem:[#allocation2] sm:$0xff]  ;;  %v75_v57 = vld [vmem:[#allocation2 + $0x8] sm:$0xff]  ;;  %v5317_v59 = vcombine.low %v82_v46, %v86_v47 }
  0x2b   :  { %v78_v55 = vld [vmem:[#allocation2 + $0x20] sm:$0xff]  ;;  %v79_v58 = vld [vmem:[#allocation2 + $0x28] sm:$0xff]  ;;  %v5319_v60 = vcombine.low %v83_v48, %v87_v49 }
  0x2c   :  { %v5860_v56 = vld [vmem:[%s7672_s0 + $0x4] ss:$8 sps:$4 sm:$0xff]   ;;  %v5310_v61 = vcombine.high %v74_v54, %v78_v55  ;;  %v5312_v62 = vcombine.high %v75_v57, %v79_v58  ;;  %v5309_v3 = vcombine.low %v74_v54, %v78_v55  ;;  %v5311_v4 = vcombine.low %v75_v57, %v79_v58 }
  0x2d   :  { %929 = vmatpush1.bf16.msra.mxu0 %v5341_v34  ;;  %1042 = vmatpush1.bf16.msra.mxu1 %v5343_v35  ;;  %v194_v63 = vld [vmem:[#allocation2 + $0x3c0] sm:$0xff]  ;;  %v195_v1 = vld [vmem:[#allocation2 + $0x3c8] sm:$0xff] }
  0x2e   :  { %930 = vmatprep.subr.bf16.mxu0 %v5334_v36  ;;  %1043 = vmatprep.subr.bf16.mxu1 %v5336_v37  ;;  %v198_v0 = vld [vmem:[#allocation2 + $0x3e0] sm:$0xff]  ;;  %v199_v2 = vld [vmem:[#allocation2 + $0x3e8] sm:$0xff] }
  0x2f   :  { %954 = vmatprep.mubr.bf16.mxu0 %v5860_v56  ;;  %1067 = vmatprep.mubr.bf16.mxu1 %v5860_v56  ;;  %v5430_v5 = vcombine.high %v194_v63, %v198_v0  ;;  %v5432_v6 = vcombine.high %v195_v1, %v199_v2  ;;  %v186_v7 = vld [vmem:[#allocation2 + $0x380] sm:$0xff]  ;;  %v187_v9 = vld [vmem:[#allocation2 + $0x388] sm:$0xff]  ;;  %v5429_v11 = vcombine.low %v194_v63, %v198_v0  ;;  %v133_v0 = vld [vmem:[#allocation2 + $0x1d8] sm:$0xff] }
  0x30   :  { %v190_v8 = vld [vmem:[#allocation2 + $0x3a0] sm:$0xff]  ;;  %v191_v10 = vld [vmem:[#allocation2 + $0x3a8] sm:$0xff]  ;;  %v5431_v12 = vcombine.low %v195_v1, %v199_v2  ;;  %v137_v1 = vld [vmem:[#allocation2 + $0x1f8] sm:$0xff] }
  0x31   :  { %931 = vmatpush1.bf16.msra.mxu0 %v5333_v42  ;;  %1044 = vmatpush1.bf16.msra.mxu1 %v5335_v43  ;;  %v5422_v13 = vcombine.high %v186_v7, %v190_v8  ;;  %v5424_v14 = vcombine.high %v187_v9, %v191_v10  ;;  %v178_v15 = vld [vmem:[#allocation2 + $0x340] sm:$0xff]  ;;  %v179_v17 = vld [vmem:[#allocation2 + $0x348] sm:$0xff]  ;;  %v5421_v19 = vcombine.low %v186_v7, %v190_v8  ;;  %v124_v7 = vld [vmem:[#allocation2 + $0x190] sm:$0xff] }
  0x32   :  { %932 = vmatprep.subr.bf16.mxu0 %v5326_v44  ;;  %1045 = vmatprep.subr.bf16.mxu1 %v5328_v45  ;;  %v182_v16 = vld [vmem:[#allocation2 + $0x360] sm:$0xff]  ;;  %v183_v18 = vld [vmem:[#allocation2 + $0x368] sm:$0xff]  ;;  %v5423_v20 = vcombine.low %v187_v9, %v191_v10  ;;  %v128_v8 = vld [vmem:[#allocation2 + $0x1b0] sm:$0xff] }
  0x33   :  { %v5414_v21 = vcombine.high %v178_v15, %v182_v16  ;;  %v5416_v22 = vcombine.high %v179_v17, %v183_v18  ;;  %v170_v23 = vld [vmem:[#allocation2 + $0x300] sm:$0xff]  ;;  %v171_v25 = vld [vmem:[#allocation2 + $0x308] sm:$0xff]  ;;  %v5413_v27 = vcombine.low %v178_v15, %v182_v16  ;;  %v5415_v28 = vcombine.low %v179_v17, %v183_v18  ;;  %v125_v10 = vld [vmem:[#allocation2 + $0x198] sm:$0xff] }
  0x34   :  { %v174_v24 = vld [vmem:[#allocation2 + $0x320] sm:$0xff]  ;;  %v175_v26 = vld [vmem:[#allocation2 + $0x328] sm:$0xff]  ;;  %v6495_v15 = vld [vmem:[%s7672_s0 + $0x14] ss:$8 sps:$4 sm:$0xff]  }
  0x35   :  { %933 = vmatpush1.bf16.msra.mxu0 %v5325_v50  ;;  %1046 = vmatpush1.bf16.msra.mxu1 %v5327_v51  ;;  %v5406_v29 = vcombine.high %v170_v23, %v174_v24  ;;  %v5408_v30 = vcombine.high %v171_v25, %v175_v26  ;;  %v162_v31 = vld [vmem:[#allocation2 + $0x2c0] sm:$0xff]  ;;  %v163_v33 = vld [vmem:[#allocation2 + $0x2c8] sm:$0xff]  ;;  %v5405_v35 = vcombine.low %v170_v23, %v174_v24  ;;  %v116_v17 = vld [vmem:[#allocation2 + $0x150] sm:$0xff] }
  0x36   :  { %934 = vmatprep.subr.bf16.mxu0 %v5318_v52  ;;  %1047 = vmatprep.subr.bf16.mxu1 %v5320_v53  ;;  %v166_v32 = vld [vmem:[#allocation2 + $0x2e0] sm:$0xff]  ;;  %v167_v34 = vld [vmem:[#allocation2 + $0x2e8] sm:$0xff]  ;;  %v5407_v36 = vcombine.low %v171_v25, %v175_v26  ;;  %v120_v18 = vld [vmem:[#allocation2 + $0x170] sm:$0xff] }
  0x37   :  { %v5398_v37 = vcombine.high %v162_v31, %v166_v32  ;;  %v5400_v38 = vcombine.high %v163_v33, %v167_v34  ;;  %v154_v39 = vld [vmem:[#allocation2 + $0x280] sm:$0xff]  ;;  %v155_v41 = vld [vmem:[#allocation2 + $0x288] sm:$0xff]  ;;  %v5397_v43 = vcombine.low %v162_v31, %v166_v32  ;;  %v5399_v44 = vcombine.low %v163_v33, %v167_v34  ;;  %v6502_v23 = vld [vmem:[%s7672_s0 + $0x10] ss:$8 sps:$4 sm:$0xff]  }
  0x38   :  { %v158_v40 = vld [vmem:[#allocation2 + $0x2a0] sm:$0xff]  ;;  %v159_v42 = vld [vmem:[#allocation2 + $0x2a8] sm:$0xff]  ;;  %v5354_v24 = vcombine.high %v116_v17, %v120_v18  ;;  %v108_v26 = vld [vmem:[#allocation2 + $0x110] sm:$0xff] }
  0x39   :  { %935 = vmatpush1.bf16.msra.mxu0 %v5317_v59  ;;  %1048 = vmatpush1.bf16.msra.mxu1 %v5319_v60  ;;  %v5390_v45 = vcombine.high %v154_v39, %v158_v40  ;;  %v5392_v46 = vcombine.high %v155_v41, %v159_v42  ;;  %v146_v47 = vld [vmem:[#allocation2 + $0x240] sm:$0xff]  ;;  %v147_v49 = vld [vmem:[#allocation2 + $0x248] sm:$0xff]  ;;  %v5389_v51 = vcombine.low %v154_v39, %v158_v40  ;;  %v132_v60 = vld [vmem:[#allocation2 + $0x1d0] sm:$0xff] }
  0x3a   :  { %936 = vmatprep.subr.bf16.mxu0 %v5310_v61  ;;  %1049 = vmatprep.subr.bf16.mxu1 %v5312_v62  ;;  %v150_v48 = vld [vmem:[#allocation2 + $0x260] sm:$0xff]  ;;  %v151_v50 = vld [vmem:[#allocation2 + $0x268] sm:$0xff]  ;;  %v5391_v54 = vcombine.low %v155_v41, %v159_v42  ;;  %v136_v61 = vld [vmem:[#allocation2 + $0x1f0] sm:$0xff] }
  0x3b   :  { %v138_v52 = vld [vmem:[#allocation2 + $0x200] sm:$0xff]  ;;  %v5382_v55 = vcombine.high %v146_v47, %v150_v48  ;;  %v139_v56 = vld [vmem:[#allocation2 + $0x208] sm:$0xff]  ;;  %v5384_v58 = vcombine.high %v147_v49, %v151_v50  ;;  %v5381_v59 = vcombine.low %v146_v47, %v150_v48  ;;  %v5383_v62 = vcombine.low %v147_v49, %v151_v50  ;;  %v97_v47 = vld [vmem:[#allocation2 + $0xb8] sm:$0xff] }
  0x3c   :  { %v142_v53 = vld [vmem:[#allocation2 + $0x220] sm:$0xff]  ;;  %v143_v57 = vld [vmem:[#allocation2 + $0x228] sm:$0xff] }
  0x3d   :  { %937 = vmatpush1.bf16.msra.mxu0 %v5309_v3  ;;  %1050 = vmatpush1.bf16.msra.mxu1 %v5311_v4  ;;  %v5374_v63 = vcombine.high %v138_v52, %v142_v53  ;;  %v5376_v2 = vcombine.high %v139_v56, %v143_v57  ;;  %v5373_v3 = vcombine.low %v138_v52, %v142_v53  ;;  %v6490_v9 = vld [vmem:[%s7672_s0] ss:$8 sps:$4 sm:$0xff]   ;;  %v6509_v33 = vld [vmem:[%s7672_s0 + $0x24] ss:$8 sps:$4 sm:$0xff]   ;;  %v84_v53 = vld [vmem:[#allocation2 + $0x50] sm:$0xff] }
  0x3e   :  { %938 = vmatprep.subr.bf16.mxu0 %v5430_v5  ;;  %1051 = vmatprep.subr.bf16.mxu1 %v5432_v6  ;;  %v5375_v4 = vcombine.low %v139_v56, %v143_v57  ;;  %v5370_v5 = vcombine.high %v132_v60, %v136_v61  ;;  %v5372_v6 = vcombine.high %v133_v0, %v137_v1  ;;  %v6516_v41 = vld [vmem:[%s7672_s0 + $0x20] ss:$8 sps:$4 sm:$0xff]   ;;  %v89_v56 = vld [vmem:[#allocation2 + $0x78] sm:$0xff] }
  0x41   :  { %939 = vmatpush2.bf16.msra.mxu0 %v5429_v11  ;;  %1052 = vmatpush2.bf16.msra.mxu1 %v5431_v12  ;;  %v129_v11 = vld [vmem:[#allocation2 + $0x1b8] sm:$0xff]  ;;  %v5369_v12 = vcombine.low %v132_v60, %v136_v61 }
  0x42   :  { %940 = vmatprep.subr.bf16.mxu0 %v5422_v13  ;;  %1053 = vmatprep.subr.bf16.mxu1 %v5424_v14  ;;  %v5371_v13 = vcombine.low %v133_v0, %v137_v1  ;;  %v5362_v14 = vcombine.high %v124_v7, %v128_v8  ;;  %v5364_v16 = vcombine.high %v125_v10, %v129_v11  ;;  %v77_v0 = vld [vmem:[#allocation2 + $0x18] sm:$0xff] }
  0x43   :  { %v81_v1 = vld [vmem:[#allocation2 + $0x38] sm:$0xff] }
  0x45   :  { %941 = vmatpush2.bf16.msra.mxu0 %v5421_v19  ;;  %1054 = vmatpush2.bf16.msra.mxu1 %v5423_v20  ;;  %v117_v19 = vld [vmem:[#allocation2 + $0x158] sm:$0xff] }
  0x46   :  { %942 = vmatprep.subr.bf16.mxu0 %v5414_v21  ;;  %1055 = vmatprep.subr.bf16.mxu1 %v5416_v22  ;;  %v121_v20 = vld [vmem:[#allocation2 + $0x178] sm:$0xff]  ;;  %v5361_v21 = vcombine.low %v124_v7, %v128_v8  ;;  %v5363_v22 = vcombine.low %v125_v10, %v129_v11  ;;  %v5316_v11 = vcombine.high %v77_v0, %v81_v1 }
  0x47   :  { %v5356_v25 = vcombine.high %v117_v19, %v121_v20  ;;  %v5355_v31 = vcombine.low %v117_v19, %v121_v20  ;;  %v197_v8 = vld [vmem:[#allocation2 + $0x3d8] sm:$0xff] }
  0x48   :  { %v201_v10 = vld [vmem:[#allocation2 + $0x3f8] sm:$0xff] }
  0x49   :  { %943 = vmatpush2.bf16.msra.mxu0 %v5413_v27  ;;  %1056 = vmatpush2.bf16.msra.mxu1 %v5415_v28  ;;  %v112_v27 = vld [vmem:[#allocation2 + $0x130] sm:$0xff]  ;;  %v109_v28 = vld [vmem:[#allocation2 + $0x118] sm:$0xff] }
  0x4a   :  { %944 = vmatprep.subr.bf16.mxu0 %v5406_v29  ;;  %1057 = vmatprep.subr.bf16.mxu1 %v5408_v30  ;;  %v113_v29 = vld [vmem:[#allocation2 + $0x138] sm:$0xff]  ;;  %v5353_v30 = vcombine.low %v116_v17, %v120_v18  ;;  %v5346_v32 = vcombine.high %v108_v26, %v112_v27  ;;  %v5345_v39 = vcombine.low %v108_v26, %v112_v27  ;;  %v6544_v17 = vld [vmem:[%s7672_s0 + $0x40] ss:$8 sps:$4 sm:$0xff]   ;;  %v184_v26 = vld [vmem:[#allocation2 + $0x370] sm:$0xff] }
  0x4b   :  { %v5348_v34 = vcombine.high %v109_v28, %v113_v29  ;;  %v5347_v40 = vcombine.low %v109_v28, %v113_v29  ;;  %v189_v19 = vld [vmem:[#allocation2 + $0x398] sm:$0xff]  ;;  %v5435_v27 = vcombine.low %v197_v8, %v201_v10 }
  0x4c   :  { %v193_v20 = vld [vmem:[#allocation2 + $0x3b8] sm:$0xff] }
  0x4d   :  { %945 = vmatpush2.bf16.msra.mxu0 %v5405_v35  ;;  %1058 = vmatpush2.bf16.msra.mxu1 %v5407_v36  ;;  %v100_v35 = vld [vmem:[#allocation2 + $0xd0] sm:$0xff]  ;;  %v181_v29 = vld [vmem:[#allocation2 + $0x358] sm:$0xff] }
  0x4e   :  { %946 = vmatprep.subr.bf16.mxu0 %v5398_v37  ;;  %1059 = vmatprep.subr.bf16.mxu1 %v5400_v38  ;;  %v104_v36 = vld [vmem:[#allocation2 + $0xf0] sm:$0xff]  ;;  %v101_v37 = vld [vmem:[#allocation2 + $0xd8] sm:$0xff] }
  0x4f   :  { %v105_v38 = vld [vmem:[#allocation2 + $0xf8] sm:$0xff]  ;;  %v5338_v42 = vcombine.high %v100_v35, %v104_v36  ;;  %v5337_v48 = vcombine.low %v100_v35, %v104_v36  ;;  %v176_v35 = vld [vmem:[#allocation2 + $0x330] sm:$0xff]  ;;  %v5427_v36 = vcombine.low %v189_v19, %v193_v20 }
  0x50   :  { %v5339_v49 = vcombine.low %v101_v37, %v105_v38 }
  0x51   :  { %947 = vmatpush2.bf16.msra.mxu0 %v5397_v43  ;;  %1060 = vmatpush2.bf16.msra.mxu1 %v5399_v44  ;;  %v5340_v43 = vcombine.high %v101_v37, %v105_v38  ;;  %v92_v44 = vld [vmem:[#allocation2 + $0x90] sm:$0xff] }
  0x52   :  { %948 = vmatprep.subr.bf16.mxu0 %v5390_v45  ;;  %1061 = vmatprep.subr.bf16.mxu1 %v5392_v46  ;;  %v96_v45 = vld [vmem:[#allocation2 + $0xb0] sm:$0xff]  ;;  %v93_v46 = vld [vmem:[#allocation2 + $0x98] sm:$0xff] }
  0x53   :  { %v5330_v50 = vcombine.high %v92_v44, %v96_v45  ;;  %v5332_v52 = vcombine.high %v93_v46, %v97_v47  ;;  %v5329_v57 = vcombine.low %v92_v44, %v96_v45  ;;  %v6558_v37 = vld [vmem:[%s7672_s0 + $0x50] ss:$8 sps:$4 sm:$0xff]   ;;  %v6565_v44 = vld [vmem:[%s7672_s0 + $0x64] ss:$8 sps:$4 sm:$0xff]  }
  0x54   :  { %v164_v45 = vld [vmem:[#allocation2 + $0x2d0] sm:$0xff] }
  0x55   :  { %949 = vmatpush2.bf16.msra.mxu0 %v5389_v51  ;;  %1062 = vmatpush2.bf16.msra.mxu1 %v5391_v54  ;;  %v6523_v51 = vld [vmem:[%s7672_s0 + $0x34] ss:$8 sps:$4 sm:$0xff]  }
  0x56   :  { %950 = vmatprep.subr.bf16.mxu0 %v5382_v55  ;;  %1063 = vmatprep.subr.bf16.mxu1 %v5384_v58  ;;  %v88_v54 = vld [vmem:[#allocation2 + $0x70] sm:$0xff]  ;;  %v85_v55 = vld [vmem:[#allocation2 + $0x58] sm:$0xff]  ;;  %v5331_v58 = vcombine.low %v93_v46, %v97_v47 }
  0x57   :  { %v5322_v60 = vcombine.high %v84_v53, %v88_v54  ;;  %v5324_v61 = vcombine.high %v85_v55, %v89_v56  ;;  %v168_v46 = vld [vmem:[#allocation2 + $0x2f0] sm:$0xff] }
  0x59   :  { %951 = vmatpush2.bf16.msra.mxu0 %v5381_v59  ;;  %1064 = vmatpush2.bf16.msra.mxu1 %v5383_v62  ;;  %v6530_v59 = vld [vmem:[%s7672_s0 + $0x30] ss:$8 sps:$4 sm:$0xff]  }
  0x5a   :  { %952 = vmatprep.subr.bf16.mxu0 %v5374_v63  ;;  %1065 = vmatprep.subr.bf16.mxu1 %v5376_v2  ;;  %v76_v62 = vld [vmem:[#allocation2 + $0x10] sm:$0xff]  ;;  %v5321_v2 = vcombine.low %v84_v53, %v88_v54 }
  0x5b   :  { %v80_v63 = vld [vmem:[#allocation2 + $0x30] sm:$0xff] }
  0x5c   :  { %v5314_v7 = vcombine.high %v76_v62, %v80_v63  ;;  %v156_v54 = vld [vmem:[#allocation2 + $0x290] sm:$0xff] }
  0x5d   :  { %953 = vmatpush2.bf16.msra.mxu0 %v5373_v3  ;;  %1066 = vmatpush2.bf16.msra.mxu1 %v5375_v4  ;;  %v6537_v3 = vld [vmem:[%s7672_s0 + $0x44] ss:$8 sps:$4 sm:$0xff]   ;;  %v196_v4 = vld [vmem:[#allocation2 + $0x3d0] sm:$0xff] }
  0x5e   :  { %1148 = vmatprep.subr.bf16.mxu0 %v5370_v5  ;;  %1261 = vmatprep.subr.bf16.mxu1 %v5372_v6  ;;  %v200_v5 = vld [vmem:[#allocation2 + $0x3f0] sm:$0xff]  ;;  %v5323_v6 = vcombine.low %v85_v55, %v89_v56 }
  0x5f   :  { %v5434_v18 = vcombine.high %v196_v4, %v200_v5  ;;  %v160_v55 = vld [vmem:[#allocation2 + $0x2b0] sm:$0xff] }
  0x60   :  { %955 = vmatmul.mubr.bf16.vlgmr.msra.gmra.mxu0 %v6490_v9  ;;  %1068 = vmatmul.mubr.bf16.vlgmr.msra.gmra.mxu1 %v6490_v9 }
  0x61   :  { %1149 = vmatpush1.bf16.msra.mxu0 %v5369_v12  ;;  %1262 = vmatpush1.bf16.msra.mxu1 %v5371_v13  ;;  %v5313_v12 = vcombine.low %v76_v62, %v80_v63  ;;  %v188_v13 = vld [vmem:[#allocation2 + $0x390] sm:$0xff]  ;;  %v5401_v63 = vcombine.low %v164_v45, %v168_v46 }
  0x62   :  { %1150 = vmatprep.subr.bf16.mxu0 %v5362_v14  ;;  %1263 = vmatprep.subr.bf16.mxu1 %v5364_v16  ;;  %v192_v14 = vld [vmem:[#allocation2 + $0x3b0] sm:$0xff]  ;;  %v5315_v16 = vcombine.low %v77_v0, %v81_v1 }
  0x63   :  { %964 = vmatprep.mubr.bf16.mxu0 %v6495_v15  ;;  %1077 = vmatprep.mubr.bf16.mxu1 %v6495_v15  ;;  %v5426_v28 = vcombine.high %v188_v13, %v192_v14  ;;  %v6579_v0 = vld [vmem:[%s7672_s0 + $0x74] ss:$8 sps:$4 sm:$0xff]  }
  0x64   :  { %v148_v1 = vld [vmem:[#allocation2 + $0x250] sm:$0xff] }
  0x65   :  { %1151 = vmatpush1.bf16.msra.mxu0 %v5361_v21  ;;  %1264 = vmatpush1.bf16.msra.mxu1 %v5363_v22  ;;  %v5436_v21 = vcombine.high %v197_v8, %v201_v10  ;;  %v5433_v22 = vcombine.low %v196_v4, %v200_v5  ;;  %v5394_v5 = vcombine.high %v156_v54, %v160_v55 }
  0x66   :  { %1152 = vmatprep.subr.bf16.mxu0 %v5354_v24  ;;  %1265 = vmatprep.subr.bf16.mxu1 %v5356_v25  ;;  %v6551_v24 = vld [vmem:[%s7672_s0 + $0x54] ss:$8 sps:$4 sm:$0xff]   ;;  %v5393_v10 = vcombine.low %v156_v54, %v160_v55 }
  0x67   :  { %v180_v25 = vld [vmem:[#allocation2 + $0x350] sm:$0xff] }
  0x68   :  { %965 = vmatmul.mubr.bf16.gmra.mxu0 %v6502_v23  ;;  %1078 = vmatmul.mubr.bf16.gmra.mxu1 %v6502_v23  ;;  %v5418_v38 = vcombine.high %v180_v25, %v184_v26  ;;  %v5919_v54 = vld [vmem:[#allocation4 + $0x244] ss:$16 sps:$4 sm:$0xff]  }
  0x69   :  { %1153 = vmatpush1.bf16.msra.mxu0 %v5353_v30  ;;  %1266 = vmatpush1.bf16.msra.mxu1 %v5355_v31  ;;  %v185_v30 = vld [vmem:[#allocation2 + $0x378] sm:$0xff]  ;;  %v5428_v31 = vcombine.high %v189_v19, %v193_v20  ;;  %v5922_v55 = vld [vmem:[#allocation4 + $0x24] ss:$16 sps:$4 sm:$0xff]  }
  0x6a   :  { %1154 = vmatprep.subr.bf16.mxu0 %v5346_v32  ;;  %1267 = vmatprep.subr.bf16.mxu1 %v5348_v34  ;;  %v5425_v32 = vcombine.low %v188_v13, %v192_v14  ;;  %v172_v34 = vld [vmem:[#allocation2 + $0x310] sm:$0xff]  ;;  %v5419_v47 = vcombine.low %v181_v29, %v185_v30  ;;  %v145_v19 = vld [vmem:[#allocation2 + $0x238] sm:$0xff] }
  0x6b   :  { %974 = vmatprep.mubr.bf16.mxu0 %v6509_v33  ;;  %1087 = vmatprep.mubr.bf16.mxu1 %v6509_v33  ;;  %v5409_v53 = vcombine.low %v172_v34, %v176_v35  ;;  %v6586_v14 = vld [vmem:[%s7672_s0 + $0x70] ss:$8 sps:$4 sm:$0xff]  }
  0x6d   :  { %1155 = vmatpush1.bf16.msra.mxu0 %v5345_v39  ;;  %1268 = vmatpush1.bf16.msra.mxu1 %v5347_v40  ;;  %v173_v39 = vld [vmem:[#allocation2 + $0x318] sm:$0xff] }
  0x6e   :  { %1156 = vmatprep.subr.bf16.mxu0 %v5338_v42  ;;  %1269 = vmatprep.subr.bf16.mxu1 %v5340_v43  ;;  %v177_v40 = vld [vmem:[#allocation2 + $0x338] sm:$0xff]  ;;  %v5420_v42 = vcombine.high %v181_v29, %v185_v30  ;;  %v5417_v43 = vcombine.low %v180_v25, %v184_v26  ;;  %v5889_v29 = vld [vmem:[#allocation4 + $0x2e4] ss:$16 sps:$4 sm:$0xff]  }
  0x6f   :  { %v5411_v56 = vcombine.low %v173_v39, %v177_v40 }
  0x70   :  { %975 = vmatmul.mubr.bf16.gmra.mxu0 %v6516_v41  ;;  %1088 = vmatmul.mubr.bf16.gmra.mxu1 %v6516_v41 }
  0x71   :  { %1157 = vmatpush1.bf16.msra.mxu0 %v5337_v48  ;;  %1270 = vmatpush1.bf16.msra.mxu1 %v5339_v49  ;;  %v5410_v48 = vcombine.high %v172_v34, %v176_v35  ;;  %v165_v49 = vld [vmem:[#allocation2 + $0x2d8] sm:$0xff]  ;;  %v5887_v34 = vld [vmem:[#allocation4 + $0x2e0] ss:$16 sps:$4 sm:$0xff]   ;;  %v5892_v35 = vld [vmem:[#allocation4 + $0xc4] ss:$16 sps:$4 sm:$0xff]  }
  0x72   :  { %1158 = vmatprep.subr.bf16.mxu0 %v5330_v50  ;;  %1271 = vmatprep.subr.bf16.mxu1 %v5332_v52  ;;  %v169_v50 = vld [vmem:[#allocation2 + $0x2f8] sm:$0xff]  ;;  %v5412_v52 = vcombine.high %v173_v39, %v177_v40  ;;  %v5893_v39 = vld [vmem:[#allocation4 + $0x2c0] ss:$16 sps:$4 sm:$0xff]   ;;  %v5898_v40 = vld [vmem:[#allocation4 + $0xa4] ss:$16 sps:$4 sm:$0xff]  }
  0x73   :  { %984 = vmatprep.mubr.bf16.mxu0 %v6523_v51  ;;  %1097 = vmatprep.mubr.bf16.mxu1 %v6523_v51  ;;  %v5404_v62 = vcombine.high %v165_v49, %v169_v50  ;;  %v5403_v4 = vcombine.low %v165_v49, %v169_v50  ;;  %v5913_v49 = vld [vmem:[#allocation4 + $0x264] ss:$16 sps:$4 sm:$0xff]   ;;  %v5908_v50 = vld [vmem:[#allocation4 + $0x60] ss:$16 sps:$4 sm:$0xff]  }
  0x75   :  { %1159 = vmatpush1.bf16.msra.mxu0 %v5329_v57  ;;  %1272 = vmatpush1.bf16.msra.mxu1 %v5331_v58  ;;  %v6572_v57 = vld [vmem:[%s7672_s0 + $0x60] ss:$8 sps:$4 sm:$0xff]   ;;  %v5402_v58 = vcombine.high %v164_v45, %v168_v46  ;;  %v5904_v46 = vld [vmem:[#allocation4 + $0x84] ss:$16 sps:$4 sm:$0xff]  }
  0x76   :  { %1160 = vmatprep.subr.bf16.mxu0 %v5322_v60  ;;  %1273 = vmatprep.subr.bf16.mxu1 %v5324_v61  ;;  %v157_v60 = vld [vmem:[#allocation2 + $0x298] sm:$0xff]  ;;  %v5899_v45 = vld [vmem:[#allocation4 + $0x2a0] ss:$16 sps:$4 sm:$0xff]  }
  0x77   :  { %v161_v61 = vld [vmem:[#allocation2 + $0x2b8] sm:$0xff] }
  0x78   :  { %985 = vmatmul.mubr.bf16.gmra.mxu0 %v6530_v59  ;;  %1098 = vmatmul.mubr.bf16.gmra.mxu1 %v6530_v59  ;;  %v5396_v8 = vcombine.high %v157_v60, %v161_v61  ;;  %v5395_v13 = vcombine.low %v157_v60, %v161_v61  ;;  %v5923_v60 = vld [vmem:[#allocation4 + $0x220] ss:$16 sps:$4 sm:$0xff]   ;;  %v5928_v61 = vld [vmem:[#allocation4 + $0x4] ss:$16 sps:$4 sm:$0xff]  }
  0x79   :  { %1161 = vmatpush1.bf16.msra.mxu0 %v5321_v2  ;;  %1274 = vmatpush1.bf16.msra.mxu1 %v5323_v6  ;;  %v152_v2 = vld [vmem:[#allocation2 + $0x270] sm:$0xff]  ;;  %v149_v6 = vld [vmem:[#allocation2 + $0x258] sm:$0xff] }
  0x7a   :  { %1162 = vmatprep.subr.bf16.mxu0 %v5314_v7  ;;  %1275 = vmatprep.subr.bf16.mxu1 %v5316_v11  ;;  %v153_v7 = vld [vmem:[#allocation2 + $0x278] sm:$0xff]  ;;  %v140_v11 = vld [vmem:[#allocation2 + $0x210] sm:$0xff] }
  0x7b   :  { %994 = vmatprep.mubr.bf16.mxu0 %v6537_v3  ;;  %1107 = vmatprep.mubr.bf16.mxu1 %v6537_v3  ;;  %v5388_v20 = vcombine.high %v149_v6, %v153_v7 }
  0x7d   :  { %1163 = vmatpush1.bf16.msra.mxu0 %v5313_v12  ;;  %1276 = vmatpush1.bf16.msra.mxu1 %v5315_v16  ;;  %v144_v12 = vld [vmem:[#allocation2 + $0x230] sm:$0xff]  ;;  %v5386_v16 = vcombine.high %v148_v1, %v152_v2 }
  0x7e   :  { %1164 = vmatprep.subr.bf16.mxu0 %v5434_v18  ;;  %1277 = vmatprep.subr.bf16.mxu1 %v5436_v21  ;;  %v141_v18 = vld [vmem:[#allocation2 + $0x218] sm:$0xff]  ;;  %v5385_v21 = vcombine.low %v148_v1, %v152_v2  ;;  %v5378_v25 = vcombine.high %v140_v11, %v144_v12  ;;  %v5937_v1 = vld [vmem:[#allocation4 + $0x3e4] ss:$16 sps:$4 sm:$0xff]   ;;  %v5932_v2 = vld [vmem:[#allocation4 + $0x1e0] ss:$16 sps:$4 sm:$0xff]  }
  0x7f   :  { %v5380_v26 = vcombine.high %v141_v18, %v145_v19  ;;  %v5379_v30 = vcombine.low %v141_v18, %v145_v19  ;;  %v5961_v18 = vld [vmem:[#allocation4 + $0x364] ss:$16 sps:$4 sm:$0xff]   ;;  %v5956_v19 = vld [vmem:[#allocation4 + $0x160] ss:$16 sps:$4 sm:$0xff]  }
  0x80   :  { %995 = vmatmul.mubr.bf16.gmra.mxu0 %v6544_v17  ;;  %1108 = vmatmul.mubr.bf16.gmra.mxu1 %v6544_v17 }
  0x81   :  { %1165 = vmatpush2.bf16.msra.mxu0 %v5433_v22  ;;  %1278 = vmatpush2.bf16.msra.mxu1 %v5435_v27  ;;  %v5387_v22 = vcombine.low %v149_v6, %v153_v7  ;;  %v5886_v27 = vld [vmem:[#allocation4 + $0xe4] ss:$16 sps:$4 sm:$0xff]  }
  0x82   :  { %1166 = vmatprep.subr.bf16.mxu0 %v5426_v28  ;;  %1279 = vmatprep.subr.bf16.mxu1 %v5428_v31  ;;  %v5377_v28 = vcombine.low %v140_v11, %v144_v12  ;;  %v6382_v31 = vld [vmem:[%s7672_s0 + $0x4] ss:$8 sps:$4 sm:$0xff]   ;;  %v5947_v11 = vld [vmem:[#allocation4 + $0x3a0] ss:$16 sps:$4 sm:$0xff]  }
  0x83   :  { %1004 = vmatprep.mubr.bf16.mxu0 %v6551_v24  ;;  %1117 = vmatprep.mubr.bf16.mxu1 %v6551_v24  ;;  %v5943_v6 = vld [vmem:[#allocation4 + $0x3c4] ss:$16 sps:$4 sm:$0xff]  }
  0x84   :  { %v5946_v7 = vld [vmem:[#allocation4 + $0x1a4] ss:$16 sps:$4 sm:$0xff]  }
  0x85   :  { %1167 = vmatpush2.bf16.msra.mxu0 %v5425_v32  ;;  %1280 = vmatpush2.bf16.msra.mxu1 %v5427_v36  ;;  %v5884_v32 = vld [vmem:[#allocation4 + $0xe0] ss:$16 sps:$4 sm:$0xff]   ;;  %v5895_v36 = vld [vmem:[#allocation4 + $0x2c4] ss:$16 sps:$4 sm:$0xff]  }
  0x86   :  { %1168 = vmatprep.subr.bf16.mxu0 %v5418_v38  ;;  %1281 = vmatprep.subr.bf16.mxu1 %v5420_v42  ;;  %v5890_v38 = vld [vmem:[#allocation4 + $0xc0] ss:$16 sps:$4 sm:$0xff]   ;;  %v5901_v42 = vld [vmem:[#allocation4 + $0x2a4] ss:$16 sps:$4 sm:$0xff]  }
  0x87   :  { %v5952_v12 = vld [vmem:[#allocation4 + $0x184] ss:$16 sps:$4 sm:$0xff]  }
  0x88   :  { %1005 = vmatmul.mubr.bf16.gmra.mxu0 %v6558_v37  ;;  %1118 = vmatmul.mubr.bf16.gmra.mxu1 %v6558_v37 }
  0x89   :  { %1169 = vmatpush2.bf16.msra.mxu0 %v5417_v43  ;;  %1282 = vmatpush2.bf16.msra.mxu1 %v5419_v47  ;;  %v5896_v43 = vld [vmem:[#allocation4 + $0xa0] ss:$16 sps:$4 sm:$0xff]   ;;  %v5907_v47 = vld [vmem:[#allocation4 + $0x284] ss:$16 sps:$4 sm:$0xff]  }
  0x8a   :  { %1170 = vmatprep.subr.bf16.mxu0 %v5410_v48  ;;  %1283 = vmatprep.subr.bf16.mxu1 %v5412_v52  ;;  %v5910_v48 = vld [vmem:[#allocation4 + $0x64] ss:$16 sps:$4 sm:$0xff]   ;;  %v5911_v52 = vld [vmem:[#allocation4 + $0x260] ss:$16 sps:$4 sm:$0xff]  }
  0x8b   :  { %1014 = vmatprep.mubr.bf16.mxu0 %v6565_v44  ;;  %1127 = vmatprep.mubr.bf16.mxu1 %v6565_v44 }
  0x8d   :  { %1171 = vmatpush2.bf16.msra.mxu0 %v5409_v53  ;;  %1284 = vmatpush2.bf16.msra.mxu1 %v5411_v56  ;;  %v5916_v53 = vld [vmem:[#allocation4 + $0x44] ss:$16 sps:$4 sm:$0xff]  }
  0x8e   :  { %1172 = vmatprep.subr.bf16.mxu0 %v5402_v58  ;;  %1285 = vmatprep.subr.bf16.mxu1 %v5404_v62  ;;  %v5925_v56 = vld [vmem:[#allocation4 + $0x224] ss:$16 sps:$4 sm:$0xff]   ;;  %v5920_v58 = vld [vmem:[#allocation4 + $0x20] ss:$16 sps:$4 sm:$0xff]  }
  0x8f   :  { %v5931_v62 = vld [vmem:[#allocation4 + $0x204] ss:$16 sps:$4 sm:$0xff]  }
  0x90   :  { %1015 = vmatmul.mubr.bf16.gmra.mxu0 %v6572_v57  ;;  %1128 = vmatmul.mubr.bf16.gmra.mxu1 %v6572_v57 }
  0x91   :  { %1173 = vmatpush2.bf16.msra.mxu0 %v5401_v63  ;;  %1286 = vmatpush2.bf16.msra.mxu1 %v5403_v4  ;;  %v5934_v63 = vld [vmem:[#allocation4 + $0x1e4] ss:$16 sps:$4 sm:$0xff]   ;;  %v5935_v4 = vld [vmem:[#allocation4 + $0x3e0] ss:$16 sps:$4 sm:$0xff]  }
  0x92   :  { %1174 = vmatprep.subr.bf16.mxu0 %v5394_v5  ;;  %1287 = vmatprep.subr.bf16.mxu1 %v5396_v8  ;;  %v5940_v5 = vld [vmem:[#allocation4 + $0x1c4] ss:$16 sps:$4 sm:$0xff]  }
  0x93   :  { %1024 = vmatprep.mubr.bf16.mxu0 %v6579_v0  ;;  %1137 = vmatprep.mubr.bf16.mxu1 %v6579_v0  ;;  %v5949_v8 = vld [vmem:[#allocation4 + $0x3a4] ss:$16 sps:$4 sm:$0xff]  }
  0x95   :  { %1175 = vmatpush2.bf16.msra.mxu0 %v5393_v10  ;;  %1288 = vmatpush2.bf16.msra.mxu1 %v5395_v13  ;;  %v5944_v10 = vld [vmem:[#allocation4 + $0x1a0] ss:$16 sps:$4 sm:$0xff]   ;;  %v5955_v13 = vld [vmem:[#allocation4 + $0x384] ss:$16 sps:$4 sm:$0xff]  }
  0x96   :  { %1176 = vmatprep.subr.bf16.mxu0 %v5386_v16  ;;  %1289 = vmatprep.subr.bf16.mxu1 %v5388_v20  ;;  %v5958_v16 = vld [vmem:[#allocation4 + $0x164] ss:$16 sps:$4 sm:$0xff]   ;;  %v5959_v20 = vld [vmem:[#allocation4 + $0x360] ss:$16 sps:$4 sm:$0xff]  }
  0x98   :  { %1025 = vmatmul.mubr.bf16.gmra.mxu0 %v6586_v14  ;;  %1138 = vmatmul.mubr.bf16.gmra.mxu1 %v6586_v14 }
  0x99   :  { %1177 = vmatpush2.bf16.msra.mxu0 %v5385_v21  ;;  %1290 = vmatpush2.bf16.msra.mxu1 %v5387_v22  ;;  %v5964_v21 = vld [vmem:[#allocation4 + $0x144] ss:$16 sps:$4 sm:$0xff]  }
  0x9a   :  { %1178 = vmatprep.subr.bf16.mxu0 %v5378_v25  ;;  %1291 = vmatprep.subr.bf16.mxu1 %v5380_v26  ;;  %v5967_v22 = vld [vmem:[#allocation4 + $0x344] ss:$16 sps:$4 sm:$0xff]  }
  0x9b   :  { %1180 = vmatprep.mubr.bf16.mxu0 %v6382_v31  ;;  %1293 = vmatprep.mubr.bf16.mxu1 %v6382_v31  ;;  %v5970_v25 = vld [vmem:[#allocation4 + $0x124] ss:$16 sps:$4 sm:$0xff]  }
  0x9c   :  { %v5973_v26 = vld [vmem:[#allocation4 + $0x324] ss:$16 sps:$4 sm:$0xff]  }
  0x9d   :  { %1179 = vmatpush2.bf16.msra.mxu0 %v5377_v28  ;;  %1292 = vmatpush2.bf16.msra.mxu1 %v5379_v30  ;;  %v5971_v28 = vld [vmem:[#allocation4 + $0x320] ss:$16 sps:$4 sm:$0xff]   ;;  %v5979_v30 = vld [vmem:[#allocation4 + $0x304] ss:$16 sps:$4 sm:$0xff]  }
  0x9e   :  { %3252 = vmatprep.subr.bf16.mxu0 %v5886_v27  ;;  %3365 = vmatprep.subr.bf16.mxu1 %v5889_v29  ;;  %v5968_v27 = vld [vmem:[#allocation4 + $0x120] ss:$16 sps:$4 sm:$0xff]   ;;  %v5976_v29 = vld [vmem:[#allocation4 + $0x104] ss:$16 sps:$4 sm:$0xff]  }
  0x9f   :  { %v5982_v31 = vld [vmem:[#allocation4 + $0x4e4] ss:$16 sps:$4 sm:$0xff]  }
  0xa0   :  { %1181 = vmatmul.mubr.bf16.vlgmr.msra.gmra.mxu0 %v6490_v9  ;;  %1294 = vmatmul.mubr.bf16.vlgmr.msra.gmra.mxu1 %v6490_v9  ;;  %v5902_v9 = vld [vmem:[#allocation4 + $0x80] ss:$16 sps:$4 sm:$0xff]  }
  0xa1   :  { %1190 = vmatprep.mubr.bf16.mxu0 %v6495_v15  ;;  %1303 = vmatprep.mubr.bf16.mxu1 %v6495_v15  ;;  %v5905_v15 = vld [vmem:[#allocation4 + $0x280] ss:$16 sps:$4 sm:$0xff]  }
  0xa2   :  { %3253 = vmatpush1.bf16.msra.mxu0 %v5884_v32  ;;  %3366 = vmatpush1.bf16.msra.mxu1 %v5887_v34  ;;  %v5985_v32 = vld [vmem:[#allocation4 + $0x6e4] ss:$16 sps:$4 sm:$0xff]  }
  0xa3   :  { %3254 = vmatprep.subr.bf16.mxu0 %v5892_v35  ;;  %3367 = vmatprep.subr.bf16.mxu1 %v5895_v36 }
  0xa6   :  { %3255 = vmatpush1.bf16.msra.mxu0 %v5890_v38  ;;  %3368 = vmatpush1.bf16.msra.mxu1 %v5893_v39 }
  0xa7   :  { %3256 = vmatprep.subr.bf16.mxu0 %v5898_v40  ;;  %3369 = vmatprep.subr.bf16.mxu1 %v5901_v42 }
  0xa8   :  { %1191 = vmatmul.mubr.bf16.gmra.mxu0 %v6502_v23  ;;  %1304 = vmatmul.mubr.bf16.gmra.mxu1 %v6502_v23  ;;  %v5914_v23 = vld [vmem:[#allocation4 + $0x40] ss:$16 sps:$4 sm:$0xff]  }
  0xa9   :  { %1200 = vmatprep.mubr.bf16.mxu0 %v6509_v33  ;;  %1313 = vmatprep.mubr.bf16.mxu1 %v6509_v33  ;;  %v5917_v33 = vld [vmem:[#allocation4 + $0x240] ss:$16 sps:$4 sm:$0xff]  }
  0xaa   :  { %3257 = vmatpush1.bf16.msra.mxu0 %v5896_v43  ;;  %3370 = vmatpush1.bf16.msra.mxu1 %v5899_v45 }
  0xab   :  { %3258 = vmatprep.subr.bf16.mxu0 %v5904_v46  ;;  %3371 = vmatprep.subr.bf16.mxu1 %v5907_v47 }
  0xae   :  { %3259 = vmatpush1.bf16.msra.mxu0 %v5902_v9  ;;  %3372 = vmatpush1.bf16.msra.mxu1 %v5905_v15 }
  0xaf   :  { %3260 = vmatprep.subr.bf16.mxu0 %v5910_v48  ;;  %3373 = vmatprep.subr.bf16.mxu1 %v5913_v49 }
  0xb0   :  { %1201 = vmatmul.mubr.bf16.gmra.mxu0 %v6516_v41  ;;  %1314 = vmatmul.mubr.bf16.gmra.mxu1 %v6516_v41  ;;  %v5926_v41 = vld [vmem:[#allocation4] ss:$16 sps:$4 sm:$0xff]  }
  0xb1   :  { %1210 = vmatprep.mubr.bf16.mxu0 %v6523_v51  ;;  %1323 = vmatprep.mubr.bf16.mxu1 %v6523_v51  ;;  %v5929_v51 = vld [vmem:[#allocation4 + $0x200] ss:$16 sps:$4 sm:$0xff]  }
  0xb2   :  { %3261 = vmatpush1.bf16.msra.mxu0 %v5908_v50  ;;  %3374 = vmatpush1.bf16.msra.mxu1 %v5911_v52 }
  0xb3   :  { %3262 = vmatprep.subr.bf16.mxu0 %v5916_v53  ;;  %3375 = vmatprep.subr.bf16.mxu1 %v5919_v54 }
  0xb6   :  { %3263 = vmatpush1.bf16.msra.mxu0 %v5914_v23  ;;  %3376 = vmatpush1.bf16.msra.mxu1 %v5917_v33 }
  0xb7   :  { %3264 = vmatprep.subr.bf16.mxu0 %v5922_v55  ;;  %3377 = vmatprep.subr.bf16.mxu1 %v5925_v56 }
  0xb8   :  { %1211 = vmatmul.mubr.bf16.gmra.mxu0 %v6530_v59  ;;  %1324 = vmatmul.mubr.bf16.gmra.mxu1 %v6530_v59  ;;  %v5938_v59 = vld [vmem:[#allocation4 + $0x1c0] ss:$16 sps:$4 sm:$0xff]  }
  0xb9   :  { %1220 = vmatprep.mubr.bf16.mxu0 %v6537_v3  ;;  %1333 = vmatprep.mubr.bf16.mxu1 %v6537_v3  ;;  %v5941_v3 = vld [vmem:[#allocation4 + $0x3c0] ss:$16 sps:$4 sm:$0xff]  }
  0xba   :  { %3265 = vmatpush1.bf16.msra.mxu0 %v5920_v58  ;;  %3378 = vmatpush1.bf16.msra.mxu1 %v5923_v60 }
  0xbb   :  { %3266 = vmatprep.subr.bf16.mxu0 %v5928_v61  ;;  %3379 = vmatprep.subr.bf16.mxu1 %v5931_v62 }
  0xbe   :  { %3267 = vmatpush1.bf16.msra.mxu0 %v5926_v41  ;;  %3380 = vmatpush1.bf16.msra.mxu1 %v5929_v51  ;;  %v5980_v51 = vld [vmem:[#allocation4 + $0x4e0] ss:$16 sps:$4 sm:$0xff]  }
  0xbf   :  { %3268 = vmatprep.subr.bf16.mxu0 %v5934_v63  ;;  %3381 = vmatprep.subr.bf16.mxu1 %v5937_v1 }
  0xc0   :  { %1221 = vmatmul.mubr.bf16.gmra.mxu0 %v6544_v17  ;;  %1334 = vmatmul.mubr.bf16.gmra.mxu1 %v6544_v17  ;;  %v5950_v17 = vld [vmem:[#allocation4 + $0x180] ss:$16 sps:$4 sm:$0xff]  }
  0xc1   :  { %1230 = vmatprep.mubr.bf16.mxu0 %v6551_v24  ;;  %1343 = vmatprep.mubr.bf16.mxu1 %v6551_v24  ;;  %v5953_v24 = vld [vmem:[#allocation4 + $0x380] ss:$16 sps:$4 sm:$0xff]  }
  0xc2   :  { %3269 = vmatpush2.bf16.msra.mxu0 %v5932_v2  ;;  %3382 = vmatpush2.bf16.msra.mxu1 %v5935_v4  ;;  %v5983_v4 = vld [vmem:[#allocation4 + $0x6e0] ss:$16 sps:$4 sm:$0xff]  }
  0xc3   :  { %3270 = vmatprep.subr.bf16.mxu0 %v5940_v5  ;;  %3383 = vmatprep.subr.bf16.mxu1 %v5943_v6  ;;  %v5988_v5 = vld [vmem:[#allocation4 + $0x4c4] ss:$16 sps:$4 sm:$0xff]  }
  0xc6   :  { %3271 = vmatpush2.bf16.msra.mxu0 %v5938_v59  ;;  %3384 = vmatpush2.bf16.msra.mxu1 %v5941_v3 }
  0xc7   :  { %3272 = vmatprep.subr.bf16.mxu0 %v5946_v7  ;;  %3385 = vmatprep.subr.bf16.mxu1 %v5949_v8  ;;  %v5991_v8 = vld [vmem:[#allocation4 + $0x6c4] ss:$16 sps:$4 sm:$0xff]  }
  0xc8   :  { %1231 = vmatmul.mubr.bf16.gmra.mxu0 %v6558_v37  ;;  %1344 = vmatmul.mubr.bf16.gmra.mxu1 %v6558_v37  ;;  %v5962_v37 = vld [vmem:[#allocation4 + $0x140] ss:$16 sps:$4 sm:$0xff]  }
  0xc9   :  { %1240 = vmatprep.mubr.bf16.mxu0 %v6565_v44  ;;  %1353 = vmatprep.mubr.bf16.mxu1 %v6565_v44  ;;  %v5965_v44 = vld [vmem:[#allocation4 + $0x340] ss:$16 sps:$4 sm:$0xff]  }
  0xca   :  { %3273 = vmatpush2.bf16.msra.mxu0 %v5944_v10  ;;  %3386 = vmatpush2.bf16.msra.mxu1 %v5947_v11 }
  0xcb   :  { %3274 = vmatprep.subr.bf16.mxu0 %v5952_v12  ;;  %3387 = vmatprep.subr.bf16.mxu1 %v5955_v13 }
  0xce   :  { %3275 = vmatpush2.bf16.msra.mxu0 %v5950_v17  ;;  %3388 = vmatpush2.bf16.msra.mxu1 %v5953_v24 }
  0xcf   :  { %3276 = vmatprep.subr.bf16.mxu0 %v5958_v16  ;;  %3389 = vmatprep.subr.bf16.mxu1 %v5961_v18  ;;  %v5986_v18 = vld [vmem:[#allocation4 + $0x4c0] ss:$16 sps:$4 sm:$0xff]  }
  0xd0   :  { %1241 = vmatmul.mubr.bf16.gmra.mxu0 %v6572_v57  ;;  %1354 = vmatmul.mubr.bf16.gmra.mxu1 %v6572_v57  ;;  %v5974_v57 = vld [vmem:[#allocation4 + $0x100] ss:$16 sps:$4 sm:$0xff]  }
  0xd1   :  { %1250 = vmatprep.mubr.bf16.mxu0 %v6579_v0  ;;  %1363 = vmatprep.mubr.bf16.mxu1 %v6579_v0  ;;  %v5977_v0 = vld [vmem:[#allocation4 + $0x300] ss:$16 sps:$4 sm:$0xff]  }
  0xd2   :  { %3277 = vmatpush2.bf16.msra.mxu0 %v5956_v19  ;;  %3390 = vmatpush2.bf16.msra.mxu1 %v5959_v20 }
  0xd3   :  { %3278 = vmatprep.subr.bf16.mxu0 %v5964_v21  ;;  %3391 = vmatprep.subr.bf16.mxu1 %v5967_v22  ;;  %v5989_v22 = vld [vmem:[#allocation4 + $0x6c0] ss:$16 sps:$4 sm:$0xff]  }
  0xd6   :  { %3279 = vmatpush2.bf16.msra.mxu0 %v5962_v37  ;;  %3392 = vmatpush2.bf16.msra.mxu1 %v5965_v44  ;;  %v5994_v37 = vld [vmem:[#allocation4 + $0x4a4] ss:$16 sps:$4 sm:$0xff]  }
  0xd7   :  { %3280 = vmatprep.subr.bf16.mxu0 %v5970_v25  ;;  %3393 = vmatprep.subr.bf16.mxu1 %v5973_v26 }
  0xd8   :  { %1251 = vmatmul.mubr.bf16.gmra.mxu0 %v6586_v14  ;;  %1364 = vmatmul.mubr.bf16.gmra.mxu1 %v6586_v14 }
  0xda   :  { %3281 = vmatpush2.bf16.msra.mxu0 %v5968_v27  ;;  %3394 = vmatpush2.bf16.msra.mxu1 %v5971_v28  ;;  %v5997_v28 = vld [vmem:[#allocation4 + $0x6a4] ss:$16 sps:$4 sm:$0xff]  }
  0xdb   :  { %3282 = vmatprep.subr.bf16.mxu0 %v5976_v29  ;;  %3395 = vmatprep.subr.bf16.mxu1 %v5979_v30 }
  0xde   :  { %3283 = vmatpush2.bf16.msra.mxu0 %v5974_v57  ;;  %3396 = vmatpush2.bf16.msra.mxu1 %v5977_v0 }
  0xdf   :  { %3478 = vmatprep.subr.bf16.mxu0 %v5982_v31  ;;  %3591 = vmatprep.subr.bf16.mxu1 %v5985_v32 }
 0x120   :  { %v956_v34 = vpop.f32.mrf.mxu0  ;;  %v1069_v35 = vpop.f32.mrf.mxu1 }
 0x121   :  { %v1374_v43 = vmul.f32 0.25, %v956_v34  ;;  %v1376_v9 = vmul.f32 0.25, %v1069_v35 }
 0x122   :  { %v958_v36 = vpop.f32.mrf.mxu0  ;;  %v1071_v38 = vpop.f32.mrf.mxu1 }
 0x123   :  { %v1375_v40 = vmul.f32 0.25, %v958_v36  ;;  %v1377_v45 = vmul.f32 0.25, %v1071_v38  ;;  %v1502_v55 = vmax.f32 %v956_v34, %v1374_v43  ;;  %v1504_v61 = vmax.f32 %v1069_v35, %v1376_v9  ;;  %v5992_v35 = vld [vmem:[#allocation4 + $0x4a0] ss:$16 sps:$4 sm:$0xff]  }
 0x124   :  { %v960_v39 = vpop.f32.mrf.mxu0  ;;  %v1073_v14 = vpop.f32.mrf.mxu1 }
 0x125   :  { %v1382_v42 = vmul.f32 0.25, %v960_v39  ;;  %v1384_v46 = vmul.f32 0.25, %v1073_v14  ;;  %v1503_v53 = vmax.f32 %v958_v36, %v1375_v40  ;;  %v1505_v56 = vmax.f32 %v1071_v38, %v1377_v45  ;;  %v5995_v40 = vld [vmem:[#allocation4 + $0x6a0] ss:$16 sps:$4 sm:$0xff]  }
 0x126   :  { %v962_v47 = vpop.f32.mrf.mxu0  ;;  %v1075_v48 = vpop.f32.mrf.mxu1 }
 0x127   :  { %v1383_v15 = vmul.f32 0.25, %v962_v47  ;;  %v1510_v49 = vmax.f32 %v960_v39, %v1382_v42  ;;  %v1385_v50 = vmul.f32 0.25, %v1075_v48  ;;  %v1512_v54 = vmax.f32 %v1073_v14, %v1384_v46  ;;  %v6000_v42 = vld [vmem:[#allocation4 + $0x484] ss:$16 sps:$4 sm:$0xff]  }
 0x128   :  { %v966_v52 = vpop.f32.mrf.mxu0  ;;  %v1079_v33 = vpop.f32.mrf.mxu1 }
 0x129   :  { %v1511_v23 = vmax.f32 %v962_v47, %v1383_v15  ;;  %v1513_v58 = vmax.f32 %v1075_v48, %v1385_v50  ;;  %v6627_v63 = vpack.c.bf16 %v1510_v49, %v1502_v55  ;;  %v6631_v6 = vpack.c.bf16 %v1512_v54, %v1504_v61  ;;  %v6003_v47 = vld [vmem:[#allocation4 + $0x684] ss:$16 sps:$4 sm:$0xff]   ;;  %v5998_v54 = vld [vmem:[#allocation4 + $0x480] ss:$16 sps:$4 sm:$0xff]  }
 0x12a   :  { %v968_v60 = vpop.f32.mrf.mxu0  ;;  %v1081_v62 = vpop.f32.mrf.mxu1  ;;  %v1390_v10 = vmul.f32 0.25, %v966_v52  ;;  %v1392_v17 = vmul.f32 0.25, %v1079_v33 }
 0x12b   :  { %v6625_v41 = vpack.c.bf16 %v1511_v23, %v1503_v53  ;;  %v6629_v2 = vpack.c.bf16 %v1513_v58, %v1505_v56  ;;  %v1391_v59 = vmul.f32 0.25, %v968_v60  ;;  %v1393_v11 = vmul.f32 0.25, %v1081_v62  ;;  %v6001_v56 = vld [vmem:[#allocation4 + $0x680] ss:$16 sps:$4 sm:$0xff]   ;;  %v6006_v58 = vld [vmem:[#allocation4 + $0x464] ss:$16 sps:$4 sm:$0xff]  }
 0x12c   :  { %v970_v1 = vpop.f32.mrf.mxu0  ;;  %v1083_v7 = vpop.f32.mrf.mxu1  ;;  %v1518_v29 = vmax.f32 %v966_v52, %v1390_v10  ;;  %v1520_v31 = vmax.f32 %v1079_v33, %v1392_v17 }
 0x12d   :  { %v1398_v3 = vmul.f32 0.25, %v970_v1  ;;  %3284 = vmatprep.mubr.bf16.mxu0 %v6625_v41  ;;  %v1400_v12 = vmul.f32 0.25, %v1083_v7  ;;  %3397 = vmatprep.mubr.bf16.mxu1 %v6629_v2  ;;  %v1519_v44 = vmax.f32 %v968_v60, %v1391_v59  ;;  %v1521_v30 = vmax.f32 %v1081_v62, %v1393_v11  ;;  %v6004_v11 = vld [vmem:[#allocation4 + $0x460] ss:$16 sps:$4 sm:$0xff]  }
 0x12e   :  { %v972_v13 = vpop.f32.mrf.mxu0  ;;  %3285 = vmatmul.mubr.bf16.vlgmr.msra.gmra.mxu0 %v6627_v63  ;;  %v1085_v16 = vpop.f32.mrf.mxu1  ;;  %3398 = vmatmul.mubr.bf16.vlgmr.msra.gmra.mxu1 %v6631_v6 }
 0x12f   :  { %v1399_v24 = vmul.f32 0.25, %v972_v13  ;;  %3479 = vmatpush1.bf16.msra.mxu0 %v5980_v51  ;;  %v1526_v19 = vmax.f32 %v970_v1, %v1398_v3  ;;  %v1401_v20 = vmul.f32 0.25, %v1085_v16  ;;  %3592 = vmatpush1.bf16.msra.mxu1 %v5983_v4  ;;  %v1528_v25 = vmax.f32 %v1083_v7, %v1400_v12  ;;  %v6009_v1 = vld [vmem:[#allocation4 + $0x664] ss:$16 sps:$4 sm:$0xff]  }
 0x130   :  { %v6637_v21 = vpop.f32.mrf.mxu0  ;;  %3480 = vmatprep.subr.bf16.mxu0 %v5988_v5  ;;  %v6639_v27 = vpop.f32.mrf.mxu1  ;;  %3593 = vmatprep.subr.bf16.mxu1 %v5991_v8 }
 0x131   :  { %v1527_v26 = vmax.f32 %v972_v13, %v1399_v24  ;;  %v1529_v57 = vmax.f32 %v1085_v16, %v1401_v20  ;;  %v6643_v36 = vpack.c.bf16 %v1526_v19, %v1518_v29  ;;  %v6647_v14 = vpack.c.bf16 %v1528_v25, %v1520_v31  ;;  %v6007_v24 = vld [vmem:[#allocation4 + $0x660] ss:$16 sps:$4 sm:$0xff]   ;;  %v6012_v16 = vld [vmem:[#allocation4 + $0x444] ss:$16 sps:$4 sm:$0xff]  }
 0x132   :  { %v978_v0 = vpop.f32.mrf.mxu0  ;;  %v1091_v32 = vpop.f32.mrf.mxu1  ;;  %v1406_v9 = vmul.f32 0.25, %v6637_v21  ;;  %v1408_v50 = vmul.f32 0.25, %v6639_v27 }
 0x133   :  { %3481 = vmatpush1.bf16.msra.mxu0 %v5986_v18  ;;  %v6641_v34 = vpack.c.bf16 %v1527_v26, %v1519_v44  ;;  %3594 = vmatpush1.bf16.msra.mxu1 %v5989_v22  ;;  %v6645_v39 = vpack.c.bf16 %v1529_v57, %v1521_v30  ;;  %v1407_v43 = vmul.f32 0.25, %v978_v0  ;;  %v1409_v15 = vmul.f32 0.25, %v1091_v32  ;;  %v6015_v22 = vld [vmem:[#allocation4 + $0x644] ss:$16 sps:$4 sm:$0xff]   ;;  %v6010_v30 = vld [vmem:[#allocation4 + $0x440] ss:$16 sps:$4 sm:$0xff]  }
 0x134   :  { %v980_v38 = vpop.f32.mrf.mxu0  ;;  %3482 = vmatprep.subr.bf16.mxu0 %v5994_v37  ;;  %v1093_v46 = vpop.f32.mrf.mxu1  ;;  %3595 = vmatprep.subr.bf16.mxu1 %v5997_v28  ;;  %v1534_v4 = vmax.f32 %v6637_v21, %v1406_v9  ;;  %v1536_v7 = vmax.f32 %v6639_v27, %v1408_v50 }
 0x135   :  { %v1414_v45 = vmul.f32 0.25, %v980_v38  ;;  %3294 = vmatprep.mubr.bf16.mxu0 %v6641_v34  ;;  %v1416_v48 = vmul.f32 0.25, %v1093_v46  ;;  %3407 = vmatprep.mubr.bf16.mxu1 %v6645_v39  ;;  %v1535_v60 = vmax.f32 %v978_v0, %v1407_v43  ;;  %v1537_v5 = vmax.f32 %v1091_v32, %v1409_v15  ;;  %v6013_v32 = vld [vmem:[#allocation4 + $0x640] ss:$16 sps:$4 sm:$0xff]  }
 0x136   :  { %v982_v49 = vpop.f32.mrf.mxu0  ;;  %3295 = vmatmul.mubr.bf16.gmra.mxu0 %v6643_v36  ;;  %v1095_v53 = vpop.f32.mrf.mxu1  ;;  %3408 = vmatmul.mubr.bf16.gmra.mxu1 %v6647_v14 }
 0x137   :  { %v1415_v52 = vmul.f32 0.25, %v982_v49  ;;  %3483 = vmatpush1.bf16.msra.mxu0 %v5992_v35  ;;  %v1542_v23 = vmax.f32 %v980_v38, %v1414_v45  ;;  %v1417_v33 = vmul.f32 0.25, %v1095_v53  ;;  %3596 = vmatpush1.bf16.msra.mxu1 %v5995_v40  ;;  %v1544_v61 = vmax.f32 %v1093_v46, %v1416_v48  ;;  %v6018_v35 = vld [vmem:[#allocation4 + $0x424] ss:$16 sps:$4 sm:$0xff]  }
 0x138   :  { %v6655_v55 = vpop.f32.mrf.mxu0  ;;  %3484 = vmatprep.subr.bf16.mxu0 %v6000_v42  ;;  %v6657_v51 = vpop.f32.mrf.mxu1  ;;  %3597 = vmatprep.subr.bf16.mxu1 %v6003_v47  ;;  %v6021_v45 = vld [vmem:[#allocation4 + $0x624] ss:$16 sps:$4 sm:$0xff]  }
 0x139   :  { %v1543_v62 = vmax.f32 %v982_v49, %v1415_v52  ;;  %v1545_v59 = vmax.f32 %v1095_v53, %v1417_v33  ;;  %v6663_v12 = vpack.c.bf16 %v1542_v23, %v1534_v4  ;;  %v6667_v18 = vpack.c.bf16 %v1544_v61, %v1536_v7  ;;  %v6016_v52 = vld [vmem:[#allocation4 + $0x420] ss:$16 sps:$4 sm:$0xff]  }
 0x13a   :  { %v988_v3 = vpop.f32.mrf.mxu0  ;;  %v1101_v8 = vpop.f32.mrf.mxu1  ;;  %v1422_v37 = vmul.f32 0.25, %v6655_v55  ;;  %v1424_v27 = vmul.f32 0.25, %v6657_v51  ;;  %v6019_v33 = vld [vmem:[#allocation4 + $0x620] ss:$16 sps:$4 sm:$0xff]  }
 0x13b   :  { %3485 = vmatpush1.bf16.msra.mxu0 %v5998_v54  ;;  %v6661_v10 = vpack.c.bf16 %v1543_v62, %v1535_v60  ;;  %3598 = vmatpush1.bf16.msra.mxu1 %v6001_v56  ;;  %v6665_v17 = vpack.c.bf16 %v1545_v59, %v1537_v5  ;;  %v1423_v19 = vmul.f32 0.25, %v988_v3  ;;  %v1425_v44 = vmul.f32 0.25, %v1101_v8  ;;  %v6024_v56 = vld [vmem:[#allocation4 + $0x404] ss:$16 sps:$4 sm:$0xff]  }
 0x13c   :  { %v990_v13 = vpop.f32.mrf.mxu0  ;;  %3486 = vmatprep.subr.bf16.mxu0 %v6006_v58  ;;  %v1103_v21 = vpop.f32.mrf.mxu1  ;;  %3599 = vmatprep.subr.bf16.mxu1 %v6009_v1  ;;  %v1550_v46 = vmax.f32 %v6655_v55, %v1422_v37  ;;  %v1552_v48 = vmax.f32 %v6657_v51, %v1424_v27  ;;  %v6027_v62 = vld [vmem:[#allocation4 + $0x604] ss:$16 sps:$4 sm:$0xff]  }
 0x13d   :  { %v1430_v20 = vmul.f32 0.25, %v990_v13  ;;  %3304 = vmatprep.mubr.bf16.mxu0 %v6661_v10  ;;  %v1432_v25 = vmul.f32 0.25, %v1103_v21  ;;  %3417 = vmatprep.mubr.bf16.mxu1 %v6665_v17  ;;  %v1551_v38 = vmax.f32 %v988_v3, %v1423_v19  ;;  %v1553_v47 = vmax.f32 %v1101_v8, %v1425_v44  ;;  %v6022_v8 = vld [vmem:[#allocation4 + $0x400] ss:$16 sps:$4 sm:$0xff]   ;;  %v6030_v19 = vld [vmem:[#allocation4 + $0x5e4] ss:$16 sps:$4 sm:$0xff]  }
 0x13e   :  { %v992_v26 = vpop.f32.mrf.mxu0  ;;  %3305 = vmatmul.mubr.bf16.gmra.mxu0 %v6663_v12  ;;  %v1105_v29 = vpop.f32.mrf.mxu1  ;;  %3418 = vmatmul.mubr.bf16.gmra.mxu1 %v6667_v18  ;;  %v6033_v44 = vld [vmem:[#allocation4 + $0x7e4] ss:$16 sps:$4 sm:$0xff]  }
 0x13f   :  { %v1431_v28 = vmul.f32 0.25, %v992_v26  ;;  %3487 = vmatpush1.bf16.msra.mxu0 %v6004_v11  ;;  %v1558_v57 = vmax.f32 %v990_v13, %v1430_v20  ;;  %v1433_v0 = vmul.f32 0.25, %v1105_v29  ;;  %3600 = vmatpush1.bf16.msra.mxu1 %v6007_v24  ;;  %v1560_v40 = vmax.f32 %v1103_v21, %v1432_v25 }
 0x140   :  { %v6675_v31 = vpop.f32.mrf.mxu0  ;;  %3488 = vmatprep.subr.bf16.mxu0 %v6012_v16  ;;  %v6677_v43 = vpop.f32.mrf.mxu1  ;;  %3601 = vmatprep.subr.bf16.mxu1 %v6015_v22  ;;  %v6025_v16 = vld [vmem:[#allocation4 + $0x600] ss:$16 sps:$4 sm:$0xff]  }
 0x141   :  { %v1559_v42 = vmax.f32 %v992_v26, %v1431_v28  ;;  %v1561_v9 = vmax.f32 %v1105_v29, %v1433_v0  ;;  %v6683_v53 = vpack.c.bf16 %v1558_v57, %v1550_v46  ;;  %v6687_v55 = vpack.c.bf16 %v1560_v40, %v1552_v48  ;;  %v6028_v0 = vld [vmem:[#allocation4 + $0x5e0] ss:$16 sps:$4 sm:$0xff]  }
 0x142   :  { %v998_v15 = vpop.f32.mrf.mxu0  ;;  %v1111_v49 = vpop.f32.mrf.mxu1  ;;  %v1438_v51 = vmul.f32 0.25, %v6675_v31  ;;  %v1440_v59 = vmul.f32 0.25, %v6677_v43  ;;  %v6031_v40 = vld [vmem:[#allocation4 + $0x7e0] ss:$16 sps:$4 sm:$0xff]  }
 0x143   :  { %3489 = vmatpush1.bf16.msra.mxu0 %v6010_v30  ;;  %v6681_v50 = vpack.c.bf16 %v1559_v42, %v1551_v38  ;;  %3602 = vmatpush1.bf16.msra.mxu1 %v6013_v32  ;;  %v6685_v23 = vpack.c.bf16 %v1561_v9, %v1553_v47  ;;  %v1439_v58 = vmul.f32 0.25, %v998_v15  ;;  %v1441_v1 = vmul.f32 0.25, %v1111_v49  ;;  %v6036_v42 = vld [vmem:[#allocation4 + $0x5c4] ss:$16 sps:$4 sm:$0xff]  }
 0x144   :  { %v1000_v54 = vpop.f32.mrf.mxu0  ;;  %3490 = vmatprep.subr.bf16.mxu0 %v6018_v35  ;;  %v1113_v61 = vpop.f32.mrf.mxu1  ;;  %3603 = vmatprep.subr.bf16.mxu1 %v6021_v45  ;;  %v1566_v25 = vmax.f32 %v6675_v31, %v1438_v51  ;;  %v1568_v29 = vmax.f32 %v6677_v43, %v1440_v59  ;;  %v6039_v43 = vld [vmem:[#allocation4 + $0x7c4] ss:$16 sps:$4 sm:$0xff]  }
 0x145   :  { %v1446_v60 = vmul.f32 0.25, %v1000_v54  ;;  %3314 = vmatprep.mubr.bf16.mxu0 %v6681_v50  ;;  %v1448_v4 = vmul.f32 0.25, %v1113_v61  ;;  %3427 = vmatprep.mubr.bf16.mxu1 %v6685_v23  ;;  %v1567_v20 = vmax.f32 %v998_v15, %v1439_v58  ;;  %v1569_v26 = vmax.f32 %v1111_v49, %v1441_v1  ;;  %v6042_v51 = vld [vmem:[#allocation4 + $0x5a4] ss:$16 sps:$4 sm:$0xff]  }
 0x146   :  { %v1002_v5 = vpop.f32.mrf.mxu0  ;;  %3315 = vmatmul.mubr.bf16.gmra.mxu0 %v6683_v53  ;;  %v1115_v7 = vpop.f32.mrf.mxu1  ;;  %3428 = vmatmul.mubr.bf16.gmra.mxu1 %v6687_v55 }
 0x147   :  { %v1447_v3 = vmul.f32 0.25, %v1002_v5  ;;  %3491 = vmatpush1.bf16.msra.mxu0 %v6016_v52  ;;  %v1574_v11 = vmax.f32 %v1000_v54, %v1446_v60  ;;  %v1449_v13 = vmul.f32 0.25, %v1115_v7  ;;  %3604 = vmatpush1.bf16.msra.mxu1 %v6019_v33  ;;  %v1576_v21 = vmax.f32 %v1113_v61, %v1448_v4 }
 0x148   :  { %v6695_v24 = vpop.f32.mrf.mxu0  ;;  %3492 = vmatprep.subr.bf16.mxu0 %v6024_v56  ;;  %v6697_v37 = vpop.f32.mrf.mxu1  ;;  %3605 = vmatprep.subr.bf16.mxu1 %v6027_v62  ;;  %v6034_v56 = vld [vmem:[#allocation4 + $0x5c0] ss:$16 sps:$4 sm:$0xff]  }
 0x149   :  { %v1575_v22 = vmax.f32 %v1002_v5, %v1447_v3  ;;  %v1577_v27 = vmax.f32 %v1115_v7, %v1449_v13  ;;  %v6703_v32 = vpack.c.bf16 %v1574_v11, %v1566_v25  ;;  %v6707_v31 = vpack.c.bf16 %v1576_v21, %v1568_v29  ;;  %v6037_v62 = vld [vmem:[#allocation4 + $0x7c0] ss:$16 sps:$4 sm:$0xff]   ;;  %v6045_v3 = vld [vmem:[#allocation4 + $0x7a4] ss:$16 sps:$4 sm:$0xff]  }
 0x14a   :  { %v1008_v28 = vpop.f32.mrf.mxu0  ;;  %v1121_v30 = vpop.f32.mrf.mxu1  ;;  %v1454_v9 = vmul.f32 0.25, %v6695_v24  ;;  %v1456_v52 = vmul.f32 0.25, %v6697_v37  ;;  %v6040_v21 = vld [vmem:[#allocation4 + $0x5a0] ss:$16 sps:$4 sm:$0xff]  }
 0x14b   :  { %3493 = vmatpush1.bf16.msra.mxu0 %v6022_v8  ;;  %v6701_v57 = vpack.c.bf16 %v1575_v22, %v1567_v20  ;;  %3606 = vmatpush1.bf16.msra.mxu1 %v6025_v16  ;;  %v6705_v38 = vpack.c.bf16 %v1577_v27, %v1569_v26  ;;  %v1455_v45 = vmul.f32 0.25, %v1008_v28  ;;  %v1457_v15 = vmul.f32 0.25, %v1121_v30  ;;  %v6043_v26 = vld [vmem:[#allocation4 + $0x7a0] ss:$16 sps:$4 sm:$0xff]   ;;  %v6048_v27 = vld [vmem:[#allocation4 + $0x584] ss:$16 sps:$4 sm:$0xff]  }
 0x14c   :  { %v1010_v35 = vpop.f32.mrf.mxu0  ;;  %3494 = vmatprep.subr.bf16.mxu0 %v6030_v19  ;;  %v1123_v47 = vpop.f32.mrf.mxu1  ;;  %3607 = vmatprep.subr.bf16.mxu1 %v6033_v44  ;;  %v1582_v7 = vmax.f32 %v6695_v24, %v1454_v9  ;;  %v1584_v16 = vmax.f32 %v6697_v37, %v1456_v52  ;;  %v6051_v37 = vld [vmem:[#allocation4 + $0x784] ss:$16 sps:$4 sm:$0xff]  }
 0x14d   :  { %v1462_v46 = vmul.f32 0.25, %v1010_v35  ;;  %3324 = vmatprep.mubr.bf16.mxu0 %v6701_v57  ;;  %v1464_v48 = vmul.f32 0.25, %v1123_v47  ;;  %3437 = vmatprep.mubr.bf16.mxu1 %v6705_v38  ;;  %v1583_v1 = vmax.f32 %v1008_v28, %v1455_v45  ;;  %v1585_v8 = vmax.f32 %v1121_v30, %v1457_v15  ;;  %v6054_v52 = vld [vmem:[#allocation4 + $0x564] ss:$16 sps:$4 sm:$0xff]  }
 0x14e   :  { %v1012_v49 = vpop.f32.mrf.mxu0  ;;  %3325 = vmatmul.mubr.bf16.gmra.mxu0 %v6703_v32  ;;  %v1125_v33 = vpop.f32.mrf.mxu1  ;;  %3438 = vmatmul.mubr.bf16.gmra.mxu1 %v6707_v31 }
 0x14f   :  { %v1463_v54 = vmul.f32 0.25, %v1012_v49  ;;  %3495 = vmatpush2.bf16.msra.mxu0 %v6028_v0  ;;  %v1590_v58 = vmax.f32 %v1010_v35, %v1462_v46  ;;  %v1465_v60 = vmul.f32 0.25, %v1125_v33  ;;  %3608 = vmatpush2.bf16.msra.mxu1 %v6031_v40  ;;  %v1592_v4 = vmax.f32 %v1123_v47, %v1464_v48 }
 0x150   :  { %v6715_v61 = vpop.f32.mrf.mxu0  ;;  %3496 = vmatprep.subr.bf16.mxu0 %v6036_v42  ;;  %v6717_v59 = vpop.f32.mrf.mxu1  ;;  %3609 = vmatprep.subr.bf16.mxu1 %v6039_v43  ;;  %v6046_v43 = vld [vmem:[#allocation4 + $0x580] ss:$16 sps:$4 sm:$0xff]  }
 0x151   :  { %v1591_v5 = vmax.f32 %v1012_v49, %v1463_v54  ;;  %v1593_v11 = vmax.f32 %v1125_v33, %v1465_v60  ;;  %v6723_v22 = vpack.c.bf16 %v1590_v58, %v1582_v7  ;;  %v6727_v24 = vpack.c.bf16 %v1592_v4, %v1584_v16  ;;  %v6049_v49 = vld [vmem:[#allocation4 + $0x780] ss:$16 sps:$4 sm:$0xff]   ;;  %v6057_v60 = vld [vmem:[#allocation4 + $0x764] ss:$16 sps:$4 sm:$0xff]  }
 0x152   :  { %v1018_v13 = vpop.f32.mrf.mxu0  ;;  %v1131_v19 = vpop.f32.mrf.mxu1  ;;  %v1470_v0 = vmul.f32 0.25, %v6715_v61  ;;  %v1472_v45 = vmul.f32 0.25, %v6717_v59 }
 0x153   :  { %3497 = vmatpush2.bf16.msra.mxu0 %v6034_v56  ;;  %v6721_v20 = vpack.c.bf16 %v1591_v5, %v1583_v1  ;;  %3610 = vmatpush2.bf16.msra.mxu1 %v6037_v62  ;;  %v6725_v25 = vpack.c.bf16 %v1593_v11, %v1585_v8  ;;  %v1471_v28 = vmul.f32 0.25, %v1018_v13  ;;  %v1473_v35 = vmul.f32 0.25, %v1131_v19  ;;  %v6052_v8 = vld [vmem:[#allocation4 + $0x560] ss:$16 sps:$4 sm:$0xff]  }
 0x154   :  { %v1020_v44 = vpop.f32.mrf.mxu0  ;;  %3498 = vmatprep.subr.bf16.mxu0 %v6042_v51  ;;  %v1133_v30 = vpop.f32.mrf.mxu1  ;;  %3611 = vmatprep.subr.bf16.mxu1 %v6045_v3  ;;  %v1598_v62 = vmax.f32 %v6715_v61, %v1470_v0  ;;  %v1600_v5 = vmax.f32 %v6717_v59, %v1472_v45  ;;  %v6063_v59 = vld [vmem:[#allocation4 + $0x744] ss:$16 sps:$4 sm:$0xff]  }
 0x155   :  { %v1478_v29 = vmul.f32 0.25, %v1020_v44  ;;  %3334 = vmatprep.mubr.bf16.mxu0 %v6721_v20  ;;  %v1480_v40 = vmul.f32 0.25, %v1133_v30  ;;  %3447 = vmatprep.mubr.bf16.mxu1 %v6725_v25  ;;  %v1599_v54 = vmax.f32 %v1018_v13, %v1471_v28  ;;  %v1601_v51 = vmax.f32 %v1131_v19, %v1473_v35 }
 0x156   :  { %v1022_v42 = vpop.f32.mrf.mxu0  ;;  %3335 = vmatmul.mubr.bf16.gmra.mxu0 %v6723_v22  ;;  %v1135_v47 = vpop.f32.mrf.mxu1  ;;  %3448 = vmatmul.mubr.bf16.gmra.mxu1 %v6727_v24 }
 0x157   :  { %v1479_v46 = vmul.f32 0.25, %v1022_v42  ;;  %3499 = vmatpush2.bf16.msra.mxu0 %v6040_v21  ;;  %v1606_v9 = vmax.f32 %v1020_v44, %v1478_v29  ;;  %v1481_v15 = vmul.f32 0.25, %v1135_v47  ;;  %3612 = vmatpush2.bf16.msra.mxu1 %v6043_v26  ;;  %v1608_v33 = vmax.f32 %v1133_v30, %v1480_v40  ;;  %v6055_v21 = vld [vmem:[#allocation4 + $0x760] ss:$16 sps:$4 sm:$0xff]   ;;  %v6060_v44 = vld [vmem:[#allocation4 + $0x544] ss:$16 sps:$4 sm:$0xff]  }
 0x158   :  { %v6735_v48 = vpop.f32.mrf.mxu0  ;;  %3500 = vmatprep.subr.bf16.mxu0 %v6048_v27  ;;  %v6737_v58 = vpop.f32.mrf.mxu1  ;;  %3613 = vmatprep.subr.bf16.mxu1 %v6051_v37 }
 0x159   :  { %v1607_v56 = vmax.f32 %v1022_v42, %v1479_v46  ;;  %v1609_v1 = vmax.f32 %v1135_v47, %v1481_v15  ;;  %v6743_v11 = vpack.c.bf16 %v1606_v9, %v1598_v62  ;;  %v6747_v61 = vpack.c.bf16 %v1608_v33, %v1600_v5  ;;  %v6058_v42 = vld [vmem:[#allocation4 + $0x540] ss:$16 sps:$4 sm:$0xff]   ;;  %v6066_v9 = vld [vmem:[#allocation4 + $0x524] ss:$16 sps:$4 sm:$0xff]  }
 0x15a   :  { %v1028_v4 = vpop.f32.mrf.mxu0  ;;  %v1141_v3 = vpop.f32.mrf.mxu1  ;;  %v1486_v28 = vmul.f32 0.25, %v6735_v48  ;;  %v1488_v0 = vmul.f32 0.25, %v6737_v58  ;;  %v6069_v33 = vld [vmem:[#allocation4 + $0x724] ss:$16 sps:$4 sm:$0xff]  }
 0x15b   :  { %3501 = vmatpush2.bf16.msra.mxu0 %v6046_v43  ;;  %v6741_v7 = vpack.c.bf16 %v1607_v56, %v1599_v54  ;;  %3614 = vmatpush2.bf16.msra.mxu1 %v6049_v49  ;;  %v6745_v16 = vpack.c.bf16 %v1609_v1, %v1601_v51  ;;  %v1487_v19 = vmul.f32 0.25, %v1028_v4  ;;  %v1489_v29 = vmul.f32 0.25, %v1141_v3  ;;  %v6061_v43 = vld [vmem:[#allocation4 + $0x740] ss:$16 sps:$4 sm:$0xff]  }
 0x15c   :  { %v1030_v13 = vpop.f32.mrf.mxu0  ;;  %3502 = vmatprep.subr.bf16.mxu0 %v6054_v52  ;;  %v1143_v27 = vpop.f32.mrf.mxu1  ;;  %3615 = vmatprep.subr.bf16.mxu1 %v6057_v60  ;;  %v1614_v56 = vmax.f32 %v6735_v48, %v1486_v28  ;;  %v1616_v1 = vmax.f32 %v6737_v58, %v1488_v0  ;;  %v6075_v58 = vld [vmem:[#allocation4 + $0x704] ss:$16 sps:$4 sm:$0xff]  }
 0x15d   :  { %v1494_v26 = vmul.f32 0.25, %v1030_v13  ;;  %3344 = vmatprep.mubr.bf16.mxu0 %v6741_v7  ;;  %v1496_v30 = vmul.f32 0.25, %v1143_v27  ;;  %3457 = vmatprep.mubr.bf16.mxu1 %v6745_v16  ;;  %v1615_v15 = vmax.f32 %v1028_v4, %v1487_v19  ;;  %v1617_v60 = vmax.f32 %v1141_v3, %v1489_v29  ;;  %v6067_v19 = vld [vmem:[#allocation4 + $0x720] ss:$16 sps:$4 sm:$0xff]  }
 0x15e   :  { %v1032_v37 = vpop.f32.mrf.mxu0  ;;  %3345 = vmatmul.mubr.bf16.gmra.mxu0 %v6743_v11  ;;  %v1145_v40 = vpop.f32.mrf.mxu1  ;;  %3458 = vmatmul.mubr.bf16.gmra.mxu1 %v6747_v61 }
 0x15f   :  { %v1495_v35 = vmul.f32 0.25, %v1032_v37  ;;  %3503 = vmatpush2.bf16.msra.mxu0 %v6052_v8  ;;  %v1622_v45 = vmax.f32 %v1030_v13, %v1494_v26  ;;  %v1497_v46 = vmul.f32 0.25, %v1145_v40  ;;  %3616 = vmatpush2.bf16.msra.mxu1 %v6055_v21  ;;  %v1624_v49 = vmax.f32 %v1143_v27, %v1496_v30  ;;  %v6064_v13 = vld [vmem:[#allocation4 + $0x520] ss:$16 sps:$4 sm:$0xff]   ;;  %v6072_v26 = vld [vmem:[#allocation4 + $0x504] ss:$16 sps:$4 sm:$0xff]  }
 0x160   :  { %v6755_v47 = vpop.f32.mrf.mxu0  ;;  %3504 = vmatprep.subr.bf16.mxu0 %v6060_v44  ;;  %v6757_v54 = vpop.f32.mrf.mxu1  ;;  %3617 = vmatprep.subr.bf16.mxu1 %v6063_v59 }
 0x161   :  { %v1623_v52 = vmax.f32 %v1032_v37, %v1495_v35  ;;  %v1625_v62 = vmax.f32 %v1145_v40, %v1497_v46  ;;  %v6763_v21 = vpack.c.bf16 %v1622_v45, %v1614_v56  ;;  %v6767_v48 = vpack.c.bf16 %v1624_v49, %v1616_v1 }
 0x162   :  { %v1184_v51 = vpop.f32.mrf.mxu0  ;;  %v1297_v5 = vpop.f32.mrf.mxu1  ;;  %v1378_v28 = vmul.f32 0.25, %v6755_v47  ;;  %v1380_v0 = vmul.f32 0.25, %v6757_v54 }
 0x163   :  { %3505 = vmatpush2.bf16.msra.mxu0 %v6058_v42  ;;  %v6761_v8 = vpack.c.bf16 %v1623_v52, %v1615_v15  ;;  %7711 = vst [vmem:[#allocation8_spill] sm:$0xff] %v6763_v21  ;;  %3618 = vmatpush2.bf16.msra.mxu1 %v6061_v43  ;;  %v6765_v44 = vpack.c.bf16 %v1625_v62, %v1617_v60  ;;  %7712 = vst [vmem:[#allocation9_spill] sm:$0xff] %v6767_v48  ;;  %v1379_v3 = vmul.f32 0.25, %v1184_v51  ;;  %v6070_v42 = vld [vmem:[#allocation4 + $0x500] ss:$16 sps:$4 sm:$0xff]  }
 0x164   :  { %v1186_v4 = vpop.f32.mrf.mxu0  ;;  %3506 = vmatprep.subr.bf16.mxu0 %v6066_v9  ;;  %v1299_v59 = vpop.f32.mrf.mxu1  ;;  %3619 = vmatprep.subr.bf16.mxu1 %v6069_v33  ;;  %v1381_v29 = vmul.f32 0.25, %v1297_v5  ;;  %v6073_v9 = vld [vmem:[#allocation4 + $0x700] ss:$16 sps:$4 sm:$0xff]   ;;  %v6078_v15 = vld [vmem:[#allocation4 + $0xec] ss:$16 sps:$4 sm:$0xff]   ;;  %v1506_v62 = vmax.f32 %v6755_v47, %v1378_v28 }
 0x165   :  { %v1386_v27 = vmul.f32 0.25, %v1186_v4  ;;  %3354 = vmatprep.mubr.bf16.mxu0 %v6761_v8  ;;  %v1388_v30 = vmul.f32 0.25, %v1299_v59  ;;  %3467 = vmatprep.mubr.bf16.mxu1 %v6765_v44  ;;  %v1507_v49 = vmax.f32 %v1184_v51, %v1379_v3  ;;  %v6081_v60 = vld [vmem:[#allocation4 + $0x2ec] ss:$16 sps:$4 sm:$0xff]  }
 0x166   :  { %v1188_v37 = vpop.f32.mrf.mxu0  ;;  %3355 = vmatmul.mubr.bf16.gmra.mxu0 %v6763_v21  ;;  %v1301_v40 = vpop.f32.mrf.mxu1  ;;  %3468 = vmatmul.mubr.bf16.gmra.mxu1 %v6767_v48  ;;  %v1509_v1 = vmax.f32 %v1297_v5, %v1381_v29 }
 0x167   :  { %v1387_v35 = vmul.f32 0.25, %v1188_v37  ;;  %3507 = vmatpush2.bf16.msra.mxu0 %v6064_v13  ;;  %v1514_v45 = vmax.f32 %v1186_v4, %v1386_v27  ;;  %v1389_v46 = vmul.f32 0.25, %v1301_v40  ;;  %3620 = vmatpush2.bf16.msra.mxu1 %v6067_v19  ;;  %v1516_v52 = vmax.f32 %v1299_v59, %v1388_v30  ;;  %v6079_v59 = vld [vmem:[#allocation4 + $0x2e8] ss:$16 sps:$4 sm:$0xff]  }
 0x168   :  { %v6775_v43 = vpop.f32.mrf.mxu0  ;;  %3508 = vmatprep.subr.bf16.mxu0 %v6072_v26  ;;  %v6777_v56 = vpop.f32.mrf.mxu1  ;;  %3621 = vmatprep.subr.bf16.mxu1 %v6075_v58  ;;  %v1508_v4 = vmax.f32 %v6757_v54, %v1380_v0  ;;  %v6076_v26 = vld [vmem:[#allocation4 + $0xe8] ss:$16 sps:$4 sm:$0xff]   ;;  %v6084_v58 = vld [vmem:[#allocation4 + $0xcc] ss:$16 sps:$4 sm:$0xff]  }
 0x169   :  { %v1515_v33 = vmax.f32 %v1188_v37, %v1387_v35  ;;  %v1517_v13 = vmax.f32 %v1301_v40, %v1389_v46  ;;  %v6783_v21 = vpack.c.bf16 %v1514_v45, %v1506_v62  ;;  %v6087_v54 = vld [vmem:[#allocation4 + $0x2cc] ss:$16 sps:$4 sm:$0xff]   ;;  %v1394_v30 = vmul.f32 0.25, %v6775_v43  ;;  %v6082_v46 = vld [vmem:[#allocation4 + $0xc8] ss:$16 sps:$4 sm:$0xff]  }
 0x16a   :  { %v1194_v48 = vpop.f32.mrf.mxu0  ;;  %v1307_v19 = vpop.f32.mrf.mxu1  ;;  %v6787_v47 = vpack.c.bf16 %v1516_v52, %v1508_v4  ;;  %v1396_v40 = vmul.f32 0.25, %v6777_v56  ;;  %v6085_v52 = vld [vmem:[#allocation4 + $0x2c8] ss:$16 sps:$4 sm:$0xff]   ;;  %v6093_v4 = vld [vmem:[#allocation4 + $0x2ac] ss:$16 sps:$4 sm:$0xff]  }
 0x16b   :  { %3509 = vmatpush2.bf16.msra.mxu0 %v6070_v42  ;;  %v6781_v27 = vpack.c.bf16 %v1515_v33, %v1507_v49  ;;  %7714 = vst [vmem:[#allocation11_spill] sm:$0xff] %v6783_v21  ;;  %3622 = vmatpush2.bf16.msra.mxu1 %v6073_v9  ;;  %v6785_v3 = vpack.c.bf16 %v1517_v13, %v1509_v1  ;;  %v1395_v5 = vmul.f32 0.25, %v1194_v48  ;;  %v1397_v37 = vmul.f32 0.25, %v1307_v19  ;;  %v6090_v33 = vld [vmem:[#allocation4 + $0xac] ss:$16 sps:$4 sm:$0xff]  }
 0x16c   :  { %v1196_v51 = vpop.f32.mrf.mxu0  ;;  %3704 = vmatprep.subr.bf16.mxu0 %v6078_v15  ;;  %7716 = vst [vmem:[#allocation13_spill] sm:$0xff] %v6787_v47  ;;  %v1309_v29 = vpop.f32.mrf.mxu1  ;;  %3817 = vmatprep.subr.bf16.mxu1 %v6081_v60 }
 0x16d   :  { %7713 = vst [vmem:[#allocation10_spill] sm:$0xff] %v6781_v27  ;;  %7715 = vst [vmem:[#allocation12_spill] sm:$0xff] %v6785_v3  ;;  %v1402_v28 = vmul.f32 0.25, %v1196_v51  ;;  %3510 = vmatprep.mubr.bf16.mxu0 %v6781_v27  ;;  %v1404_v0 = vmul.f32 0.25, %v1309_v29  ;;  %3623 = vmatprep.mubr.bf16.mxu1 %v6785_v3  ;;  %v1523_v60 = vmax.f32 %v1194_v48, %v1395_v5 }
 0x16e   :  { %v1198_v35 = vpop.f32.mrf.mxu0  ;;  %3511 = vmatmul.mubr.bf16.vlgmr.msra.gmra.mxu0 %v6783_v21  ;;  %v1311_v45 = vpop.f32.mrf.mxu1  ;;  %3624 = vmatmul.mubr.bf16.vlgmr.msra.gmra.mxu1 %v6787_v47  ;;  %v1522_v21 = vmax.f32 %v6775_v43, %v1394_v30  ;;  %v1525_v47 = vmax.f32 %v1307_v19, %v1397_v37 }
 0x16f   :  { %v1403_v42 = vmul.f32 0.25, %v1198_v35  ;;  %3705 = vmatpush1.bf16.msra.mxu0 %v6076_v26  ;;  %v1530_v9 = vmax.f32 %v1196_v51, %v1402_v28  ;;  %v1405_v15 = vmul.f32 0.25, %v1311_v45  ;;  %3818 = vmatpush1.bf16.msra.mxu1 %v6079_v59  ;;  %v1532_v62 = vmax.f32 %v1309_v29, %v1404_v0  ;;  %v6091_v29 = vld [vmem:[#allocation4 + $0x2a8] ss:$16 sps:$4 sm:$0xff]  }
 0x170   :  { %v6795_v49 = vpop.f32.mrf.mxu0  ;;  %3706 = vmatprep.subr.bf16.mxu0 %v6084_v58  ;;  %v6797_v13 = vpop.f32.mrf.mxu1  ;;  %3819 = vmatprep.subr.bf16.mxu1 %v6087_v54  ;;  %v1524_v51 = vmax.f32 %v6777_v56, %v1396_v40  ;;  %v6088_v58 = vld [vmem:[#allocation4 + $0xa8] ss:$16 sps:$4 sm:$0xff]   ;;  %v6096_v54 = vld [vmem:[#allocation4 + $0x8c] ss:$16 sps:$4 sm:$0xff]  }
 0x171   :  { %v1531_v1 = vmax.f32 %v1198_v35, %v1403_v42  ;;  %v1533_v26 = vmax.f32 %v1311_v45, %v1405_v15  ;;  %v6803_v27 = vpack.c.bf16 %v1530_v9, %v1522_v21  ;;  %v6099_v56 = vld [vmem:[#allocation4 + $0x28c] ss:$16 sps:$4 sm:$0xff]   ;;  %v1410_v0 = vmul.f32 0.25, %v6795_v49 }
 0x172   :  { %v1204_v3 = vpop.f32.mrf.mxu0  ;;  %v1317_v59 = vpop.f32.mrf.mxu1  ;;  %v6807_v43 = vpack.c.bf16 %v1532_v62, %v1524_v51  ;;  %v1412_v40 = vmul.f32 0.25, %v6797_v13  ;;  %v6105_v51 = vld [vmem:[#allocation4 + $0x26c] ss:$16 sps:$4 sm:$0xff]  }
 0x173   :  { %3707 = vmatpush1.bf16.msra.mxu0 %v6082_v46  ;;  %v6801_v28 = vpack.c.bf16 %v1531_v1, %v1523_v60  ;;  %7718 = vst [vmem:[#allocation15_spill] sm:$0xff] %v6803_v27  ;;  %3820 = vmatpush1.bf16.msra.mxu1 %v6085_v52  ;;  %v6805_v5 = vpack.c.bf16 %v1533_v26, %v1525_v47  ;;  %v1411_v19 = vmul.f32 0.25, %v1204_v3  ;;  %v1413_v21 = vmul.f32 0.25, %v1317_v59  ;;  %v6094_v46 = vld [vmem:[#allocation4 + $0x88] ss:$16 sps:$4 sm:$0xff]  }
 0x174   :  { %v1206_v48 = vpop.f32.mrf.mxu0  ;;  %3708 = vmatprep.subr.bf16.mxu0 %v6090_v33  ;;  %7720 = vst [vmem:[#allocation17_spill] sm:$0xff] %v6807_v43  ;;  %v1319_v37 = vpop.f32.mrf.mxu1  ;;  %3821 = vmatprep.subr.bf16.mxu1 %v6093_v4  ;;  %v6097_v33 = vld [vmem:[#allocation4 + $0x288] ss:$16 sps:$4 sm:$0xff]   ;;  %v6102_v60 = vld [vmem:[#allocation4 + $0x6c] ss:$16 sps:$4 sm:$0xff]  }
 0x175   :  { %7717 = vst [vmem:[#allocation14_spill] sm:$0xff] %v6801_v28  ;;  %7719 = vst [vmem:[#allocation16_spill] sm:$0xff] %v6805_v5  ;;  %v1418_v30 = vmul.f32 0.25, %v1206_v48  ;;  %3520 = vmatprep.mubr.bf16.mxu0 %v6801_v28  ;;  %v1420_v35 = vmul.f32 0.25, %v1319_v37  ;;  %3633 = vmatprep.mubr.bf16.mxu1 %v6805_v5  ;;  %v1539_v62 = vmax.f32 %v1204_v3, %v1411_v19 }
 0x176   :  { %v1208_v47 = vpop.f32.mrf.mxu0  ;;  %3521 = vmatmul.mubr.bf16.gmra.mxu0 %v6803_v27  ;;  %v1321_v45 = vpop.f32.mrf.mxu1  ;;  %3634 = vmatmul.mubr.bf16.gmra.mxu1 %v6807_v43  ;;  %v1538_v27 = vmax.f32 %v6795_v49, %v1410_v0  ;;  %v1541_v43 = vmax.f32 %v1317_v59, %v1413_v21 }
 0x177   :  { %v1419_v42 = vmul.f32 0.25, %v1208_v47  ;;  %3709 = vmatpush1.bf16.msra.mxu0 %v6088_v58  ;;  %v1546_v9 = vmax.f32 %v1206_v48, %v1418_v30  ;;  %v1421_v15 = vmul.f32 0.25, %v1321_v45  ;;  %3822 = vmatpush1.bf16.msra.mxu1 %v6091_v29  ;;  %v1548_v1 = vmax.f32 %v1319_v37, %v1420_v35  ;;  %v6103_v37 = vld [vmem:[#allocation4 + $0x268] ss:$16 sps:$4 sm:$0xff]  }
 0x178   :  { %v6815_v52 = vpop.f32.mrf.mxu0  ;;  %3710 = vmatprep.subr.bf16.mxu0 %v6096_v54  ;;  %v6817_v26 = vpop.f32.mrf.mxu1  ;;  %3823 = vmatprep.subr.bf16.mxu1 %v6099_v56  ;;  %v1540_v48 = vmax.f32 %v6797_v13, %v1412_v40  ;;  %v6100_v54 = vld [vmem:[#allocation4 + $0x68] ss:$16 sps:$4 sm:$0xff]   ;;  %v6108_v56 = vld [vmem:[#allocation4 + $0x4c] ss:$16 sps:$4 sm:$0xff]  }
 0x179   :  { %v1547_v4 = vmax.f32 %v1208_v47, %v1419_v42  ;;  %v1549_v58 = vmax.f32 %v1321_v45, %v1421_v15  ;;  %v6823_v28 = vpack.c.bf16 %v1546_v9, %v1538_v27  ;;  %v6111_v13 = vld [vmem:[#allocation4 + $0x24c] ss:$16 sps:$4 sm:$0xff]   ;;  %v1426_v35 = vmul.f32 0.25, %v6815_v52 }
 0x17a   :  { %v1214_v5 = vpop.f32.mrf.mxu0  ;;  %v1327_v29 = vpop.f32.mrf.mxu1  ;;  %v6827_v49 = vpack.c.bf16 %v1548_v1, %v1540_v48  ;;  %v1428_v40 = vmul.f32 0.25, %v6817_v26  ;;  %v6117_v48 = vld [vmem:[#allocation4 + $0x22c] ss:$16 sps:$4 sm:$0xff]  }
 0x17b   :  { %3711 = vmatpush1.bf16.msra.mxu0 %v6094_v46  ;;  %v6821_v30 = vpack.c.bf16 %v1547_v4, %v1539_v62  ;;  %7722 = vst [vmem:[#allocation19_spill] sm:$0xff] %v6823_v28  ;;  %3824 = vmatpush1.bf16.msra.mxu1 %v6097_v33  ;;  %v6825_v19 = vpack.c.bf16 %v1549_v58, %v1541_v43  ;;  %v1427_v59 = vmul.f32 0.25, %v1214_v5  ;;  %v1429_v27 = vmul.f32 0.25, %v1327_v29  ;;  %v6106_v46 = vld [vmem:[#allocation4 + $0x48] ss:$16 sps:$4 sm:$0xff]  }
 0x17c   :  { %v1216_v3 = vpop.f32.mrf.mxu0  ;;  %3712 = vmatprep.subr.bf16.mxu0 %v6102_v60  ;;  %7724 = vst [vmem:[#allocation21_spill] sm:$0xff] %v6827_v49  ;;  %v1329_v21 = vpop.f32.mrf.mxu1  ;;  %3825 = vmatprep.subr.bf16.mxu1 %v6105_v51  ;;  %v6109_v60 = vld [vmem:[#allocation4 + $0x248] ss:$16 sps:$4 sm:$0xff]   ;;  %v6114_v62 = vld [vmem:[#allocation4 + $0x2c] ss:$16 sps:$4 sm:$0xff]  }
 0x17d   :  { %7721 = vst [vmem:[#allocation18_spill] sm:$0xff] %v6821_v30  ;;  %7723 = vst [vmem:[#allocation20_spill] sm:$0xff] %v6825_v19  ;;  %v1434_v0 = vmul.f32 0.25, %v1216_v3  ;;  %3530 = vmatprep.mubr.bf16.mxu0 %v6821_v30  ;;  %v1436_v47 = vmul.f32 0.25, %v1329_v21  ;;  %3643 = vmatprep.mubr.bf16.mxu1 %v6825_v19  ;;  %v1555_v1 = vmax.f32 %v1214_v5, %v1427_v59 }
 0x17e   :  { %v1218_v43 = vpop.f32.mrf.mxu0  ;;  %3531 = vmatmul.mubr.bf16.gmra.mxu0 %v6823_v28  ;;  %v1331_v45 = vpop.f32.mrf.mxu1  ;;  %3644 = vmatmul.mubr.bf16.gmra.mxu1 %v6827_v49  ;;  %v1554_v28 = vmax.f32 %v6815_v52, %v1426_v35  ;;  %v1557_v49 = vmax.f32 %v1327_v29, %v1429_v27 }
 0x17f   :  { %v1435_v42 = vmul.f32 0.25, %v1218_v43  ;;  %3713 = vmatpush1.bf16.msra.mxu0 %v6100_v54  ;;  %v1562_v9 = vmax.f32 %v1216_v3, %v1434_v0  ;;  %v1437_v15 = vmul.f32 0.25, %v1331_v45  ;;  %3826 = vmatpush1.bf16.msra.mxu1 %v6103_v37  ;;  %v1564_v4 = vmax.f32 %v1329_v21, %v1436_v47  ;;  %v6115_v21 = vld [vmem:[#allocation4 + $0x228] ss:$16 sps:$4 sm:$0xff]  }
 0x180   :  { %v6835_v33 = vpop.f32.mrf.mxu0  ;;  %3714 = vmatprep.subr.bf16.mxu0 %v6108_v56  ;;  %v6837_v58 = vpop.f32.mrf.mxu1  ;;  %3827 = vmatprep.subr.bf16.mxu1 %v6111_v13  ;;  %v1556_v3 = vmax.f32 %v6817_v26, %v1428_v40  ;;  %v6112_v56 = vld [vmem:[#allocation4 + $0x28] ss:$16 sps:$4 sm:$0xff]   ;;  %v6120_v13 = vld [vmem:[#allocation4 + $0xc] ss:$16 sps:$4 sm:$0xff]  }
 0x181   :  { %v1563_v51 = vmax.f32 %v1218_v43, %v1435_v42  ;;  %v1565_v54 = vmax.f32 %v1331_v45, %v1437_v15  ;;  %v6843_v30 = vpack.c.bf16 %v1562_v9, %v1554_v28  ;;  %v6123_v26 = vld [vmem:[#allocation4 + $0x20c] ss:$16 sps:$4 sm:$0xff]   ;;  %v1442_v47 = vmul.f32 0.25, %v6835_v33 }
 0x182   :  { %v1224_v19 = vpop.f32.mrf.mxu0  ;;  %v1337_v37 = vpop.f32.mrf.mxu1  ;;  %v6847_v52 = vpack.c.bf16 %v1564_v4, %v1556_v3  ;;  %v1444_v40 = vmul.f32 0.25, %v6837_v58  ;;  %v6129_v3 = vld [vmem:[#allocation4 + $0x3ec] ss:$16 sps:$4 sm:$0xff]  }
 0x183   :  { %3715 = vmatpush1.bf16.msra.mxu0 %v6106_v46  ;;  %v6841_v0 = vpack.c.bf16 %v1563_v51, %v1555_v1  ;;  %7726 = vst [vmem:[#allocation23_spill] sm:$0xff] %v6843_v30  ;;  %3828 = vmatpush1.bf16.msra.mxu1 %v6109_v60  ;;  %v6845_v59 = vpack.c.bf16 %v1565_v54, %v1557_v49  ;;  %v1443_v29 = vmul.f32 0.25, %v1224_v19  ;;  %v1445_v28 = vmul.f32 0.25, %v1337_v37  ;;  %v6118_v46 = vld [vmem:[#allocation4 + $0x8] ss:$16 sps:$4 sm:$0xff]  }
 0x184   :  { %v1226_v5 = vpop.f32.mrf.mxu0  ;;  %3716 = vmatprep.subr.bf16.mxu0 %v6114_v62  ;;  %7728 = vst [vmem:[#allocation25_spill] sm:$0xff] %v6847_v52  ;;  %v1339_v27 = vpop.f32.mrf.mxu1  ;;  %3829 = vmatprep.subr.bf16.mxu1 %v6117_v48  ;;  %v6121_v62 = vld [vmem:[#allocation4 + $0x208] ss:$16 sps:$4 sm:$0xff]   ;;  %v6126_v1 = vld [vmem:[#allocation4 + $0x1ec] ss:$16 sps:$4 sm:$0xff]  }
 0x185   :  { %7725 = vst [vmem:[#allocation22_spill] sm:$0xff] %v6841_v0  ;;  %7727 = vst [vmem:[#allocation24_spill] sm:$0xff] %v6845_v59  ;;  %v1450_v35 = vmul.f32 0.25, %v1226_v5  ;;  %3540 = vmatprep.mubr.bf16.mxu0 %v6841_v0  ;;  %v1452_v43 = vmul.f32 0.25, %v1339_v27  ;;  %3653 = vmatprep.mubr.bf16.mxu1 %v6845_v59  ;;  %v1571_v4 = vmax.f32 %v1224_v19, %v1443_v29 }
 0x186   :  { %v1228_v49 = vpop.f32.mrf.mxu0  ;;  %3541 = vmatmul.mubr.bf16.gmra.mxu0 %v6843_v30  ;;  %v1341_v45 = vpop.f32.mrf.mxu1  ;;  %3654 = vmatmul.mubr.bf16.gmra.mxu1 %v6847_v52  ;;  %v1570_v30 = vmax.f32 %v6835_v33, %v1442_v47  ;;  %v1573_v52 = vmax.f32 %v1337_v37, %v1445_v28 }
 0x187   :  { %v1451_v42 = vmul.f32 0.25, %v1228_v49  ;;  %3717 = vmatpush1.bf16.msra.mxu0 %v6112_v56  ;;  %v1578_v9 = vmax.f32 %v1226_v5, %v1450_v35  ;;  %v1453_v15 = vmul.f32 0.25, %v1341_v45  ;;  %3830 = vmatpush1.bf16.msra.mxu1 %v6115_v21  ;;  %v1580_v51 = vmax.f32 %v1339_v27, %v1452_v43  ;;  %v6127_v27 = vld [vmem:[#allocation4 + $0x3e8] ss:$16 sps:$4 sm:$0xff]  }
 0x188   :  { %v6855_v60 = vpop.f32.mrf.mxu0  ;;  %3718 = vmatprep.subr.bf16.mxu0 %v6120_v13  ;;  %v6857_v54 = vpop.f32.mrf.mxu1  ;;  %3831 = vmatprep.subr.bf16.mxu1 %v6123_v26  ;;  %v1572_v5 = vmax.f32 %v6837_v58, %v1444_v40  ;;  %v6124_v13 = vld [vmem:[#allocation4 + $0x1e8] ss:$16 sps:$4 sm:$0xff]   ;;  %v6132_v26 = vld [vmem:[#allocation4 + $0x1cc] ss:$16 sps:$4 sm:$0xff]  }
 0x189   :  { %v1579_v48 = vmax.f32 %v1228_v49, %v1451_v42  ;;  %v1581_v56 = vmax.f32 %v1341_v45, %v1453_v15  ;;  %v6863_v0 = vpack.c.bf16 %v1578_v9, %v1570_v30  ;;  %v6135_v58 = vld [vmem:[#allocation4 + $0x3cc] ss:$16 sps:$4 sm:$0xff]   ;;  %v1458_v43 = vmul.f32 0.25, %v6855_v60 }
 0x18a   :  { %v1234_v59 = vpop.f32.mrf.mxu0  ;;  %v1347_v21 = vpop.f32.mrf.mxu1  ;;  %v6867_v33 = vpack.c.bf16 %v1580_v51, %v1572_v5  ;;  %v1460_v40 = vmul.f32 0.25, %v6857_v54  ;;  %v6141_v5 = vld [vmem:[#allocation4 + $0x3ac] ss:$16 sps:$4 sm:$0xff]  }
 0x18b   :  { %3719 = vmatpush1.bf16.msra.mxu0 %v6118_v46  ;;  %v6861_v35 = vpack.c.bf16 %v1579_v48, %v1571_v4  ;;  %7730 = vst [vmem:[#allocation27_spill] sm:$0xff] %v6863_v0  ;;  %3832 = vmatpush1.bf16.msra.mxu1 %v6121_v62  ;;  %v6865_v29 = vpack.c.bf16 %v1581_v56, %v1573_v52  ;;  %v1459_v37 = vmul.f32 0.25, %v1234_v59  ;;  %v1461_v30 = vmul.f32 0.25, %v1347_v21  ;;  %v6130_v46 = vld [vmem:[#allocation4 + $0x1c8] ss:$16 sps:$4 sm:$0xff]  }
 0x18c   :  { %v1236_v19 = vpop.f32.mrf.mxu0  ;;  %3720 = vmatprep.subr.bf16.mxu0 %v6126_v1  ;;  %7732 = vst [vmem:[#allocation29_spill] sm:$0xff] %v6867_v33  ;;  %v1349_v28 = vpop.f32.mrf.mxu1  ;;  %3833 = vmatprep.subr.bf16.mxu1 %v6129_v3  ;;  %v6133_v1 = vld [vmem:[#allocation4 + $0x3c8] ss:$16 sps:$4 sm:$0xff]   ;;  %v6138_v4 = vld [vmem:[#allocation4 + $0x1ac] ss:$16 sps:$4 sm:$0xff]  }
 0x18d   :  { %7729 = vst [vmem:[#allocation26_spill] sm:$0xff] %v6861_v35  ;;  %7731 = vst [vmem:[#allocation28_spill] sm:$0xff] %v6865_v29  ;;  %v1466_v47 = vmul.f32 0.25, %v1236_v19  ;;  %3550 = vmatprep.mubr.bf16.mxu0 %v6861_v35  ;;  %v1468_v49 = vmul.f32 0.25, %v1349_v28  ;;  %3663 = vmatprep.mubr.bf16.mxu1 %v6865_v29  ;;  %v1587_v51 = vmax.f32 %v1234_v59, %v1459_v37 }
 0x18e   :  { %v1238_v52 = vpop.f32.mrf.mxu0  ;;  %3551 = vmatmul.mubr.bf16.gmra.mxu0 %v6863_v0  ;;  %v1351_v45 = vpop.f32.mrf.mxu1  ;;  %3664 = vmatmul.mubr.bf16.gmra.mxu1 %v6867_v33  ;;  %v1586_v0 = vmax.f32 %v6855_v60, %v1458_v43  ;;  %v1589_v33 = vmax.f32 %v1347_v21, %v1461_v30 }
 0x18f   :  { %v1467_v42 = vmul.f32 0.25, %v1238_v52  ;;  %3721 = vmatpush2.bf16.msra.mxu0 %v6124_v13  ;;  %v1594_v9 = vmax.f32 %v1236_v19, %v1466_v47  ;;  %v1469_v15 = vmul.f32 0.25, %v1351_v45  ;;  %3834 = vmatpush2.bf16.msra.mxu1 %v6127_v27  ;;  %v1596_v48 = vmax.f32 %v1349_v28, %v1468_v49  ;;  %v6139_v28 = vld [vmem:[#allocation4 + $0x3a8] ss:$16 sps:$4 sm:$0xff]  }
 0x190   :  { %v6875_v62 = vpop.f32.mrf.mxu0  ;;  %3722 = vmatprep.subr.bf16.mxu0 %v6132_v26  ;;  %v6877_v56 = vpop.f32.mrf.mxu1  ;;  %3835 = vmatprep.subr.bf16.mxu1 %v6135_v58  ;;  %v1588_v19 = vmax.f32 %v6857_v54, %v1460_v40  ;;  %v6136_v26 = vld [vmem:[#allocation4 + $0x1a8] ss:$16 sps:$4 sm:$0xff]   ;;  %v6144_v58 = vld [vmem:[#allocation4 + $0x18c] ss:$16 sps:$4 sm:$0xff]  }
 0x191   :  { %v1595_v3 = vmax.f32 %v1238_v52, %v1467_v42  ;;  %v1597_v13 = vmax.f32 %v1351_v45, %v1469_v15  ;;  %v6883_v35 = vpack.c.bf16 %v1594_v9, %v1586_v0  ;;  %v6147_v54 = vld [vmem:[#allocation4 + $0x38c] ss:$16 sps:$4 sm:$0xff]   ;;  %v1474_v49 = vmul.f32 0.25, %v6875_v62 }
 0x192   :  { %v1244_v29 = vpop.f32.mrf.mxu0  ;;  %v1357_v27 = vpop.f32.mrf.mxu1  ;;  %v6887_v60 = vpack.c.bf16 %v1596_v48, %v1588_v19  ;;  %v1476_v40 = vmul.f32 0.25, %v6877_v56  ;;  %v6153_v19 = vld [vmem:[#allocation4 + $0x36c] ss:$16 sps:$4 sm:$0xff]  }
 0x193   :  { %3723 = vmatpush2.bf16.msra.mxu0 %v6130_v46  ;;  %v6881_v47 = vpack.c.bf16 %v1595_v3, %v1587_v51  ;;  %7734 = vst [vmem:[#allocation31_spill] sm:$0xff] %v6883_v35  ;;  %3836 = vmatpush2.bf16.msra.mxu1 %v6133_v1  ;;  %v6885_v37 = vpack.c.bf16 %v1597_v13, %v1589_v33  ;;  %v1475_v21 = vmul.f32 0.25, %v1244_v29  ;;  %v1477_v0 = vmul.f32 0.25, %v1357_v27  ;;  %v6142_v46 = vld [vmem:[#allocation4 + $0x188] ss:$16 sps:$4 sm:$0xff]  }
 0x194   :  { %v1246_v59 = vpop.f32.mrf.mxu0  ;;  %3724 = vmatprep.subr.bf16.mxu0 %v6138_v4  ;;  %7736 = vst [vmem:[#allocation33_spill] sm:$0xff] %v6887_v60  ;;  %v1359_v30 = vpop.f32.mrf.mxu1  ;;  %3837 = vmatprep.subr.bf16.mxu1 %v6141_v5  ;;  %v6145_v4 = vld [vmem:[#allocation4 + $0x388] ss:$16 sps:$4 sm:$0xff]   ;;  %v6150_v51 = vld [vmem:[#allocation4 + $0x16c] ss:$16 sps:$4 sm:$0xff]  }
 0x195   :  { %7733 = vst [vmem:[#allocation30_spill] sm:$0xff] %v6881_v47  ;;  %7735 = vst [vmem:[#allocation32_spill] sm:$0xff] %v6885_v37  ;;  %v1482_v43 = vmul.f32 0.25, %v1246_v59  ;;  %3560 = vmatprep.mubr.bf16.mxu0 %v6881_v47  ;;  %v1484_v52 = vmul.f32 0.25, %v1359_v30  ;;  %3673 = vmatprep.mubr.bf16.mxu1 %v6885_v37  ;;  %v1603_v48 = vmax.f32 %v1244_v29, %v1475_v21 }
 0x196   :  { %v1248_v33 = vpop.f32.mrf.mxu0  ;;  %3561 = vmatmul.mubr.bf16.gmra.mxu0 %v6883_v35  ;;  %v1361_v45 = vpop.f32.mrf.mxu1  ;;  %3674 = vmatmul.mubr.bf16.gmra.mxu1 %v6887_v60  ;;  %v1602_v35 = vmax.f32 %v6875_v62, %v1474_v49  ;;  %v1605_v37 = vmax.f32 %v1357_v27, %v1477_v0 }
 0x197   :  { %v1483_v42 = vmul.f32 0.25, %v1248_v33  ;;  %3725 = vmatpush2.bf16.msra.mxu0 %v6136_v26  ;;  %v1610_v9 = vmax.f32 %v1246_v59, %v1482_v43  ;;  %v1485_v15 = vmul.f32 0.25, %v1361_v45  ;;  %3838 = vmatpush2.bf16.msra.mxu1 %v6139_v28  ;;  %v1612_v3 = vmax.f32 %v1359_v30, %v1484_v52  ;;  %v6151_v30 = vld [vmem:[#allocation4 + $0x368] ss:$16 sps:$4 sm:$0xff]  }
 0x198   :  { %v6895_v1 = vpop.f32.mrf.mxu0  ;;  %3726 = vmatprep.subr.bf16.mxu0 %v6144_v58  ;;  %v1365_v13 = vpop.f32.mrf.mxu1  ;;  %3839 = vmatprep.subr.bf16.mxu1 %v6147_v54  ;;  %v1604_v59 = vmax.f32 %v6877_v56, %v1476_v40  ;;  %v6148_v58 = vld [vmem:[#allocation4 + $0x168] ss:$16 sps:$4 sm:$0xff]   ;;  %v6156_v54 = vld [vmem:[#allocation4 + $0x14c] ss:$16 sps:$4 sm:$0xff]  }
 0x199   :  { %v1611_v5 = vmax.f32 %v1248_v33, %v1483_v42  ;;  %v1613_v60 = vmax.f32 %v1361_v45, %v1485_v15  ;;  %v6901_v47 = vpack.c.bf16 %v1610_v9, %v1602_v35  ;;  %v6159_v56 = vld [vmem:[#allocation4 + $0x34c] ss:$16 sps:$4 sm:$0xff]   ;;  %v1490_v52 = vmul.f32 0.25, %v6895_v1  ;;  %v6154_v45 = vld [vmem:[#allocation4 + $0x148] ss:$16 sps:$4 sm:$0xff]  }
 0x19a   :  { %v1254_v26 = vpop.f32.mrf.mxu0  ;;  %v1367_v43 = vpop.f32.mrf.mxu1  ;;  %v6905_v62 = vpack.c.bf16 %v1612_v3, %v1604_v59  ;;  %v6157_v15 = vld [vmem:[#allocation4 + $0x348] ss:$16 sps:$4 sm:$0xff]  }
 0x19b   :  { %3727 = vmatpush2.bf16.msra.mxu0 %v6142_v46  ;;  %v6899_v28 = vpack.c.bf16 %v1611_v5, %v1603_v48  ;;  %7737 = vst [vmem:[#allocation34_spill] sm:$0xff] %v6901_v47  ;;  %3840 = vmatpush2.bf16.msra.mxu1 %v6145_v4  ;;  %v6903_v21 = vpack.c.bf16 %v1613_v60, %v1605_v37  ;;  %v1491_v27 = vmul.f32 0.25, %v1254_v26  ;;  %v1493_v35 = vmul.f32 0.25, %v1367_v43  ;;  %v6162_v4 = vld [vmem:[#allocation4 + $0x12c] ss:$16 sps:$4 sm:$0xff]  }
 0x19c   :  { %v1256_v29 = vpop.f32.mrf.mxu0  ;;  %3728 = vmatprep.subr.bf16.mxu0 %v6150_v51  ;;  %7739 = vst [vmem:[#allocation36_spill] sm:$0xff] %v6905_v62  ;;  %v1369_v0 = vpop.f32.mrf.mxu1  ;;  %3841 = vmatprep.subr.bf16.mxu1 %v6153_v19  ;;  %v1492_v60 = vmul.f32 0.25, %v1365_v13  ;;  %v6165_v5 = vld [vmem:[#allocation4 + $0x32c] ss:$16 sps:$4 sm:$0xff]   ;;  %v1618_v19 = vmax.f32 %v6895_v1, %v1490_v52 }
 0x19d   :  { %7738 = vst [vmem:[#allocation35_spill] sm:$0xff] %v6903_v21  ;;  %v1498_v49 = vmul.f32 0.25, %v1256_v29  ;;  %3570 = vmatprep.mubr.bf16.mxu0 %v6899_v28  ;;  %v1500_v33 = vmul.f32 0.25, %v1369_v0  ;;  %3683 = vmatprep.mubr.bf16.mxu1 %v6903_v21  ;;  %v1619_v51 = vmax.f32 %v1254_v26, %v1491_v27  ;;  %v1621_v59 = vmax.f32 %v1367_v43, %v1493_v35  ;;  %v6163_v26 = vld [vmem:[#allocation4 + $0x328] ss:$16 sps:$4 sm:$0xff]  }
 0x19e   :  { %v1258_v37 = vpop.f32.mrf.mxu0  ;;  %3571 = vmatmul.mubr.bf16.gmra.mxu0 %v6901_v47  ;;  %v1371_v42 = vpop.f32.mrf.mxu1  ;;  %3684 = vmatmul.mubr.bf16.gmra.mxu1 %v6905_v62  ;;  %v1620_v21 = vmax.f32 %v1365_v13, %v1492_v60  ;;  %v6168_v1 = vld [vmem:[#allocation4 + $0x10c] ss:$16 sps:$4 sm:$0xff]   ;;  %v6166_v43 = vld [vmem:[#allocation4 + $0x108] ss:$16 sps:$4 sm:$0xff]  }
 0x19f   :  { %v1499_v40 = vmul.f32 0.25, %v1258_v37  ;;  %3729 = vmatpush2.bf16.msra.mxu0 %v6148_v58  ;;  %v1626_v46 = vmax.f32 %v1256_v29, %v1498_v49  ;;  %v1501_v9 = vmul.f32 0.25, %v1371_v42  ;;  %3842 = vmatpush2.bf16.msra.mxu1 %v6151_v30  ;;  %v1628_v48 = vmax.f32 %v1369_v0, %v1500_v33  ;;  %v6160_v58 = vld [vmem:[#allocation4 + $0x128] ss:$16 sps:$4 sm:$0xff]   ;;  %v6171_v13 = vld [vmem:[#allocation4 + $0x30c] ss:$16 sps:$4 sm:$0xff]  }
 0x1a0   :  { %3730 = vmatprep.subr.bf16.mxu0 %v6156_v54  ;;  %3843 = vmatprep.subr.bf16.mxu1 %v6159_v56  ;;  %v6174_v27 = vld [vmem:[#allocation4 + $0x4ec] ss:$16 sps:$4 sm:$0xff]   ;;  %v6172_v49 = vld [vmem:[#allocation4 + $0x4e8] ss:$16 sps:$4 sm:$0xff]  }
 0x1a1   :  { %v1627_v3 = vmax.f32 %v1258_v37, %v1499_v40  ;;  %v1629_v47 = vmax.f32 %v1371_v42, %v1501_v9  ;;  %v6915_v29 = vpack.c.bf16 %v1626_v46, %v1618_v19  ;;  %v6919_v54 = vpack.c.bf16 %v1628_v48, %v1620_v21  ;;  %v6177_v21 = vld [vmem:[#allocation4 + $0x6ec] ss:$16 sps:$4 sm:$0xff]   ;;  %v6175_v0 = vld [vmem:[#allocation4 + $0x6e8] ss:$16 sps:$4 sm:$0xff]  }
 0x1a2   :  { %v6180_v56 = vld [vmem:[#allocation4 + $0x4cc] ss:$16 sps:$4 sm:$0xff]   ;;  %v6184_v37 = vld [vmem:[#allocation4 + $0x4a8] ss:$16 sps:$4 sm:$0xff]  }
 0x1a3   :  { %3731 = vmatpush2.bf16.msra.mxu0 %v6154_v45  ;;  %v6913_v62 = vpack.c.bf16 %v1627_v3, %v1619_v51  ;;  %3844 = vmatpush2.bf16.msra.mxu1 %v6157_v15  ;;  %v6917_v30 = vpack.c.bf16 %v1629_v47, %v1621_v59  ;;  %v6169_v47 = vld [vmem:[#allocation4 + $0x308] ss:$16 sps:$4 sm:$0xff]   ;;  %v6183_v52 = vld [vmem:[#allocation4 + $0x6cc] ss:$16 sps:$4 sm:$0xff]  }
 0x1a4   :  { %3732 = vmatprep.subr.bf16.mxu0 %v6162_v4  ;;  %3845 = vmatprep.subr.bf16.mxu1 %v6165_v5  ;;  %v6186_v35 = vld [vmem:[#allocation4 + $0x4ac] ss:$16 sps:$4 sm:$0xff]   ;;  %v6196_v45 = vld [vmem:[#allocation4 + $0x468] ss:$16 sps:$4 sm:$0xff]  }
 0x1a5   :  { %3580 = vmatprep.mubr.bf16.mxu0 %v6913_v62  ;;  %3693 = vmatprep.mubr.bf16.mxu1 %v6917_v30  ;;  %v6189_v33 = vld [vmem:[#allocation4 + $0x6ac] ss:$16 sps:$4 sm:$0xff]   ;;  %v6208_v4 = vld [vmem:[#allocation4 + $0x428] ss:$16 sps:$4 sm:$0xff]  }
 0x1a6   :  { %3581 = vmatmul.mubr.bf16.gmra.mxu0 %v6915_v29  ;;  %3694 = vmatmul.mubr.bf16.gmra.mxu1 %v6919_v54  ;;  %v6192_v60 = vld [vmem:[#allocation4 + $0x48c] ss:$16 sps:$4 sm:$0xff]   ;;  %v6220_v5 = vld [vmem:[#allocation4 + $0x5e8] ss:$16 sps:$4 sm:$0xff]  }
 0x1a7   :  { %3733 = vmatpush2.bf16.msra.mxu0 %v6160_v58  ;;  %3736 = vmatprep.mubr.bf16.mxu0 %v6625_v41  ;;  %v6178_v41 = vld [vmem:[#allocation4 + $0x4c8] ss:$16 sps:$4 sm:$0xff]   ;;  %v6198_v40 = vld [vmem:[#allocation4 + $0x46c] ss:$16 sps:$4 sm:$0xff]  }
 0x1a8   :  { %3846 = vmatpush2.bf16.msra.mxu1 %v6163_v26  ;;  %3849 = vmatprep.mubr.bf16.mxu1 %v6629_v2  ;;  %v6181_v2 = vld [vmem:[#allocation4 + $0x6c8] ss:$16 sps:$4 sm:$0xff]   ;;  %v6201_v42 = vld [vmem:[#allocation4 + $0x66c] ss:$16 sps:$4 sm:$0xff]  }
 0x1a9   :  { %3734 = vmatprep.subr.bf16.mxu0 %v6168_v1  ;;  %3847 = vmatprep.subr.bf16.mxu1 %v6171_v13  ;;  %v6204_v46 = vld [vmem:[#allocation4 + $0x44c] ss:$16 sps:$4 sm:$0xff]   ;;  %v6232_v26 = vld [vmem:[#allocation4 + $0x5a8] ss:$16 sps:$4 sm:$0xff]  }
 0x1aa   :  { %v6210_v9 = vld [vmem:[#allocation4 + $0x42c] ss:$16 sps:$4 sm:$0xff]  }
 0x1ab   :  { %3735 = vmatpush2.bf16.msra.mxu0 %v6166_v43  ;;  %v6213_v15 = vld [vmem:[#allocation4 + $0x62c] ss:$16 sps:$4 sm:$0xff]  }
 0x1ac   :  { %3848 = vmatpush2.bf16.msra.mxu1 %v6169_v47  ;;  %3930 = vmatprep.subr.bf16.mxu0 %v6174_v27  ;;  %v6216_v51 = vld [vmem:[#allocation4 + $0x40c] ss:$16 sps:$4 sm:$0xff]   ;;  %v6244_v47 = vld [vmem:[#allocation4 + $0x568] ss:$16 sps:$4 sm:$0xff]  }
 0x1ad   :  { %4043 = vmatprep.subr.bf16.mxu1 %v6177_v21  ;;  %v6222_v48 = vld [vmem:[#allocation4 + $0x5ec] ss:$16 sps:$4 sm:$0xff]   ;;  %v6253_v21 = vld [vmem:[#allocation4 + $0x748] ss:$16 sps:$4 sm:$0xff]  }
 0x1ae   :  { %3737 = vmatmul.mubr.bf16.vlgmr.msra.gmra.mxu0 %v6627_v63  ;;  %v6187_v63 = vld [vmem:[#allocation4 + $0x6a8] ss:$16 sps:$4 sm:$0xff]   ;;  %v6225_v3 = vld [vmem:[#allocation4 + $0x7ec] ss:$16 sps:$4 sm:$0xff]  }
 0x1af   :  { %3850 = vmatmul.mubr.bf16.vlgmr.msra.gmra.mxu1 %v6631_v6  ;;  %3746 = vmatprep.mubr.bf16.mxu0 %v6641_v34  ;;  %v6195_v6 = vld [vmem:[#allocation4 + $0x68c] ss:$16 sps:$4 sm:$0xff]   ;;  %v6190_v34 = vld [vmem:[#allocation4 + $0x488] ss:$16 sps:$4 sm:$0xff]  }
 0x1b0   :  { %3859 = vmatprep.mubr.bf16.mxu1 %v6645_v39  ;;  %3931 = vmatpush1.bf16.msra.mxu0 %v6172_v49  ;;  %v6193_v39 = vld [vmem:[#allocation4 + $0x688] ss:$16 sps:$4 sm:$0xff]   ;;  %v6228_v19 = vld [vmem:[#allocation4 + $0x5cc] ss:$16 sps:$4 sm:$0xff]  }
 0x1b1   :  { %4044 = vmatpush1.bf16.msra.mxu1 %v6175_v0  ;;  %3932 = vmatprep.subr.bf16.mxu0 %v6180_v56  ;;  %v6234_v59 = vld [vmem:[#allocation4 + $0x5ac] ss:$16 sps:$4 sm:$0xff]  }
 0x1b2   :  { %4045 = vmatprep.subr.bf16.mxu1 %v6183_v52  ;;  %v6237_v58 = vld [vmem:[#allocation4 + $0x7ac] ss:$16 sps:$4 sm:$0xff]  }
 0x1b3   :  { %v6240_v1 = vld [vmem:[#allocation4 + $0x58c] ss:$16 sps:$4 sm:$0xff]  }
 0x1b4   :  { %3933 = vmatpush1.bf16.msra.mxu0 %v6178_v41  ;;  %v6246_v13 = vld [vmem:[#allocation4 + $0x56c] ss:$16 sps:$4 sm:$0xff]  }
 0x1b5   :  { %4046 = vmatpush1.bf16.msra.mxu1 %v6181_v2  ;;  %3934 = vmatprep.subr.bf16.mxu0 %v6186_v35  ;;  %v6249_v43 = vld [vmem:[#allocation4 + $0x76c] ss:$16 sps:$4 sm:$0xff]   ;;  %v7742_v2 = vld [vmem:[#allocation10_spill] sm:$0xff] }
 0x1b6   :  { %3747 = vmatmul.mubr.bf16.gmra.mxu0 %v6643_v36  ;;  %4047 = vmatprep.subr.bf16.mxu1 %v6189_v33  ;;  %v6199_v36 = vld [vmem:[#allocation4 + $0x668] ss:$16 sps:$4 sm:$0xff]   ;;  %v6252_v27 = vld [vmem:[#allocation4 + $0x54c] ss:$16 sps:$4 sm:$0xff]   ;;  %v7743_v33 = vld [vmem:[#allocation12_spill] sm:$0xff] }
 0x1b7   :  { %3860 = vmatmul.mubr.bf16.gmra.mxu1 %v6647_v14  ;;  %3756 = vmatprep.mubr.bf16.mxu0 %v6661_v10  ;;  %v6207_v14 = vld [vmem:[#allocation4 + $0x64c] ss:$16 sps:$4 sm:$0xff]   ;;  %v6202_v10 = vld [vmem:[#allocation4 + $0x448] ss:$16 sps:$4 sm:$0xff]  }
 0x1b8   :  { %3869 = vmatprep.mubr.bf16.mxu1 %v6665_v17  ;;  %3935 = vmatpush1.bf16.msra.mxu0 %v6184_v37  ;;  %v6205_v17 = vld [vmem:[#allocation4 + $0x648] ss:$16 sps:$4 sm:$0xff]   ;;  %v6258_v49 = vld [vmem:[#allocation4 + $0x52c] ss:$16 sps:$4 sm:$0xff]  }
 0x1b9   :  { %4048 = vmatpush1.bf16.msra.mxu1 %v6187_v63  ;;  %3936 = vmatprep.subr.bf16.mxu0 %v6192_v60  ;;  %v6261_v0 = vld [vmem:[#allocation4 + $0x72c] ss:$16 sps:$4 sm:$0xff]   ;;  %v6262_v37 = vld [vmem:[#allocation4 + $0x508] ss:$16 sps:$4 sm:$0xff]   ;;  %v6965_v63 = vld [vmem:[%s7675_s3] sm:$0xf] }
 0x1ba   :  { %4049 = vmatprep.subr.bf16.mxu1 %v6195_v6  ;;  %v6264_v52 = vld [vmem:[#allocation4 + $0x50c] ss:$16 sps:$4 sm:$0xff]   ;;  %v6265_v60 = vld [vmem:[#allocation4 + $0x708] ss:$16 sps:$4 sm:$0xff]  }
 0x1bb   :  { %v7741_v41 = vld [vmem:[#allocation9_spill] sm:$0xff] }
 0x1bc   :  { %3937 = vmatpush1.bf16.msra.mxu0 %v6190_v34  ;;  %v6270_v34 = vld [vmem:[%s7676_s4 + $0x74] ss:$8 sps:$4 sm:$0xff]  }
 0x1bd   :  { %4050 = vmatpush1.bf16.msra.mxu1 %v6193_v39  ;;  %3938 = vmatprep.subr.bf16.mxu0 %v6198_v40 }
 0x1be   :  { %3757 = vmatmul.mubr.bf16.gmra.mxu0 %v6663_v12  ;;  %4051 = vmatprep.subr.bf16.mxu1 %v6201_v42  ;;  %v6211_v12 = vld [vmem:[#allocation4 + $0x628] ss:$16 sps:$4 sm:$0xff]  }
 0x1bf   :  { %3870 = vmatmul.mubr.bf16.gmra.mxu1 %v6667_v18  ;;  %3766 = vmatprep.mubr.bf16.mxu0 %v6681_v50  ;;  %v6219_v18 = vld [vmem:[#allocation4 + $0x60c] ss:$16 sps:$4 sm:$0xff]   ;;  %v6214_v50 = vld [vmem:[#allocation4 + $0x408] ss:$16 sps:$4 sm:$0xff]  }
 0x1c0   :  { %3879 = vmatprep.mubr.bf16.mxu1 %v6685_v23  ;;  %3939 = vmatpush1.bf16.msra.mxu0 %v6196_v45  ;;  %v6217_v23 = vld [vmem:[#allocation4 + $0x608] ss:$16 sps:$4 sm:$0xff]  }
 0x1c1   :  { %4052 = vmatpush1.bf16.msra.mxu1 %v6199_v36  ;;  %3940 = vmatprep.subr.bf16.mxu0 %v6204_v46  ;;  %v6268_v42 = vld [vmem:[%s7676_s4 + $0x70] ss:$8 sps:$4 sm:$0xff]   ;;  %v6273_v36 = vld [vmem:[%s7676_s4 + $0x64] ss:$8 sps:$4 sm:$0xff]  }
 0x1c2   :  { %4053 = vmatprep.subr.bf16.mxu1 %v6207_v14 }
 0x1c4   :  { %3941 = vmatpush1.bf16.msra.mxu0 %v6202_v10  ;;  %v7744_v10 = vld [vmem:[#allocation11_spill] sm:$0xff] }
 0x1c5   :  { %4054 = vmatpush1.bf16.msra.mxu1 %v6205_v17  ;;  %3942 = vmatprep.subr.bf16.mxu0 %v6210_v9  ;;  %v7745_v17 = vld [vmem:[#allocation13_spill] sm:$0xff]  ;;  %v7746_v9 = vld [vmem:[#allocation14_spill] sm:$0xff] }
 0x1c6   :  { %3767 = vmatmul.mubr.bf16.gmra.mxu0 %v6683_v53  ;;  %4055 = vmatprep.subr.bf16.mxu1 %v6213_v15  ;;  %v6223_v53 = vld [vmem:[#allocation4 + $0x7e8] ss:$16 sps:$4 sm:$0xff]  }
 0x1c7   :  { %3880 = vmatmul.mubr.bf16.gmra.mxu1 %v6687_v55  ;;  %3776 = vmatprep.mubr.bf16.mxu0 %v6701_v57  ;;  %v6231_v55 = vld [vmem:[#allocation4 + $0x7cc] ss:$16 sps:$4 sm:$0xff]   ;;  %v6226_v57 = vld [vmem:[#allocation4 + $0x5c8] ss:$16 sps:$4 sm:$0xff]  }
 0x1c8   :  { %3889 = vmatprep.mubr.bf16.mxu1 %v6705_v38  ;;  %3943 = vmatpush1.bf16.msra.mxu0 %v6208_v4  ;;  %v6229_v38 = vld [vmem:[#allocation4 + $0x7c8] ss:$16 sps:$4 sm:$0xff]  }
 0x1c9   :  { %4056 = vmatpush1.bf16.msra.mxu1 %v6211_v12  ;;  %3944 = vmatprep.subr.bf16.mxu0 %v6216_v51  ;;  %v7747_v12 = vld [vmem:[#allocation16_spill] sm:$0xff] }
 0x1ca   :  { %4057 = vmatprep.subr.bf16.mxu1 %v6219_v18 }
 0x1cc   :  { %3945 = vmatpush1.bf16.msra.mxu0 %v6214_v50  ;;  %v6271_v50 = vld [vmem:[%s7676_s4 + $0x60] ss:$8 sps:$4 sm:$0xff]  }
 0x1cd   :  { %4058 = vmatpush1.bf16.msra.mxu1 %v6217_v23  ;;  %3946 = vmatprep.subr.bf16.mxu0 %v6222_v48  ;;  %v6276_v48 = vld [vmem:[%s7676_s4 + $0x54] ss:$8 sps:$4 sm:$0xff]  }
 0x1ce   :  { %3777 = vmatmul.mubr.bf16.gmra.mxu0 %v6703_v32  ;;  %4059 = vmatprep.subr.bf16.mxu1 %v6225_v3  ;;  %v6235_v32 = vld [vmem:[#allocation4 + $0x7a8] ss:$16 sps:$4 sm:$0xff]  }
 0x1cf   :  { %3890 = vmatmul.mubr.bf16.gmra.mxu1 %v6707_v31  ;;  %3786 = vmatprep.mubr.bf16.mxu0 %v6721_v20  ;;  %v6243_v31 = vld [vmem:[#allocation4 + $0x78c] ss:$16 sps:$4 sm:$0xff]   ;;  %v6238_v20 = vld [vmem:[#allocation4 + $0x588] ss:$16 sps:$4 sm:$0xff]  }
 0x1d0   :  { %3899 = vmatprep.mubr.bf16.mxu1 %v6725_v25  ;;  %3947 = vmatpush2.bf16.msra.mxu0 %v6220_v5  ;;  %v6241_v25 = vld [vmem:[#allocation4 + $0x788] ss:$16 sps:$4 sm:$0xff]  }
 0x1d1   :  { %4060 = vmatpush2.bf16.msra.mxu1 %v6223_v53  ;;  %3948 = vmatprep.subr.bf16.mxu0 %v6228_v19 }
 0x1d2   :  { %4061 = vmatprep.subr.bf16.mxu1 %v6231_v55  ;;  %v6274_v55 = vld [vmem:[%s7676_s4 + $0x50] ss:$8 sps:$4 sm:$0xff]  }
 0x1d4   :  { %3949 = vmatpush2.bf16.msra.mxu0 %v6226_v57 }
 0x1d5   :  { %4062 = vmatpush2.bf16.msra.mxu1 %v6229_v38  ;;  %3950 = vmatprep.subr.bf16.mxu0 %v6234_v59  ;;  %v6279_v38 = vld [vmem:[%s7676_s4 + $0x44] ss:$8 sps:$4 sm:$0xff]  }
 0x1d6   :  { %3787 = vmatmul.mubr.bf16.gmra.mxu0 %v6723_v22  ;;  %4063 = vmatprep.subr.bf16.mxu1 %v6237_v58  ;;  %v6247_v22 = vld [vmem:[#allocation4 + $0x768] ss:$16 sps:$4 sm:$0xff]  }
 0x1d7   :  { %3900 = vmatmul.mubr.bf16.gmra.mxu1 %v6727_v24  ;;  %3796 = vmatprep.mubr.bf16.mxu0 %v6741_v7  ;;  %v6255_v24 = vld [vmem:[#allocation4 + $0x74c] ss:$16 sps:$4 sm:$0xff]   ;;  %v1952_v7 = vlaneseq }
 0x1d8   :  { %3909 = vmatprep.mubr.bf16.mxu1 %v6745_v16  ;;  %3951 = vmatpush2.bf16.msra.mxu0 %v6232_v26  ;;  %v6250_v16 = vld [vmem:[#allocation4 + $0x548] ss:$16 sps:$4 sm:$0xff]  }
 0x1d9   :  { %4064 = vmatpush2.bf16.msra.mxu1 %v6235_v32  ;;  %3952 = vmatprep.subr.bf16.mxu0 %v6240_v1  ;;  %v6955_v56 = vshrl.u32 %v1952_v7, 7  ;;  %v7748_v26 = vld [vmem:[#allocation15_spill] sm:$0xff]  ;;  %v7749_v32 = vld [vmem:[#allocation17_spill] sm:$0xff]  ;;  %v7750_v1 = vld [vmem:[#allocation18_spill] sm:$0xff] }
 0x1da   :  { %4065 = vmatprep.subr.bf16.mxu1 %v6243_v31 }
 0x1db   :  { %v7710_v35 = vsub.s32 0, %v6955_v56  ;;  %v1958_v6 = vsub.s32 1, %v6955_v56 }
 0x1dc   :  { %3953 = vmatpush2.bf16.msra.mxu0 %v6238_v20 }
 0x1dd   :  { %4066 = vmatpush2.bf16.msra.mxu1 %v6241_v25  ;;  %3954 = vmatprep.subr.bf16.mxu0 %v6246_v13  ;;  %v6974_v39 = vrot.slane %v6965_v63, %v7710_v35  ;;  %v6979_v40 = vrot.slane %v6965_v63, %v1958_v6  ;;  %v7751_v25 = vld [vmem:[#allocation20_spill] sm:$0xff] }
 0x1de   :  { %3797 = vmatmul.mubr.bf16.gmra.mxu0 %v6743_v11  ;;  %4067 = vmatprep.subr.bf16.mxu1 %v6249_v43  ;;  %v6256_v11 = vld [vmem:[#allocation4 + $0x528] ss:$16 sps:$4 sm:$0xff]  }
 0x1df   :  { %3910 = vmatmul.mubr.bf16.gmra.mxu1 %v6747_v61  ;;  %3806 = vmatprep.mubr.bf16.mxu0 %v6761_v8  ;;  %v6259_v61 = vld [vmem:[#allocation4 + $0x728] ss:$16 sps:$4 sm:$0xff]   ;;  %v7740_v8 = vld [vmem:[#allocation8_spill] sm:$0xff] }
 0x1e0   :  { %3919 = vmatprep.mubr.bf16.mxu1 %v6765_v44  ;;  %3955 = vmatpush2.bf16.msra.mxu0 %v6244_v47  ;;  %v6267_v44 = vld [vmem:[#allocation4 + $0x70c] ss:$16 sps:$4 sm:$0xff]   ;;  %v6277_v47 = vld [vmem:[%s7676_s4 + $0x40] ss:$8 sps:$4 sm:$0xff]  }
 0x1e1   :  { %4068 = vmatpush2.bf16.msra.mxu1 %v6247_v22  ;;  %3956 = vmatprep.subr.bf16.mxu0 %v6252_v27  ;;  %v6282_v27 = vld [vmem:[%s7676_s4 + $0x34] ss:$8 sps:$4 sm:$0xff]  }
 0x1e2   :  { %4069 = vmatprep.subr.bf16.mxu1 %v6255_v24 }
 0x1e4   :  { %3957 = vmatpush2.bf16.msra.mxu0 %v6250_v16 }
 0x1e5   :  { %4070 = vmatpush2.bf16.msra.mxu1 %v6253_v21  ;;  %3958 = vmatprep.subr.bf16.mxu0 %v6258_v49 }
 0x1e6   :  { %3807 = vmatmul.mubr.bf16.gmra.mxu0 %v7740_v8  ;;  %4071 = vmatprep.subr.bf16.mxu1 %v6261_v0 }
 0x1e7   :  { %3920 = vmatmul.mubr.bf16.gmra.mxu1 %v7741_v41  ;;  %3962 = vmatprep.mubr.bf16.mxu0 %v7742_v2  ;;  %v7752_v41 = vld [vmem:[#allocation19_spill] sm:$0xff]  ;;  %v7753_v2 = vld [vmem:[#allocation21_spill] sm:$0xff] }
 0x1e8   :  { %3959 = vmatpush2.bf16.msra.mxu0 %v6256_v11  ;;  %4075 = vmatprep.mubr.bf16.mxu1 %v7743_v33  ;;  %v6280_v11 = vld [vmem:[%s7676_s4 + $0x30] ss:$8 sps:$4 sm:$0xff]  }
 0x1e9   :  { %4072 = vmatpush2.bf16.msra.mxu1 %v6259_v61  ;;  %3960 = vmatprep.subr.bf16.mxu0 %v6264_v52  ;;  %v6285_v52 = vld [vmem:[%s7676_s4 + $0x24] ss:$8 sps:$4 sm:$0xff]   ;;  %v7754_v33 = vld [vmem:[#allocation22_spill] sm:$0xff] }
 0x1ea   :  { %4073 = vmatprep.subr.bf16.mxu1 %v6267_v44 }
 0x1ec   :  { %3961 = vmatpush2.bf16.msra.mxu0 %v6262_v37 }
 0x1ed   :  { %4074 = vmatpush2.bf16.msra.mxu1 %v6265_v60  ;;  %4712 = vmatprep.subr.bf16.mxu0 %v6270_v34  ;;  %v6318_v60 = vld [vmem:[%s7676_s4 + $0x174] ss:$8 sps:$4 sm:$0xff]  }
 0x1ee   :  { %v3286_v45 = vpop.f32.mrf.mxu0  ;;  %v3399_v14 = vpop.f32.mrf.mxu1  ;;  %4825 = vmatprep.subr.bf16.mxu1 %v6318_v60  ;;  %v6292_v60 = vld [vmem:[%s7676_s4 + $0xf0] ss:$8 sps:$4 sm:$0xff]  }
 0x1ef   :  { %v3287_v46 = vadd.f32 %v3286_v45, %v6974_v39  ;;  %3963 = vmatmul.mubr.bf16.vlgmr.msra.gmra.mxu0 %v7744_v10 }
 0x1f0   :  { %4076 = vmatmul.mubr.bf16.vlgmr.msra.gmra.mxu1 %v7745_v17  ;;  %3972 = vmatprep.mubr.bf16.mxu0 %v7746_v9  ;;  %v3288_v15 = vpop.f32.mrf.mxu0  ;;  %v3401_v18 = vpop.f32.mrf.mxu1  ;;  %v6288_v17 = vld [vmem:[%s7676_s4 + $0x14] ss:$8 sps:$4 sm:$0xff]  }
 0x1f1   :  { %v6991_v4 = vadd.f32 %v3399_v14, %v3287_v46  ;;  %4085 = vmatprep.mubr.bf16.mxu1 %v7747_v12  ;;  %v3289_v51 = vadd.f32 %v3288_v15, %v6979_v40  ;;  %4713 = vmatpush1.bf16.msra.mxu0 %v6268_v42  ;;  %v7755_v42 = vld [vmem:[#allocation24_spill] sm:$0xff]  ;;  %v6316_v14 = vld [vmem:[%s7676_s4 + $0x170] ss:$8 sps:$4 sm:$0xff]  }
 0x1f2   :  { %v6998_v23 = vpop.f32.mrf.mxu0  ;;  %4714 = vmatprep.subr.bf16.mxu0 %v6273_v36  ;;  %v7005_v5 = vpop.f32.mrf.mxu1  ;;  %v6283_v46 = vld [vmem:[%s7676_s4 + $0x20] ss:$8 sps:$4 sm:$0xff]   ;;  %4826 = vmatpush1.bf16.msra.mxu1 %v6316_v14 }
 0x1f3   :  { %v7003_v3 = vadd.f32 %v3401_v18, %v3289_v51  ;;  %v6321_v18 = vld [vmem:[%s7676_s4 + $0x164] ss:$8 sps:$4 sm:$0xff]  }
 0x1f4   :  { %v7007_v53 = vpop.f32.mrf.mxu0  ;;  %v7009_v19 = vpop.f32.mrf.mxu1  ;;  %4827 = vmatprep.subr.bf16.mxu1 %v6321_v18  ;;  %v6330_v18 = vld [vmem:[%s7676_s4 + $0x134] ss:$8 sps:$4 sm:$0xff]  }
 0x1f5   :  { %4715 = vmatpush1.bf16.msra.mxu0 %v6271_v50 }
 0x1f6   :  { %v3296_v57 = vpop.f32.mrf.mxu0  ;;  %4716 = vmatprep.subr.bf16.mxu0 %v6276_v48  ;;  %v3409_v58 = vpop.f32.mrf.mxu1 }
 0x1f7   :  { %v3297_v59 = vadd.f32 %v3296_v57, %v6974_v39  ;;  %3973 = vmatmul.mubr.bf16.gmra.mxu0 %v7748_v26  ;;  %v6319_v57 = vld [vmem:[%s7676_s4 + $0x160] ss:$8 sps:$4 sm:$0xff]  }
 0x1f8   :  { %4086 = vmatmul.mubr.bf16.gmra.mxu1 %v7749_v32  ;;  %3982 = vmatprep.mubr.bf16.mxu0 %v7750_v1  ;;  %v3298_v31 = vpop.f32.mrf.mxu0  ;;  %v3411_v43 = vpop.f32.mrf.mxu1  ;;  %v7756_v32 = vld [vmem:[#allocation23_spill] sm:$0xff]  ;;  %v7757_v1 = vld [vmem:[#allocation25_spill] sm:$0xff] }
 0x1f9   :  { %v7021_v20 = vadd.f32 %v3409_v58, %v3297_v59  ;;  %4095 = vmatprep.mubr.bf16.mxu1 %v7751_v25  ;;  %v3299_v13 = vadd.f32 %v3298_v31, %v6979_v40  ;;  %4717 = vmatpush1.bf16.msra.mxu0 %v6274_v55  ;;  %v6286_v55 = vld [vmem:[%s7676_s4 + $0x10] ss:$8 sps:$4 sm:$0xff]   ;;  %v6291_v59 = vld [vmem:[%s7676_s4 + $0x4] ss:$8 sps:$4 sm:$0xff]  }
 0x1fa   :  { %v3300_v22 = vpop.f32.mrf.mxu0  ;;  %4718 = vmatprep.subr.bf16.mxu0 %v6279_v38  ;;  %v3413_v16 = vpop.f32.mrf.mxu1  ;;  %4828 = vmatpush1.bf16.msra.mxu1 %v6319_v57  ;;  %v7758_v31 = vld [vmem:[#allocation26_spill] sm:$0xff]  ;;  %v7763_v57 = vld [vmem:[#allocation32_spill] sm:$0xff] }
 0x1fb   :  { %v7031_v24 = vadd.f32 %v3411_v43, %v3299_v13  ;;  %v3301_v7 = vadd.f32 %v3300_v22, %v6974_v39  ;;  %v6324_v13 = vld [vmem:[%s7676_s4 + $0x154] ss:$8 sps:$4 sm:$0xff]  }
 0x1fc   :  { %v7034_v21 = vpop.f32.mrf.mxu0  ;;  %v7038_v0 = vpop.f32.mrf.mxu1  ;;  %4829 = vmatprep.subr.bf16.mxu1 %v6324_v13 }
 0x1fd   :  { %v7036_v49 = vadd.f32 %v3413_v16, %v3301_v7  ;;  %4719 = vmatpush1.bf16.msra.mxu0 %v6277_v47  ;;  %v7759_v47 = vld [vmem:[#allocation28_spill] sm:$0xff]  ;;  %v6322_v16 = vld [vmem:[%s7676_s4 + $0x150] ss:$8 sps:$4 sm:$0xff]  }
 0x1fe   :  { %v3306_v61 = vpop.f32.mrf.mxu0  ;;  %4720 = vmatprep.subr.bf16.mxu0 %v6282_v27  ;;  %v3419_v44 = vpop.f32.mrf.mxu1  ;;  %v6289_v7 = vld [vmem:[%s7676_s4] ss:$8 sps:$4 sm:$0xff]   ;;  %4830 = vmatpush1.bf16.msra.mxu1 %v6322_v16  ;;  %v6298_v16 = vld [vmem:[%s7676_s4 + $0xd0] ss:$8 sps:$4 sm:$0xff]  }
 0x1ff   :  { %v3307_v8 = vadd.f32 %v3306_v61, %v6974_v39  ;;  %3983 = vmatmul.mubr.bf16.gmra.mxu0 %v7752_v41  ;;  %v6294_v61 = vld [vmem:[%s7676_s4 + $0xf4] ss:$8 sps:$4 sm:$0xff]  }
 0x200   :  { %4096 = vmatmul.mubr.bf16.gmra.mxu1 %v7753_v2  ;;  %3992 = vmatprep.mubr.bf16.mxu0 %v7754_v33  ;;  %v3308_v37 = vpop.f32.mrf.mxu0  ;;  %v3421_v36 = vpop.f32.mrf.mxu1  ;;  %v6327_v2 = vld [vmem:[%s7676_s4 + $0x144] ss:$8 sps:$4 sm:$0xff]  }
 0x201   :  { %v7053_v34 = vadd.f32 %v3419_v44, %v3307_v8  ;;  %4105 = vmatprep.mubr.bf16.mxu1 %v7755_v42  ;;  %v3309_v45 = vadd.f32 %v3308_v37, %v6979_v40  ;;  %4721 = vmatpush1.bf16.msra.mxu0 %v6280_v11  ;;  %v6325_v42 = vld [vmem:[%s7676_s4 + $0x140] ss:$8 sps:$4 sm:$0xff]  }
 0x202   :  { %v3310_v10 = vpop.f32.mrf.mxu0  ;;  %4722 = vmatprep.subr.bf16.mxu0 %v6285_v52  ;;  %v3423_v12 = vpop.f32.mrf.mxu1  ;;  %4831 = vmatprep.subr.bf16.mxu1 %v6327_v2 }
 0x203   :  { %v7066_v9 = vadd.f32 %v3421_v36, %v3309_v45  ;;  %v3311_v15 = vadd.f32 %v3310_v10, %v6974_v39  ;;  %v6297_v36 = vld [vmem:[%s7676_s4 + $0xe4] ss:$8 sps:$4 sm:$0xff]   ;;  %v7760_v10 = vld [vmem:[#allocation27_spill] sm:$0xff]  ;;  %4832 = vmatpush1.bf16.msra.mxu1 %v6325_v42 }
 0x204   :  { %v7069_v51 = vpop.f32.mrf.mxu0  ;;  %v7076_v48 = vpop.f32.mrf.mxu1  ;;  %4833 = vmatprep.subr.bf16.mxu1 %v6330_v18  ;;  %v7765_v42 = vld [vmem:[#allocation33_spill] sm:$0xff]  ;;  %v6306_v18 = vld [vmem:[%s7676_s4 + $0xb4] ss:$8 sps:$4 sm:$0xff]  }
 0x205   :  { %v7074_v50 = vadd.f32 %v3423_v12, %v3311_v15  ;;  %4723 = vmatpush1.bf16.msra.mxu0 %v6283_v46  ;;  %v7762_v15 = vld [vmem:[#allocation30_spill] sm:$0xff] }
 0x206   :  { %v3316_v38 = vpop.f32.mrf.mxu0  ;;  %4724 = vmatprep.subr.bf16.mxu0 %v6288_v17  ;;  %v3429_v26 = vpop.f32.mrf.mxu1  ;;  %v7761_v17 = vld [vmem:[#allocation29_spill] sm:$0xff] }
 0x207   :  { %v3317_v58 = vadd.f32 %v3316_v38, %v6974_v39  ;;  %3993 = vmatmul.mubr.bf16.gmra.mxu0 %v7756_v32 }
 0x208   :  { %4106 = vmatmul.mubr.bf16.gmra.mxu1 %v7757_v1  ;;  %4002 = vmatprep.mubr.bf16.mxu0 %v7758_v31  ;;  %v3318_v25 = vpop.f32.mrf.mxu0  ;;  %v3431_v27 = vpop.f32.mrf.mxu1  ;;  %v6300_v1 = vld [vmem:[%s7676_s4 + $0xd4] ss:$8 sps:$4 sm:$0xff]  }
 0x209   :  { %v7094_v43 = vadd.f32 %v3429_v26, %v3317_v58  ;;  %4115 = vmatprep.mubr.bf16.mxu1 %v7759_v47  ;;  %v3319_v22 = vadd.f32 %v3318_v25, %v6979_v40  ;;  %4725 = vmatpush1.bf16.msra.mxu0 %v6286_v55  ;;  %v6295_v58 = vld [vmem:[%s7676_s4 + $0xe0] ss:$8 sps:$4 sm:$0xff]   ;;  %v6328_v26 = vld [vmem:[%s7676_s4 + $0x130] ss:$8 sps:$4 sm:$0xff]  }
 0x20a   :  { %v3320_v11 = vpop.f32.mrf.mxu0  ;;  %4726 = vmatprep.subr.bf16.mxu0 %v6291_v59  ;;  %v3433_v44 = vpop.f32.mrf.mxu1  ;;  %4834 = vmatpush1.bf16.msra.mxu1 %v6328_v26  ;;  %v6339_v26 = vld [vmem:[%s7676_s4 + $0x104] ss:$8 sps:$4 sm:$0xff]  }
 0x20b   :  { %v7107_v52 = vadd.f32 %v3431_v27, %v3319_v22  ;;  %v3321_v8 = vadd.f32 %v3320_v11, %v6974_v39  ;;  %v6333_v22 = vld [vmem:[%s7676_s4 + $0x124] ss:$8 sps:$4 sm:$0xff]   ;;  %v6331_v11 = vld [vmem:[%s7676_s4 + $0x120] ss:$8 sps:$4 sm:$0xff]  }
 0x20c   :  { %v7110_v41 = vpop.f32.mrf.mxu0  ;;  %v7117_v37 = vpop.f32.mrf.mxu1  ;;  %4835 = vmatprep.subr.bf16.mxu1 %v6333_v22 }
 0x20d   :  { %v7115_v33 = vadd.f32 %v3433_v44, %v3321_v8  ;;  %4727 = vmatpush1.bf16.msra.mxu0 %v6289_v7  ;;  %v6303_v8 = vld [vmem:[%s7676_s4 + $0xc4] ss:$8 sps:$4 sm:$0xff]  }
 0x20e   :  { %v3326_v45 = vpop.f32.mrf.mxu0  ;;  %4728 = vmatprep.subr.bf16.mxu0 %v6294_v61  ;;  %v3439_v14 = vpop.f32.mrf.mxu1  ;;  %4836 = vmatpush1.bf16.msra.mxu1 %v6331_v11 }
 0x20f   :  { %v3327_v46 = vadd.f32 %v3326_v45, %v6974_v39  ;;  %4003 = vmatmul.mubr.bf16.gmra.mxu0 %v7760_v10 }
 0x210   :  { %4116 = vmatmul.mubr.bf16.gmra.mxu1 %v7761_v17  ;;  %4012 = vmatprep.mubr.bf16.mxu0 %v7762_v15  ;;  %v3328_v12 = vpop.f32.mrf.mxu0  ;;  %v3441_v59 = vpop.f32.mrf.mxu1  ;;  %v6301_v15 = vld [vmem:[%s7676_s4 + $0xc0] ss:$8 sps:$4 sm:$0xff]  }
 0x211   :  { %v7135_v55 = vadd.f32 %v3439_v14, %v3327_v46  ;;  %4125 = vmatprep.mubr.bf16.mxu1 %v7763_v57  ;;  %v3329_v38 = vadd.f32 %v3328_v12, %v6979_v40  ;;  %4729 = vmatpush2.bf16.msra.mxu0 %v6292_v60  ;;  %v7764_v60 = vld [vmem:[#allocation31_spill] sm:$0xff] }
 0x212   :  { %v3330_v32 = vpop.f32.mrf.mxu0  ;;  %4730 = vmatprep.subr.bf16.mxu0 %v6297_v36  ;;  %v3443_v13 = vpop.f32.mrf.mxu1  ;;  %v6336_v36 = vld [vmem:[%s7676_s4 + $0x114] ss:$8 sps:$4 sm:$0xff]  }
 0x213   :  { %v7148_v31 = vadd.f32 %v3441_v59, %v3329_v38  ;;  %v3331_v25 = vadd.f32 %v3330_v32, %v6974_v39  ;;  %v7766_v14 = vld [vmem:[#allocation35_spill] sm:$0xff]  ;;  %4837 = vmatprep.subr.bf16.mxu1 %v6336_v36 }
 0x214   :  { %v7151_v47 = vpop.f32.mrf.mxu0  ;;  %v7158_v7 = vpop.f32.mrf.mxu1 }
 0x215   :  { %v7156_v27 = vadd.f32 %v3443_v13, %v3331_v25  ;;  %4731 = vmatpush2.bf16.msra.mxu0 %v6295_v58  ;;  %v6304_v25 = vld [vmem:[%s7676_s4 + $0xb0] ss:$8 sps:$4 sm:$0xff]   ;;  %v6337_v13 = vld [vmem:[%s7676_s4 + $0x100] ss:$8 sps:$4 sm:$0xff]  }
 0x216   :  { %v3336_v61 = vpop.f32.mrf.mxu0  ;;  %4732 = vmatprep.subr.bf16.mxu0 %v6300_v1  ;;  %v3449_v2 = vpop.f32.mrf.mxu1 }
 0x217   :  { %v3337_v44 = vadd.f32 %v3336_v61, %v6974_v39  ;;  %4013 = vmatmul.mubr.bf16.gmra.mxu0 %v7764_v60  ;;  %v6342_v60 = vld [vmem:[%s7676_s4 + $0x1f4] ss:$8 sps:$4 sm:$0xff]  }
 0x218   :  { %4126 = vmatmul.mubr.bf16.gmra.mxu1 %v7765_v42  ;;  %4022 = vmatprep.mubr.bf16.mxu0 %v6899_v28  ;;  %v3338_v45 = vpop.f32.mrf.mxu0  ;;  %v3451_v17 = vpop.f32.mrf.mxu1  ;;  %v6334_v28 = vld [vmem:[%s7676_s4 + $0x110] ss:$8 sps:$4 sm:$0xff]  }
 0x219   :  { %v7176_v46 = vadd.f32 %v3449_v2, %v3337_v44  ;;  %4135 = vmatprep.mubr.bf16.mxu1 %v7766_v14  ;;  %v3339_v10 = vadd.f32 %v3338_v45, %v6979_v40  ;;  %4733 = vmatpush2.bf16.msra.mxu0 %v6298_v16  ;;  %v6309_v16 = vld [vmem:[%s7676_s4 + $0xa4] ss:$8 sps:$4 sm:$0xff]   ;;  %v6307_v14 = vld [vmem:[%s7676_s4 + $0xa0] ss:$8 sps:$4 sm:$0xff]  }
 0x21a   :  { %v3340_v12 = vpop.f32.mrf.mxu0  ;;  %4734 = vmatprep.subr.bf16.mxu0 %v6303_v8  ;;  %v3453_v59 = vpop.f32.mrf.mxu1  ;;  %4838 = vmatpush1.bf16.msra.mxu1 %v6334_v28  ;;  %v7767_v8 = vld [vmem:[#allocation34_spill] sm:$0xff]  ;;  %v7768_v44 = vld [vmem:[#allocation36_spill] sm:$0xff] }
 0x21b   :  { %v7189_v57 = vadd.f32 %v3451_v17, %v3339_v10  ;;  %v3341_v38 = vadd.f32 %v3340_v12, %v6974_v39  ;;  %4839 = vmatprep.subr.bf16.mxu1 %v6339_v26  ;;  %v6312_v17 = vld [vmem:[%s7676_s4 + $0x94] ss:$8 sps:$4 sm:$0xff]   ;;  %v6310_v26 = vld [vmem:[%s7676_s4 + $0x90] ss:$8 sps:$4 sm:$0xff]  }
 0x21c   :  { %v7192_v58 = vpop.f32.mrf.mxu0  ;;  %v7199_v1 = vpop.f32.mrf.mxu1 }
 0x21d   :  { %v7197_v32 = vadd.f32 %v3453_v59, %v3341_v38  ;;  %4735 = vmatpush2.bf16.msra.mxu0 %v6301_v15 }
 0x21e   :  { %v3346_v22 = vpop.f32.mrf.mxu0  ;;  %4736 = vmatprep.subr.bf16.mxu0 %v6306_v18  ;;  %v3459_v61 = vpop.f32.mrf.mxu1  ;;  %4840 = vmatpush1.bf16.msra.mxu1 %v6337_v13  ;;  %v6345_v18 = vld [vmem:[%s7676_s4 + $0x1e4] ss:$8 sps:$4 sm:$0xff]  }
 0x21f   :  { %v3347_v11 = vadd.f32 %v3346_v22, %v6974_v39  ;;  %4023 = vmatmul.mubr.bf16.gmra.mxu0 %v7767_v8  ;;  %4841 = vmatprep.subr.bf16.mxu1 %v6342_v60  ;;  %v6315_v22 = vld [vmem:[%s7676_s4 + $0x84] ss:$8 sps:$4 sm:$0xff]   ;;  %v6348_v8 = vld [vmem:[%s7676_s4 + $0x1d4] ss:$8 sps:$4 sm:$0xff]  }
 0x220   :  { %4136 = vmatmul.mubr.bf16.gmra.mxu1 %v7768_v44  ;;  %4032 = vmatprep.mubr.bf16.mxu0 %v6913_v62  ;;  %v3348_v2 = vpop.f32.mrf.mxu0  ;;  %v3461_v36 = vpop.f32.mrf.mxu1  ;;  %v6340_v62 = vld [vmem:[%s7676_s4 + $0x1f0] ss:$8 sps:$4 sm:$0xff]  }
 0x221   :  { %v7217_v42 = vadd.f32 %v3459_v61, %v3347_v11  ;;  %4145 = vmatprep.mubr.bf16.mxu1 %v6917_v30  ;;  %v3349_v45 = vadd.f32 %v3348_v2, %v6979_v40  ;;  %4737 = vmatpush2.bf16.msra.mxu0 %v6304_v25  ;;  %v6343_v25 = vld [vmem:[%s7676_s4 + $0x1e0] ss:$8 sps:$4 sm:$0xff]  }
 0x222   :  { %v3350_v10 = vpop.f32.mrf.mxu0  ;;  %4738 = vmatprep.subr.bf16.mxu0 %v6309_v16  ;;  %v3463_v28 = vpop.f32.mrf.mxu1  ;;  %4842 = vmatpush2.bf16.msra.mxu1 %v6340_v62 }
 0x223   :  { %v7230_v30 = vadd.f32 %v3461_v36, %v3349_v45  ;;  %v3351_v15 = vadd.f32 %v3350_v10, %v6974_v39  ;;  %4843 = vmatprep.subr.bf16.mxu1 %v6345_v18  ;;  %v6313_v45 = vld [vmem:[%s7676_s4 + $0x80] ss:$8 sps:$4 sm:$0xff]  }
 0x224   :  { %v7233_v12 = vpop.f32.mrf.mxu0  ;;  %v7240_v59 = vpop.f32.mrf.mxu1 }
 0x225   :  { %v7238_v38 = vadd.f32 %v3463_v28, %v3351_v15  ;;  %4739 = vmatpush2.bf16.msra.mxu0 %v6307_v14  ;;  %v3291_v15 = vadd.f32 %v6998_v23, %v6974_v39 }
 0x226   :  { %v3356_v13 = vpop.f32.mrf.mxu0  ;;  %4740 = vmatprep.subr.bf16.mxu0 %v6312_v17  ;;  %v3469_v11 = vpop.f32.mrf.mxu1  ;;  %4844 = vmatpush2.bf16.msra.mxu1 %v6343_v25  ;;  %v6351_v17 = vld [vmem:[%s7676_s4 + $0x1c4] ss:$8 sps:$4 sm:$0xff]  }
 0x227   :  { %v3357_v16 = vadd.f32 %v3356_v13, %v6974_v39  ;;  %4033 = vmatmul.mubr.bf16.gmra.mxu0 %v6915_v29  ;;  %v6346_v29 = vld [vmem:[%s7676_s4 + $0x1d0] ss:$8 sps:$4 sm:$0xff]   ;;  %4845 = vmatprep.subr.bf16.mxu1 %v6348_v8  ;;  %v3293_v13 = vadd.f32 %v7007_v53, %v6979_v40  ;;  %v3404_v23 = vadd.f32 %v7005_v5, %v3291_v15  ;;  %v6357_v5 = vld [vmem:[%s7676_s4 + $0x1a4] ss:$8 sps:$4 sm:$0xff]   ;;  %v6355_v15 = vld [vmem:[%s7676_s4 + $0x1a0] ss:$8 sps:$4 sm:$0xff]  }
 0x228   :  { %4146 = vmatmul.mubr.bf16.gmra.mxu1 %v6919_v54  ;;  %v3358_v61 = vpop.f32.mrf.mxu0  ;;  %v3471_v60 = vpop.f32.mrf.mxu1 }
 0x229   :  { %v7257_v44 = vadd.f32 %v3469_v11, %v3357_v16  ;;  %v3359_v2 = vadd.f32 %v3358_v61, %v6979_v40  ;;  %4741 = vmatpush2.bf16.msra.mxu0 %v6310_v26  ;;  %v6349_v26 = vld [vmem:[%s7676_s4 + $0x1c0] ss:$8 sps:$4 sm:$0xff]   ;;  %v3406_v53 = vadd.f32 %v7009_v19, %v3293_v13  ;;  %v3303_v19 = vadd.f32 %v7034_v21, %v6979_v40  ;;  %v6358_v21 = vld [vmem:[%s7676_s4 + $0x190] ss:$8 sps:$4 sm:$0xff]  }
 0x22a   :  { %v3360_v54 = vpop.f32.mrf.mxu0  ;;  %4742 = vmatprep.subr.bf16.mxu0 %v6315_v22  ;;  %v3473_v62 = vpop.f32.mrf.mxu1  ;;  %4846 = vmatpush2.bf16.msra.mxu1 %v6346_v29 }
 0x22b   :  { %v7266_v36 = vadd.f32 %v3471_v60, %v3359_v2  ;;  %v3361_v14 = vadd.f32 %v3360_v54, %v6974_v39  ;;  %4847 = vmatprep.subr.bf16.mxu1 %v6351_v17  ;;  %v6354_v39 = vld [vmem:[%s7676_s4 + $0x1b4] ss:$8 sps:$4 sm:$0xff]   ;;  %v6352_v2 = vld [vmem:[%s7676_s4 + $0x1b0] ss:$8 sps:$4 sm:$0xff]  }
 0x22c   :  { %v7269_v10 = vpop.f32.mrf.mxu0  ;;  %v7278_v18 = vpop.f32.mrf.mxu1 }
 0x22d   :  { %v7276_v28 = vadd.f32 %v3473_v62, %v3361_v14  ;;  %4743 = vmatpush2.bf16.msra.mxu0 %v6313_v45 }
 0x22e   :  { %v3512_v25 = vpop.f32.mrf.mxu0  ;;  %v3625_v22 = vpop.f32.mrf.mxu1  ;;  %4848 = vmatpush2.bf16.msra.mxu1 %v6349_v26 }
 0x22f   :  { %v3513_v16 = vadd.f32 %v3512_v25, %v6991_v4  ;;  %4849 = vmatprep.subr.bf16.mxu1 %v6354_v39 }
 0x230   :  { %v3514_v11 = vpop.f32.mrf.mxu0  ;;  %v3627_v8 = vpop.f32.mrf.mxu1 }
 0x231   :  { %v3515_v61 = vadd.f32 %v3514_v11, %v7003_v3  ;;  %v3626_v54 = vadd.f32 %v3625_v22, %v3513_v16 }
 0x232   :  { %v3516_v60 = vpop.f32.mrf.mxu0  ;;  %v3629_v29 = vpop.f32.mrf.mxu1  ;;  %4850 = vmatpush2.bf16.msra.mxu1 %v6352_v2 }
 0x233   :  { %v3628_v45 = vadd.f32 %v3627_v8, %v3515_v61  ;;  %v3517_v4 = vadd.f32 %v3516_v60, %v3404_v23  ;;  %4851 = vmatprep.subr.bf16.mxu1 %v6357_v5  ;;  %v4156_v39 = vmul.f32 0.25, %v3626_v54  ;;  %v6360_v61 = vld [vmem:[%s7676_s4 + $0x194] ss:$8 sps:$4 sm:$0xff]  }
 0x234   :  { %v3518_v14 = vpop.f32.mrf.mxu0  ;;  %v3631_v17 = vpop.f32.mrf.mxu1 }
 0x235   :  { %v3630_v3 = vadd.f32 %v3629_v29, %v3517_v4  ;;  %v3519_v62 = vadd.f32 %v3518_v14, %v3406_v53  ;;  %v4157_v25 = vmul.f32 0.25, %v3628_v45 }
 0x236   :  { %v3522_v26 = vpop.f32.mrf.mxu0  ;;  %v3635_v11 = vpop.f32.mrf.mxu1  ;;  %4852 = vmatpush2.bf16.msra.mxu1 %v6355_v15 }
 0x237   :  { %v4160_v13 = vmul.f32 0.25, %v3630_v3  ;;  %v3632_v22 = vadd.f32 %v3631_v17, %v3519_v62  ;;  %v3523_v16 = vadd.f32 %v3522_v26, %v7021_v20  ;;  %4853 = vmatprep.subr.bf16.mxu1 %v6360_v61  ;;  %v3416_v20 = vadd.f32 %v7038_v0, %v3303_v19  ;;  %v6361_v0 = vld [vmem:[%s7676_s4 + $0x180] ss:$8 sps:$4 sm:$0xff]  }
 0x238   :  { %v3524_v23 = vpop.f32.mrf.mxu0  ;;  %v3637_v60 = vpop.f32.mrf.mxu1  ;;  %v4221_v14 = vmax.f32 %v3628_v45, %v4157_v25  ;;  %v4220_v17 = vmax.f32 %v3626_v54, %v4156_v39 }
 0x239   :  { %v4161_v8 = vmul.f32 0.25, %v3632_v22  ;;  %v3525_v2 = vadd.f32 %v3524_v23, %v7031_v24  ;;  %v4224_v53 = vmax.f32 %v3630_v3, %v4160_v13  ;;  %v3636_v4 = vadd.f32 %v3635_v11, %v3523_v16  ;;  %v6363_v23 = vld [vmem:[%s7676_s4 + $0x184] ss:$8 sps:$4 sm:$0xff]  }
 0x23a   :  { %v3526_v29 = vpop.f32.mrf.mxu0  ;;  %v3639_v62 = vpop.f32.mrf.mxu1  ;;  %4854 = vmatpush2.bf16.msra.mxu1 %v6358_v21 }
 0x23b   :  { %v4225_v5 = vmax.f32 %v3632_v22, %v4161_v8  ;;  %v3638_v15 = vadd.f32 %v3637_v60, %v3525_v2  ;;  %v3527_v26 = vadd.f32 %v3526_v29, %v7036_v49  ;;  %v4284_v45 = vpack.c.bf16 %v4224_v53, %v4220_v17  ;;  %4855 = vmatprep.subr.bf16.mxu1 %v6363_v23 }
 0x23c   :  { %v3528_v24 = vpop.f32.mrf.mxu0  ;;  %v3641_v3 = vpop.f32.mrf.mxu1  ;;  %v4164_v19 = vmul.f32 0.25, %v3636_v4  ;;  %v3313_v49 = vadd.f32 %v7069_v51, %v6979_v40 }
 0x23d   :  { %v3529_v35 = vadd.f32 %v3528_v24, %v3416_v20  ;;  %v4285_v13 = vpack.c.bf16 %v4225_v5, %v4221_v14  ;;  %v3640_v25 = vadd.f32 %v3639_v62, %v3527_v26  ;;  %v4165_v39 = vmul.f32 0.25, %v3638_v15 }
 0x23e   :  { %v3532_v22 = vpop.f32.mrf.mxu0  ;;  %v3645_v11 = vpop.f32.mrf.mxu1  ;;  %4856 = vmatpush2.bf16.msra.mxu1 %v6361_v0  ;;  %v4228_v29 = vmax.f32 %v3636_v4, %v4164_v19  ;;  %v3426_v51 = vadd.f32 %v7076_v48, %v3313_v49 }
 0x23f   :  { %v3642_v54 = vadd.f32 %v3641_v3, %v3529_v35  ;;  %v3533_v16 = vadd.f32 %v3532_v22, %v7053_v34  ;;  %4744 = vmatprep.mubr.bf16.mxu0 %v4285_v13  ;;  %v4168_v61 = vmul.f32 0.25, %v3640_v25  ;;  %v4229_v17 = vmax.f32 %v3638_v15, %v4165_v39 }
 0x240   :  { %v3534_v8 = vpop.f32.mrf.mxu0  ;;  %4745 = vmatmul.mubr.bf16.vlgmr.msra.gmra.mxu0 %v4284_v45  ;;  %v3647_v53 = vpop.f32.mrf.mxu1 }
 0x241   :  { %v4169_v2 = vmul.f32 0.25, %v3642_v54  ;;  %v3646_v60 = vadd.f32 %v3645_v11, %v3533_v16  ;;  %v3535_v21 = vadd.f32 %v3534_v8, %v7066_v9  ;;  %v4232_v20 = vmax.f32 %v3640_v25, %v4168_v61 }
 0x242   :  { %v3536_v14 = vpop.f32.mrf.mxu0  ;;  %v3649_v62 = vpop.f32.mrf.mxu1  ;;  %v3323_v9 = vadd.f32 %v7110_v41, %v6979_v40 }
 0x243   :  { %v4233_v35 = vmax.f32 %v3642_v54, %v4169_v2  ;;  %v3648_v5 = vadd.f32 %v3647_v53, %v3535_v21  ;;  %v3537_v34 = vadd.f32 %v3536_v14, %v7074_v50  ;;  %v4288_v26 = vpack.c.bf16 %v4232_v20, %v4228_v29 }
 0x244   :  { %v3538_v24 = vpop.f32.mrf.mxu0  ;;  %v4172_v23 = vmul.f32 0.25, %v3646_v60  ;;  %v3651_v0 = vpop.f32.mrf.mxu1  ;;  %v3436_v41 = vadd.f32 %v7117_v37, %v3323_v9 }
 0x245   :  { %v3650_v3 = vadd.f32 %v3649_v62, %v3537_v34  ;;  %v3539_v13 = vadd.f32 %v3538_v24, %v3426_v51  ;;  %v4289_v45 = vpack.c.bf16 %v4233_v35, %v4229_v17  ;;  %v4173_v19 = vmul.f32 0.25, %v3648_v5 }
 0x246   :  { %v3542_v4 = vpop.f32.mrf.mxu0  ;;  %v3655_v49 = vpop.f32.mrf.mxu1  ;;  %v4236_v15 = vmax.f32 %v3646_v60, %v4172_v23  ;;  %v3333_v17 = vadd.f32 %v7151_v47, %v6979_v40 }
 0x247   :  { %v4176_v25 = vmul.f32 0.25, %v3650_v3  ;;  %v3652_v48 = vadd.f32 %v3651_v0, %v3539_v13  ;;  %v3543_v22 = vadd.f32 %v3542_v4, %v7094_v43  ;;  %4754 = vmatprep.mubr.bf16.mxu0 %v4289_v45  ;;  %v4237_v2 = vmax.f32 %v3648_v5, %v4173_v19 }
 0x248   :  { %v3544_v50 = vpop.f32.mrf.mxu0  ;;  %v3657_v39 = vpop.f32.mrf.mxu1  ;;  %4755 = vmatmul.mubr.bf16.gmra.mxu0 %v4288_v26 }
 0x249   :  { %v4240_v54 = vmax.f32 %v3650_v3, %v4176_v25  ;;  %v4177_v16 = vmul.f32 0.25, %v3652_v48  ;;  %v3545_v11 = vadd.f32 %v3544_v50, %v7107_v52  ;;  %v3656_v61 = vadd.f32 %v3655_v49, %v3543_v22 }
 0x24a   :  { %v3546_v8 = vpop.f32.mrf.mxu0  ;;  %v3659_v29 = vpop.f32.mrf.mxu1  ;;  %v3446_v25 = vadd.f32 %v7158_v7, %v3333_v17 }
 0x24b   :  { %v4292_v21 = vpack.c.bf16 %v4240_v54, %v4236_v15  ;;  %v4241_v53 = vmax.f32 %v3652_v48, %v4177_v16  ;;  %v3658_v20 = vadd.f32 %v3657_v39, %v3545_v11  ;;  %v3547_v43 = vadd.f32 %v3546_v8, %v7115_v33 }
 0x24c   :  { %v3548_v14 = vpop.f32.mrf.mxu0  ;;  %v3661_v60 = vpop.f32.mrf.mxu1  ;;  %v4180_v34 = vmul.f32 0.25, %v3656_v61 }
 0x24d   :  { %v3549_v51 = vadd.f32 %v3548_v14, %v3436_v41  ;;  %v4293_v35 = vpack.c.bf16 %v4241_v53, %v4237_v2  ;;  %v3660_v62 = vadd.f32 %v3659_v29, %v3547_v43  ;;  %v4181_v24 = vmul.f32 0.25, %v3658_v20 }
 0x24e   :  { %v3552_v52 = vpop.f32.mrf.mxu0  ;;  %v3665_v5 = vpop.f32.mrf.mxu1  ;;  %v4244_v4 = vmax.f32 %v3656_v61, %v4180_v34 }
 0x24f   :  { %v3662_v26 = vadd.f32 %v3661_v60, %v3549_v51  ;;  %v3553_v37 = vadd.f32 %v3552_v52, %v7135_v55  ;;  %4764 = vmatprep.mubr.bf16.mxu0 %v4293_v35  ;;  %v4184_v23 = vmul.f32 0.25, %v3660_v62  ;;  %v4245_v49 = vmax.f32 %v3658_v20, %v4181_v24 }
 0x250   :  { %v3554_v3 = vpop.f32.mrf.mxu0  ;;  %v3667_v9 = vpop.f32.mrf.mxu1  ;;  %4765 = vmatmul.mubr.bf16.gmra.mxu0 %v4292_v21 }
 0x251   :  { %v4185_v13 = vmul.f32 0.25, %v3662_v26  ;;  %v3666_v33 = vadd.f32 %v3665_v5, %v3553_v37  ;;  %v3555_v0 = vadd.f32 %v3554_v3, %v7148_v31  ;;  %v4248_v45 = vmax.f32 %v3660_v62, %v4184_v23 }
 0x252   :  { %v3556_v19 = vpop.f32.mrf.mxu0  ;;  %v3669_v22 = vpop.f32.mrf.mxu1  ;;  %v3343_v31 = vadd.f32 %v7192_v58, %v6979_v40 }
 0x253   :  { %v4249_v47 = vmax.f32 %v3662_v26, %v4185_v13  ;;  %v3668_v48 = vadd.f32 %v3667_v9, %v3555_v0  ;;  %v3557_v55 = vadd.f32 %v3556_v19, %v7156_v27  ;;  %v4296_v50 = vpack.c.bf16 %v4248_v45, %v4244_v4 }
 0x254   :  { %v3558_v15 = vpop.f32.mrf.mxu0  ;;  %v4188_v54 = vmul.f32 0.25, %v3666_v33  ;;  %v3671_v39 = vpop.f32.mrf.mxu1  ;;  %v3456_v58 = vadd.f32 %v7199_v1, %v3343_v31 }
 0x255   :  { %v3670_v16 = vadd.f32 %v3669_v22, %v3557_v55  ;;  %v3559_v11 = vadd.f32 %v3558_v15, %v3446_v25  ;;  %v4297_v8 = vpack.c.bf16 %v4249_v47, %v4245_v49  ;;  %v4189_v41 = vmul.f32 0.25, %v3668_v48 }
 0x256   :  { %v3562_v61 = vpop.f32.mrf.mxu0  ;;  %v3675_v53 = vpop.f32.mrf.mxu1  ;;  %v4252_v29 = vmax.f32 %v3666_v33, %v4188_v54  ;;  %v3353_v33 = vadd.f32 %v7233_v12, %v6979_v40 }
 0x257   :  { %v4192_v2 = vmul.f32 0.25, %v3670_v16  ;;  %v3672_v7 = vadd.f32 %v3671_v39, %v3559_v11  ;;  %v3563_v21 = vadd.f32 %v3562_v61, %v7176_v46  ;;  %4774 = vmatprep.mubr.bf16.mxu0 %v4297_v8  ;;  %v4253_v34 = vmax.f32 %v3668_v48, %v4189_v41 }
 0x258   :  { %v3564_v27 = vpop.f32.mrf.mxu0  ;;  %v3677_v51 = vpop.f32.mrf.mxu1  ;;  %4775 = vmatmul.mubr.bf16.gmra.mxu0 %v4296_v50  ;;  %v3466_v50 = vadd.f32 %v7240_v59, %v3353_v33 }
 0x259   :  { %v4256_v20 = vmax.f32 %v3670_v16, %v4192_v2  ;;  %v4193_v43 = vmul.f32 0.25, %v3672_v7  ;;  %v3565_v14 = vadd.f32 %v3564_v27, %v7189_v57  ;;  %v3676_v60 = vadd.f32 %v3675_v53, %v3563_v21 }
 0x25a   :  { %v3566_v35 = vpop.f32.mrf.mxu0  ;;  %v3679_v17 = vpop.f32.mrf.mxu1  ;;  %v1962_v21 = vsub.s32 2, %v6955_v56 }
 0x25b   :  { %v4300_v62 = vpack.c.bf16 %v4256_v20, %v4252_v29  ;;  %v4257_v52 = vmax.f32 %v3672_v7, %v4193_v43  ;;  %v3678_v26 = vadd.f32 %v3677_v51, %v3565_v14  ;;  %v3567_v46 = vadd.f32 %v3566_v35, %v7197_v32 }
 0x25c   :  { %v3568_v37 = vpop.f32.mrf.mxu0  ;;  %v3681_v24 = vpop.f32.mrf.mxu1  ;;  %v4196_v3 = vmul.f32 0.25, %v3676_v60  ;;  %v1966_v43 = vsub.s32 3, %v6955_v56 }
 0x25d   :  { %v3569_v5 = vadd.f32 %v3568_v37, %v3456_v58  ;;  %v4301_v23 = vpack.c.bf16 %v4257_v52, %v4253_v34  ;;  %v3680_v13 = vadd.f32 %v3679_v17, %v3567_v46  ;;  %v4197_v4 = vmul.f32 0.25, %v3678_v26 }
 0x25e   :  { %v3572_v57 = vpop.f32.mrf.mxu0  ;;  %v3685_v9 = vpop.f32.mrf.mxu1  ;;  %v4260_v55 = vmax.f32 %v3676_v60, %v4196_v3  ;;  %v7361_v3 = vrot.slane %v6965_v63, %v1966_v43 }
 0x25f   :  { %v3682_v0 = vadd.f32 %v3681_v24, %v3569_v5  ;;  %v3573_v1 = vadd.f32 %v3572_v57, %v7217_v42  ;;  %4784 = vmatprep.mubr.bf16.mxu0 %v4301_v23  ;;  %v4200_v45 = vmul.f32 0.25, %v3680_v13  ;;  %v4261_v16 = vmax.f32 %v3678_v26, %v4197_v4 }
 0x260   :  { %v3574_v19 = vpop.f32.mrf.mxu0  ;;  %v3687_v48 = vpop.f32.mrf.mxu1  ;;  %4785 = vmatmul.mubr.bf16.gmra.mxu0 %v4300_v62  ;;  %v7357_v62 = vrot.slane %v6965_v63, %v1962_v21 }
 0x261   :  { %v4201_v25 = vmul.f32 0.25, %v3682_v0  ;;  %v3686_v32 = vadd.f32 %v3685_v9, %v3573_v1  ;;  %v3575_v47 = vadd.f32 %v3574_v19, %v7230_v30  ;;  %v4264_v22 = vmax.f32 %v3680_v13, %v4200_v45 }
 0x262   :  { %v3576_v49 = vpop.f32.mrf.mxu0  ;;  %v3689_v54 = vpop.f32.mrf.mxu1  ;;  %v3363_v30 = vadd.f32 %v7269_v10, %v6979_v40 }
 0x263   :  { %v4265_v12 = vmax.f32 %v3682_v0, %v4201_v25  ;;  %v3688_v15 = vadd.f32 %v3687_v48, %v3575_v47  ;;  %v3577_v42 = vadd.f32 %v3576_v49, %v7238_v38  ;;  %v4304_v11 = vpack.c.bf16 %v4264_v22, %v4260_v55 }
 0x264   :  { %v3578_v39 = vpop.f32.mrf.mxu0  ;;  %v4204_v31 = vmul.f32 0.25, %v3686_v32  ;;  %v3691_v41 = vpop.f32.mrf.mxu1  ;;  %v3476_v10 = vadd.f32 %v7278_v18, %v3363_v30 }
 0x265   :  { %v3690_v61 = vadd.f32 %v3689_v54, %v3577_v42  ;;  %v3579_v8 = vadd.f32 %v3578_v39, %v3466_v50  ;;  %v4305_v7 = vpack.c.bf16 %v4265_v12, %v4261_v16  ;;  %v4205_v59 = vmul.f32 0.25, %v3688_v15 }
 0x266   :  { %v3582_v2 = vpop.f32.mrf.mxu0  ;;  %v3695_v29 = vpop.f32.mrf.mxu1  ;;  %v4268_v14 = vmax.f32 %v3686_v32, %v4204_v31 }
 0x267   :  { %v4208_v53 = vmul.f32 0.25, %v3690_v61  ;;  %v3692_v27 = vadd.f32 %v3691_v41, %v3579_v8  ;;  %v3583_v38 = vadd.f32 %v3582_v2, %v7257_v44  ;;  %4794 = vmatprep.mubr.bf16.mxu0 %v4305_v7  ;;  %v4269_v44 = vmax.f32 %v3688_v15, %v4205_v59 }
 0x268   :  { %v3584_v20 = vpop.f32.mrf.mxu0  ;;  %v3697_v40 = vpop.f32.mrf.mxu1  ;;  %4795 = vmatmul.mubr.bf16.gmra.mxu0 %v4304_v11 }
 0x269   :  { %v4272_v51 = vmax.f32 %v3690_v61, %v4208_v53  ;;  %v4209_v60 = vmul.f32 0.25, %v3692_v27  ;;  %v3585_v35 = vadd.f32 %v3584_v20, %v7266_v36  ;;  %v3696_v58 = vadd.f32 %v3695_v29, %v3583_v38 }
 0x26a   :  { %v3586_v34 = vpop.f32.mrf.mxu0  ;;  %v3699_v46 = vpop.f32.mrf.mxu1 }
 0x26b   :  { %v4308_v52 = vpack.c.bf16 %v4272_v51, %v4268_v14  ;;  %v4273_v17 = vmax.f32 %v3692_v27, %v4209_v60  ;;  %v3698_v26 = vadd.f32 %v3697_v40, %v3585_v35  ;;  %v3587_v37 = vadd.f32 %v3586_v34, %v7276_v28 }
 0x26c   :  { %v3588_v5 = vpop.f32.mrf.mxu0  ;;  %v3701_v23 = vpop.f32.mrf.mxu1  ;;  %v4212_v18 = vmul.f32 0.25, %v3696_v58 }
 0x26d   :  { %v3589_v24 = vadd.f32 %v3588_v5, %v3476_v10  ;;  %v4309_v36 = vpack.c.bf16 %v4273_v17, %v4269_v44  ;;  %v3700_v13 = vadd.f32 %v3699_v46, %v3587_v37  ;;  %v4213_v33 = vmul.f32 0.25, %v3698_v26 }
 0x26e   :  { %v3738_v57 = vpop.f32.mrf.mxu0  ;;  %v4276_v63 = vmax.f32 %v3696_v58, %v4212_v18 }
 0x26f   :  { %v3702_v0 = vadd.f32 %v3701_v23, %v3589_v24  ;;  %v3739_v1 = vadd.f32 %v3738_v57, %v7357_v62  ;;  %v3851_v9 = vpop.f32.mrf.mxu1  ;;  %4804 = vmatprep.mubr.bf16.mxu0 %v4309_v36  ;;  %v4216_v4 = vmul.f32 0.25, %v3700_v13  ;;  %v4277_v55 = vmax.f32 %v3698_v26, %v4213_v33 }
 0x270   :  { %v3740_v45 = vpop.f32.mrf.mxu0  ;;  %4805 = vmatmul.mubr.bf16.gmra.mxu0 %v4308_v52 }
 0x271   :  { %v4217_v19 = vmul.f32 0.25, %v3702_v0  ;;  %v7364_v28 = vadd.f32 %v3851_v9, %v3739_v1  ;;  %v3741_v25 = vadd.f32 %v3740_v45, %v7361_v3  ;;  %v3853_v32 = vpop.f32.mrf.mxu1  ;;  %v4280_v47 = vmax.f32 %v3700_v13, %v4216_v4 }
 0x272   :  { %v7367_v48 = vpop.f32.mrf.mxu0 }
 0x273   :  { %v4281_v22 = vmax.f32 %v3702_v0, %v4217_v19  ;;  %v7369_v49 = vadd.f32 %v3853_v32, %v3741_v25  ;;  %v7371_v50 = vpop.f32.mrf.mxu1  ;;  %v4312_v12 = vpack.c.bf16 %v4280_v47, %v4276_v63 }
 0x274   :  { %v7373_v15 = vpop.f32.mrf.mxu0 }
 0x275   :  { %v7375_v42 = vpop.f32.mrf.mxu1  ;;  %v4313_v54 = vpack.c.bf16 %v4281_v22, %v4277_v55 }
 0x276   :  { %v3748_v16 = vpop.f32.mrf.mxu0 }
 0x277   :  { %v3749_v11 = vadd.f32 %v3748_v16, %v7357_v62  ;;  %v3861_v39 = vpop.f32.mrf.mxu1  ;;  %4814 = vmatprep.mubr.bf16.mxu0 %v4313_v54 }
 0x278   :  { %v3750_v31 = vpop.f32.mrf.mxu0  ;;  %4815 = vmatmul.mubr.bf16.gmra.mxu0 %v4312_v12 }
 0x279   :  { %v7378_v61 = vadd.f32 %v3861_v39, %v3749_v11  ;;  %v3751_v8 = vadd.f32 %v3750_v31, %v7361_v3  ;;  %v3863_v41 = vpop.f32.mrf.mxu1 }
 0x27a   :  { %v3752_v30 = vpop.f32.mrf.mxu0 }
 0x27b   :  { %v7381_v2 = vadd.f32 %v3863_v41, %v3751_v8  ;;  %v3753_v7 = vadd.f32 %v3752_v30, %v7357_v62  ;;  %v3865_v21 = vpop.f32.mrf.mxu1 }
 0x27c   :  { %v7384_v59 = vpop.f32.mrf.mxu0 }
 0x27d   :  { %v7386_v53 = vadd.f32 %v3865_v21, %v3753_v7  ;;  %v7388_v27 = vpop.f32.mrf.mxu1 }
 0x27e   :  { %v3758_v38 = vpop.f32.mrf.mxu0 }
 0x27f   :  { %v3759_v29 = vadd.f32 %v3758_v38, %v7357_v62  ;;  %v3871_v20 = vpop.f32.mrf.mxu1 }
 0x280   :  { %v3760_v43 = vpop.f32.mrf.mxu0 }
 0x281   :  { %v7391_v14 = vadd.f32 %v3871_v20, %v3759_v29  ;;  %v3761_v51 = vadd.f32 %v3760_v43, %v7361_v3  ;;  %v3873_v60 = vpop.f32.mrf.mxu1 }
 0x282   :  { %v3762_v35 = vpop.f32.mrf.mxu0 }
 0x283   :  { %v7394_v40 = vadd.f32 %v3873_v60, %v3761_v51  ;;  %v3763_v10 = vadd.f32 %v3762_v35, %v7357_v62  ;;  %v3875_v58 = vpop.f32.mrf.mxu1 }
 0x284   :  { %v7397_v34 = vpop.f32.mrf.mxu0 }
 0x285   :  { %v7399_v44 = vadd.f32 %v3875_v58, %v3763_v10  ;;  %v7401_v52 = vpop.f32.mrf.mxu1 }
 0x286   :  { %v3768_v17 = vpop.f32.mrf.mxu0 }
 0x287   :  { %v3769_v26 = vadd.f32 %v3768_v17, %v7357_v62  ;;  %v3881_v46 = vpop.f32.mrf.mxu1 }
 0x288   :  { %v3770_v37 = vpop.f32.mrf.mxu0 }
 0x289   :  { %v7404_v5 = vadd.f32 %v3881_v46, %v3769_v26  ;;  %v3771_v24 = vadd.f32 %v3770_v37, %v7361_v3  ;;  %v3883_v23 = vpop.f32.mrf.mxu1 }
 0x28a   :  { %v3772_v36 = vpop.f32.mrf.mxu0 }
 0x28b   :  { %v7407_v18 = vadd.f32 %v3883_v23, %v3771_v24  ;;  %v3773_v13 = vadd.f32 %v3772_v36, %v7357_v62  ;;  %v3885_v57 = vpop.f32.mrf.mxu1 }
 0x28c   :  { %v7410_v33 = vpop.f32.mrf.mxu0 }
 0x28d   :  { %v7412_v0 = vadd.f32 %v3885_v57, %v3773_v13  ;;  %v7414_v1 = vpop.f32.mrf.mxu1 }
 0x28e   :  { %v3778_v9 = vpop.f32.mrf.mxu0 }
 0x28f   :  { %v3779_v4 = vadd.f32 %v3778_v9, %v7357_v62  ;;  %v3891_v45 = vpop.f32.mrf.mxu1 }
 0x290   :  { %v3780_v19 = vpop.f32.mrf.mxu0 }
 0x291   :  { %v7417_v25 = vadd.f32 %v3891_v45, %v3779_v4  ;;  %v3781_v32 = vadd.f32 %v3780_v19, %v7361_v3  ;;  %v3893_v63 = vpop.f32.mrf.mxu1 }
 0x292   :  { %v3782_v47 = vpop.f32.mrf.mxu0 }
 0x293   :  { %v7420_v55 = vadd.f32 %v3893_v63, %v3781_v32  ;;  %v3783_v22 = vadd.f32 %v3782_v47, %v7357_v62  ;;  %v3895_v12 = vpop.f32.mrf.mxu1 }
 0x294   :  { %v7423_v54 = vpop.f32.mrf.mxu0 }
 0x295   :  { %v7425_v16 = vadd.f32 %v3895_v12, %v3783_v22  ;;  %v7427_v11 = vpop.f32.mrf.mxu1 }
 0x296   :  { %v3788_v39 = vpop.f32.mrf.mxu0 }
 0x297   :  { %v3789_v31 = vadd.f32 %v3788_v39, %v7357_v62  ;;  %v3901_v8 = vpop.f32.mrf.mxu1 }
 0x298   :  { %v3790_v41 = vpop.f32.mrf.mxu0 }
 0x299   :  { %v7430_v30 = vadd.f32 %v3901_v8, %v3789_v31  ;;  %v3791_v7 = vadd.f32 %v3790_v41, %v7361_v3  ;;  %v3903_v21 = vpop.f32.mrf.mxu1 }
 0x29a   :  { %v3792_v38 = vpop.f32.mrf.mxu0 }
 0x29b   :  { %v7433_v29 = vadd.f32 %v3903_v21, %v3791_v7  ;;  %v3793_v20 = vadd.f32 %v3792_v38, %v7357_v62  ;;  %v3905_v43 = vpop.f32.mrf.mxu1 }
 0x29c   :  { %v7436_v51 = vpop.f32.mrf.mxu0 }
 0x29d   :  { %v7438_v60 = vadd.f32 %v3905_v43, %v3793_v20  ;;  %v7440_v35 = vpop.f32.mrf.mxu1  ;;  %v3743_v43 = vadd.f32 %v7367_v48, %v7357_v62 }
 0x29e   :  { %v3798_v10 = vpop.f32.mrf.mxu0 }
 0x29f   :  { %v3799_v58 = vadd.f32 %v3798_v10, %v7357_v62  ;;  %v3911_v17 = vpop.f32.mrf.mxu1 }
 0x2a0   :  { %v3800_v26 = vpop.f32.mrf.mxu0 }
 0x2a1   :  { %v7443_v46 = vadd.f32 %v3911_v17, %v3799_v58  ;;  %v3801_v37 = vadd.f32 %v3800_v26, %v7361_v3  ;;  %v3913_v24 = vpop.f32.mrf.mxu1  ;;  %v3745_v58 = vadd.f32 %v7373_v15, %v7361_v3 }
 0x2a2   :  { %v3802_v23 = vpop.f32.mrf.mxu0 }
 0x2a3   :  { %v7446_v36 = vadd.f32 %v3913_v24, %v3801_v37  ;;  %v3803_v13 = vadd.f32 %v3802_v23, %v7357_v62  ;;  %v3915_v57 = vpop.f32.mrf.mxu1  ;;  %v3856_v24 = vadd.f32 %v7371_v50, %v3743_v43 }
 0x2a4   :  { %v7449_v9 = vpop.f32.mrf.mxu0 }
 0x2a5   :  { %v7451_v4 = vadd.f32 %v3915_v57, %v3803_v13  ;;  %v7453_v45 = vpop.f32.mrf.mxu1 }
 0x2a6   :  { %v3808_v19 = vpop.f32.mrf.mxu0 }
 0x2a7   :  { %v3809_v32 = vadd.f32 %v3808_v19, %v7357_v62  ;;  %v3921_v63 = vpop.f32.mrf.mxu1  ;;  %v3858_v19 = vadd.f32 %v7375_v42, %v3745_v58 }
 0x2a8   :  { %v3810_v47 = vpop.f32.mrf.mxu0 }
 0x2a9   :  { %v7456_v22 = vadd.f32 %v3921_v63, %v3809_v32  ;;  %v3811_v12 = vadd.f32 %v3810_v47, %v7361_v3  ;;  %v3923_v39 = vpop.f32.mrf.mxu1 }
 0x2aa   :  { %v3812_v31 = vpop.f32.mrf.mxu0 }
 0x2ab   :  { %v7459_v8 = vadd.f32 %v3923_v39, %v3811_v12  ;;  %v3813_v41 = vadd.f32 %v3812_v31, %v7357_v62  ;;  %v3925_v7 = vpop.f32.mrf.mxu1 }
 0x2ac   :  { %v7462_v21 = vpop.f32.mrf.mxu0 }
 0x2ad   :  { %v7464_v38 = vadd.f32 %v3925_v7, %v3813_v41  ;;  %v7466_v20 = vpop.f32.mrf.mxu1 }
 0x2af   :  { %v3964_v10 = vpop.f32.mrf.mxu0 }
 0x2b0   :  { %v4077_v17 = vpop.f32.mrf.mxu1  ;;  %v3965_v26 = vadd.f32 %v3964_v10, %v7364_v28  ;;  %v3755_v28 = vadd.f32 %v7384_v59, %v7361_v3 }
 0x2b1   :  { %v3966_v37 = vpop.f32.mrf.mxu0 }
 0x2b2   :  { %v3967_v23 = vadd.f32 %v3966_v37, %v7369_v49  ;;  %v4079_v13 = vpop.f32.mrf.mxu1  ;;  %v4078_v62 = vadd.f32 %v4077_v17, %v3965_v26 }
 0x2b3   :  { %v3968_v57 = vpop.f32.mrf.mxu0 }
 0x2b4   :  { %v4080_v32 = vadd.f32 %v4079_v13, %v3967_v23  ;;  %v3969_v63 = vadd.f32 %v3968_v57, %v3856_v24  ;;  %v4081_v47 = vpop.f32.mrf.mxu1  ;;  %v4158_v10 = vmul.f32 0.25, %v4078_v62  ;;  %v3868_v13 = vadd.f32 %v7388_v27, %v3755_v28 }
 0x2b5   :  { %v3970_v48 = vpop.f32.mrf.mxu0 }
 0x2b6   :  { %v4082_v12 = vadd.f32 %v4081_v47, %v3969_v63  ;;  %v3971_v39 = vadd.f32 %v3970_v48, %v3858_v19  ;;  %v4083_v15 = vpop.f32.mrf.mxu1  ;;  %v4159_v41 = vmul.f32 0.25, %v4080_v32  ;;  %v4222_v63 = vmax.f32 %v4078_v62, %v4158_v10  ;;  %v6365_v62 = vld [vmem:[%s7678_s6 + $0x38] sm:$0xff]  }
 0x2b7   :  { %v3974_v31 = vpop.f32.mrf.mxu0 }
 0x2b8   :  { %v4162_v50 = vmul.f32 0.25, %v4082_v12  ;;  %v4084_v7 = vadd.f32 %v4083_v15, %v3971_v39  ;;  %v3975_v49 = vadd.f32 %v3974_v31, %v7378_v61  ;;  %v4087_v43 = vpop.f32.mrf.mxu1  ;;  %v4223_v57 = vmax.f32 %v4080_v32, %v4159_v41 }
 0x2b9   :  { %v3976_v42 = vpop.f32.mrf.mxu0 }
 0x2ba   :  { %v4163_v58 = vmul.f32 0.25, %v4084_v7  ;;  %v3977_v37 = vadd.f32 %v3976_v42, %v7381_v2  ;;  %v4089_v17 = vpop.f32.mrf.mxu1  ;;  %v4226_v26 = vmax.f32 %v4082_v12, %v4162_v50  ;;  %v4088_v24 = vadd.f32 %v4087_v43, %v3975_v49 }
 0x2bb   :  { %v3978_v23 = vpop.f32.mrf.mxu0  ;;  %v3765_v2 = vadd.f32 %v7397_v34, %v7361_v3  ;;  %v6366_v34 = vld [vmem:[%s7678_s6 + $0x70] sm:$0xff]  }
 0x2bc   :  { %v4227_v59 = vmax.f32 %v4084_v7, %v4163_v58  ;;  %v4091_v19 = vpop.f32.mrf.mxu1  ;;  %v4090_v47 = vadd.f32 %v4089_v17, %v3977_v37  ;;  %v3979_v48 = vadd.f32 %v3978_v23, %v7386_v53  ;;  %v4286_v42 = vpack.c.bf16 %v4226_v26, %v4222_v63  ;;  %v6364_v53 = vld [vmem:[%s7678_s6 + $0x78] sm:$0xff]  }
 0x2bd   :  { %v3980_v61 = vpop.f32.mrf.mxu0  ;;  %v4166_v12 = vmul.f32 0.25, %v4088_v24  ;;  %5774 = vmatprep.subr.bf16.mxu0 %v6364_v53  ;;  %5838 = vmatprep.subr.bf16.mxu1 %v6364_v53  ;;  %v3878_v17 = vadd.f32 %v7401_v52, %v3765_v2  ;;  %v6370_v53 = vld [vmem:[%s7678_s6 + $0x60] sm:$0xff]  }
 0x2be   :  { %v3981_v39 = vadd.f32 %v3980_v61, %v3868_v13  ;;  %v4093_v15 = vpop.f32.mrf.mxu1  ;;  %v4287_v31 = vpack.c.bf16 %v4227_v59, %v4223_v57  ;;  %v4092_v50 = vadd.f32 %v4091_v19, %v3979_v48  ;;  %v4167_v28 = vmul.f32 0.25, %v4090_v47  ;;  %5775 = vmatpush3.bf16.msra.mxu0 %v6365_v62  ;;  %v6367_v57 = vld [vmem:[%s7678_s6 + $0x30] sm:$0xff]  }
 0x2bf   :  { %v3984_v49 = vpop.f32.mrf.mxu0  ;;  %v4230_v26 = vmax.f32 %v4088_v24, %v4166_v12  ;;  %5776 = vmatprep.subr.bf16.mxu0 %v6366_v34 }
 0x2c0   :  { %v4094_v43 = vadd.f32 %v4093_v15, %v3981_v39  ;;  %v3985_v27 = vadd.f32 %v3984_v49, %v7391_v14  ;;  %v4097_v32 = vpop.f32.mrf.mxu1  ;;  %4857 = vmatprep.mubr.bf16.mxu1 %v4287_v31  ;;  %v4170_v41 = vmul.f32 0.25, %v4092_v50  ;;  %v4231_v52 = vmax.f32 %v4090_v47, %v4167_v28 }
 0x2c1   :  { %v3986_v7 = vpop.f32.mrf.mxu0  ;;  %4858 = vmatmul.mubr.bf16.vlgmr.msra.gmra.mxu1 %v4286_v42  ;;  %v3775_v42 = vadd.f32 %v7410_v33, %v7361_v3 }
 0x2c2   :  { %v4171_v10 = vmul.f32 0.25, %v4094_v43  ;;  %v4098_v14 = vadd.f32 %v4097_v32, %v3985_v27  ;;  %v3987_v58 = vadd.f32 %v3986_v7, %v7394_v40  ;;  %v4099_v37 = vpop.f32.mrf.mxu1  ;;  %v4234_v23 = vmax.f32 %v4092_v50, %v4170_v41  ;;  %5846 = vmatpush3.bf16.msra.mxu1 %v6365_v62  ;;  %v6368_v40 = vld [vmem:[%s7678_s6 + $0x68] sm:$0xff]   ;;  %5777 = vmatpush3.bf16.msra.mxu0 %v6367_v57 }
 0x2c3   :  { %v3988_v13 = vpop.f32.mrf.mxu0  ;;  %5839 = vmatprep.subr.bf16.mxu1 %v6366_v34  ;;  %5778 = vmatprep.subr.bf16.mxu0 %v6368_v40 }
 0x2c4   :  { %v4235_v59 = vmax.f32 %v4094_v43, %v4171_v10  ;;  %v4100_v19 = vadd.f32 %v4099_v37, %v3987_v58  ;;  %v3989_v63 = vadd.f32 %v3988_v13, %v7399_v44  ;;  %v4101_v48 = vpop.f32.mrf.mxu1  ;;  %v4290_v24 = vpack.c.bf16 %v4234_v23, %v4230_v26  ;;  %v6369_v44 = vld [vmem:[%s7678_s6 + $0x28] sm:$0xff]   ;;  %v6371_v37 = vld [vmem:[%s7678_s6 + $0x20] sm:$0xff]  }
 0x2c5   :  { %v3990_v61 = vpop.f32.mrf.mxu0  ;;  %v4174_v39 = vmul.f32 0.25, %v4098_v14  ;;  %v3888_v10 = vadd.f32 %v7414_v1, %v3775_v42 }
 0x2c6   :  { %v4102_v15 = vadd.f32 %v4101_v48, %v3989_v63  ;;  %v3991_v31 = vadd.f32 %v3990_v61, %v3878_v17  ;;  %v4103_v2 = vpop.f32.mrf.mxu1  ;;  %v4291_v50 = vpack.c.bf16 %v4235_v59, %v4231_v52  ;;  %5847 = vmatpush3.bf16.msra.mxu1 %v6367_v57  ;;  %v4175_v49 = vmul.f32 0.25, %v4100_v19  ;;  %5779 = vmatpush3.bf16.msra.mxu0 %v6369_v44  ;;  %v6373_v61 = vld [vmem:[%s7678_s6 + $0x18] sm:$0xff]  }
 0x2c7   :  { %v3994_v12 = vpop.f32.mrf.mxu0  ;;  %5840 = vmatprep.subr.bf16.mxu1 %v6368_v40  ;;  %v4238_v62 = vmax.f32 %v4098_v14, %v4174_v39  ;;  %5780 = vmatprep.subr.bf16.mxu0 %v6370_v53  ;;  %v3785_v40 = vadd.f32 %v7423_v54, %v7361_v3 }
 0x2c8   :  { %v4178_v43 = vmul.f32 0.25, %v4102_v15  ;;  %v4104_v47 = vadd.f32 %v4103_v2, %v3991_v31  ;;  %v3995_v27 = vadd.f32 %v3994_v12, %v7404_v5  ;;  %v4107_v32 = vpop.f32.mrf.mxu1  ;;  %4867 = vmatprep.mubr.bf16.mxu1 %v4291_v50  ;;  %v4239_v17 = vmax.f32 %v4100_v19, %v4175_v49  ;;  %v6374_v31 = vld [vmem:[%s7678_s6 + $0x50] sm:$0xff]  }
 0x2c9   :  { %v3996_v33 = vpop.f32.mrf.mxu0  ;;  %4868 = vmatmul.mubr.bf16.gmra.mxu1 %v4290_v24 }
 0x2ca   :  { %v4242_v34 = vmax.f32 %v4102_v15, %v4178_v43  ;;  %v4179_v28 = vmul.f32 0.25, %v4104_v47  ;;  %v3997_v41 = vadd.f32 %v3996_v33, %v7407_v18  ;;  %v4109_v7 = vpop.f32.mrf.mxu1  ;;  %v4108_v58 = vadd.f32 %v4107_v32, %v3995_v27  ;;  %5848 = vmatpush3.bf16.msra.mxu1 %v6369_v44  ;;  %v6372_v18 = vld [vmem:[%s7678_s6 + $0x58] sm:$0xff]   ;;  %5781 = vmatpush3.bf16.msra.mxu0 %v6371_v37  ;;  %v6375_v32 = vld [vmem:[%s7678_s6 + $0x10] sm:$0xff]  }
 0x2cb   :  { %v3998_v5 = vpop.f32.mrf.mxu0  ;;  %5841 = vmatprep.subr.bf16.mxu1 %v6370_v53  ;;  %5782 = vmatprep.subr.bf16.mxu0 %v6372_v18  ;;  %v3898_v43 = vadd.f32 %v7427_v11, %v3785_v40 }
 0x2cc   :  { %v4294_v26 = vpack.c.bf16 %v4242_v34, %v4238_v62  ;;  %v4243_v23 = vmax.f32 %v4104_v47, %v4179_v28  ;;  %v4111_v14 = vpop.f32.mrf.mxu1  ;;  %v4110_v13 = vadd.f32 %v4109_v7, %v3997_v41  ;;  %v3999_v1 = vadd.f32 %v3998_v5, %v7412_v0 }
 0x2cd   :  { %v4000_v57 = vpop.f32.mrf.mxu0  ;;  %v4182_v19 = vmul.f32 0.25, %v4108_v58  ;;  %v3795_v5 = vadd.f32 %v7436_v51, %v7361_v3 }
 0x2ce   :  { %v4001_v59 = vadd.f32 %v4000_v57, %v3888_v10  ;;  %v4113_v63 = vpop.f32.mrf.mxu1  ;;  %v4295_v48 = vpack.c.bf16 %v4243_v23, %v4239_v17  ;;  %v4112_v52 = vadd.f32 %v4111_v14, %v3999_v1  ;;  %5849 = vmatpush3.bf16.msra.mxu1 %v6371_v37  ;;  %v4183_v54 = vmul.f32 0.25, %v4110_v13  ;;  %5783 = vmatpush3.bf16.msra.mxu0 %v6373_v61 }
 0x2cf   :  { %v4004_v24 = vpop.f32.mrf.mxu0  ;;  %5842 = vmatprep.subr.bf16.mxu1 %v6372_v18  ;;  %5784 = vmatprep.subr.bf16.mxu0 %v6374_v31 }
 0x2d0   :  { %v4114_v39 = vadd.f32 %v4113_v63, %v4001_v59  ;;  %v4005_v15 = vadd.f32 %v4004_v24, %v7417_v25  ;;  %v4117_v0 = vpop.f32.mrf.mxu1  ;;  %4877 = vmatprep.mubr.bf16.mxu1 %v4295_v48  ;;  %v4186_v2 = vmul.f32 0.25, %v4112_v52  ;;  %v4246_v25 = vmax.f32 %v4108_v58, %v4182_v19 }
 0x2d1   :  { %v4006_v42 = vpop.f32.mrf.mxu0  ;;  %4878 = vmatmul.mubr.bf16.gmra.mxu1 %v4294_v26  ;;  %v3908_v19 = vadd.f32 %v7440_v35, %v3795_v5 }
 0x2d2   :  { %v4187_v12 = vmul.f32 0.25, %v4114_v39  ;;  %v4118_v50 = vadd.f32 %v4117_v0, %v4005_v15  ;;  %v4007_v44 = vadd.f32 %v4006_v42, %v7420_v55  ;;  %v4119_v49 = vpop.f32.mrf.mxu1  ;;  %v4250_v47 = vmax.f32 %v4112_v52, %v4186_v2  ;;  %5850 = vmatpush3.bf16.msra.mxu1 %v6373_v61  ;;  %5785 = vmatpush3.bf16.msra.mxu0 %v6375_v32 }
 0x2d3   :  { %v4008_v27 = vpop.f32.mrf.mxu0  ;;  %5843 = vmatprep.subr.bf16.mxu1 %v6374_v31  ;;  %v4247_v55 = vmax.f32 %v4110_v13, %v4183_v54 }
 0x2d4   :  { %v4251_v53 = vmax.f32 %v4114_v39, %v4187_v12  ;;  %v4120_v33 = vadd.f32 %v4119_v49, %v4007_v44  ;;  %v4009_v62 = vadd.f32 %v4008_v27, %v7425_v16  ;;  %v4121_v34 = vpop.f32.mrf.mxu1  ;;  %v4298_v28 = vpack.c.bf16 %v4250_v47, %v4246_v25 }
 0x2d5   :  { %v4010_v41 = vpop.f32.mrf.mxu0  ;;  %v4190_v11 = vmul.f32 0.25, %v4118_v50 }
 0x2d6   :  { %v4122_v7 = vadd.f32 %v4121_v34, %v4009_v62  ;;  %v4011_v10 = vadd.f32 %v4010_v41, %v3898_v43  ;;  %v4123_v58 = vpop.f32.mrf.mxu1  ;;  %v4299_v17 = vpack.c.bf16 %v4251_v53, %v4247_v55  ;;  %5851 = vmatpush3.bf16.msra.mxu1 %v6375_v32  ;;  %v4191_v26 = vmul.f32 0.25, %v4120_v33 }
 0x2d7   :  { %v4014_v37 = vpop.f32.mrf.mxu0  ;;  %v4254_v1 = vmax.f32 %v4118_v50, %v4190_v11  ;;  %v3805_v50 = vadd.f32 %v7449_v9, %v7361_v3 }
 0x2d8   :  { %v4194_v23 = vmul.f32 0.25, %v4122_v7  ;;  %v4124_v16 = vadd.f32 %v4123_v58, %v4011_v10  ;;  %v4015_v14 = vadd.f32 %v4014_v37, %v7430_v30  ;;  %v4127_v18 = vpop.f32.mrf.mxu1  ;;  %4887 = vmatprep.mubr.bf16.mxu1 %v4299_v17  ;;  %v4255_v52 = vmax.f32 %v4120_v33, %v4191_v26 }
 0x2d9   :  { %v4016_v13 = vpop.f32.mrf.mxu0  ;;  %4888 = vmatmul.mubr.bf16.gmra.mxu1 %v4298_v28  ;;  %v3918_v55 = vadd.f32 %v7453_v45, %v3805_v50 }
 0x2da   :  { %v4258_v57 = vmax.f32 %v4122_v7, %v4194_v23  ;;  %v4195_v59 = vmul.f32 0.25, %v4124_v16  ;;  %v4017_v63 = vadd.f32 %v4016_v13, %v7433_v29  ;;  %v4129_v48 = vpop.f32.mrf.mxu1  ;;  %v4128_v51 = vadd.f32 %v4127_v18, %v4015_v14 }
 0x2db   :  { %v4018_v40 = vpop.f32.mrf.mxu0 }
 0x2dc   :  { %v4302_v24 = vpack.c.bf16 %v4258_v57, %v4254_v1  ;;  %v4259_v61 = vmax.f32 %v4124_v16, %v4195_v59  ;;  %v4131_v39 = vpop.f32.mrf.mxu1  ;;  %v4130_v15 = vadd.f32 %v4129_v48, %v4017_v63  ;;  %v4019_v30 = vadd.f32 %v4018_v40, %v7438_v60 }
 0x2dd   :  { %v4020_v0 = vpop.f32.mrf.mxu0  ;;  %v4198_v42 = vmul.f32 0.25, %v4128_v51 }
 0x2de   :  { %v4021_v31 = vadd.f32 %v4020_v0, %v3908_v19  ;;  %v4133_v54 = vpop.f32.mrf.mxu1  ;;  %v4303_v2 = vpack.c.bf16 %v4259_v61, %v4255_v52  ;;  %v4132_v12 = vadd.f32 %v4131_v39, %v4019_v30  ;;  %v4199_v43 = vmul.f32 0.25, %v4130_v15 }
 0x2df   :  { %v4024_v29 = vpop.f32.mrf.mxu0  ;;  %v4262_v33 = vmax.f32 %v4128_v51, %v4198_v42 }
 0x2e0   :  { %v4134_v44 = vadd.f32 %v4133_v54, %v4021_v31  ;;  %v4025_v35 = vadd.f32 %v4024_v29, %v7443_v46  ;;  %v4137_v49 = vpop.f32.mrf.mxu1  ;;  %4897 = vmatprep.mubr.bf16.mxu1 %v4303_v2  ;;  %v4202_v25 = vmul.f32 0.25, %v4132_v12  ;;  %v4263_v11 = vmax.f32 %v4130_v15, %v4199_v43  ;;  %v6377_v43 = vld [vmem:[%s7678_s6 + $0x8] sm:$0xff]  }
 0x2e1   :  { %v4026_v47 = vpop.f32.mrf.mxu0  ;;  %4898 = vmatmul.mubr.bf16.gmra.mxu1 %v4302_v24 }
 0x2e2   :  { %v4203_v27 = vmul.f32 0.25, %v4134_v44  ;;  %v4138_v60 = vadd.f32 %v4137_v49, %v4025_v35  ;;  %v4027_v32 = vadd.f32 %v4026_v47, %v7446_v36  ;;  %v4139_v53 = vpop.f32.mrf.mxu1  ;;  %v4266_v62 = vmax.f32 %v4132_v12, %v4202_v25  ;;  %v6378_v25 = vld [vmem:[%s7678_s6 + $0x40] sm:$0xff]  }
 0x2e3   :  { %v4028_v34 = vpop.f32.mrf.mxu0  ;;  %v3815_v36 = vadd.f32 %v7462_v21, %v7361_v3  ;;  %v6379_v47 = vld [vmem:[%s7678_s6] sm:$0xff]  }
 0x2e4   :  { %v4267_v9 = vmax.f32 %v4134_v44, %v4203_v27  ;;  %v4140_v28 = vadd.f32 %v4139_v53, %v4027_v32  ;;  %v4029_v46 = vadd.f32 %v4028_v34, %v7451_v4  ;;  %v4141_v41 = vpop.f32.mrf.mxu1  ;;  %v4306_v7 = vpack.c.bf16 %v4266_v62, %v4262_v33 }
 0x2e5   :  { %v4030_v10 = vpop.f32.mrf.mxu0  ;;  %v4206_v58 = vmul.f32 0.25, %v4138_v60  ;;  %v3928_v51 = vadd.f32 %v7466_v20, %v3815_v36 }
 0x2e6   :  { %v4142_v5 = vadd.f32 %v4141_v41, %v4029_v46  ;;  %v4031_v37 = vadd.f32 %v4030_v10, %v3918_v55  ;;  %v4143_v17 = vpop.f32.mrf.mxu1  ;;  %v4307_v23 = vpack.c.bf16 %v4267_v9, %v4263_v11  ;;  %v4207_v16 = vmul.f32 0.25, %v4140_v28 }
 0x2e7   :  { %v4034_v26 = vpop.f32.mrf.mxu0  ;;  %v4270_v1 = vmax.f32 %v4138_v60, %v4206_v58  ;;  %v4380_v58 = vld [vmem:[%s7677_s5] sm:$0x3] }
 0x2e8   :  { %v4210_v14 = vmul.f32 0.25, %v4142_v5  ;;  %v4144_v45 = vadd.f32 %v4143_v17, %v4031_v37  ;;  %v4035_v18 = vadd.f32 %v4034_v26, %v7456_v22  ;;  %v4147_v13 = vpop.f32.mrf.mxu1  ;;  %4907 = vmatprep.mubr.bf16.mxu1 %v4307_v23  ;;  %v4271_v40 = vmax.f32 %v4140_v28, %v4207_v16 }
 0x2e9   :  { %v4036_v4 = vpop.f32.mrf.mxu0  ;;  %4908 = vmatmul.mubr.bf16.gmra.mxu1 %v4306_v7  ;;  %v7581_v37 = vrot.slane %v4380_v58, %v1958_v6  ;;  %v7769_v17 = vsub.s32 0, %v6955_v56 }
 0x2ea   :  { %v4274_v57 = vmax.f32 %v4142_v5, %v4210_v14  ;;  %v4211_v59 = vmul.f32 0.25, %v4144_v45  ;;  %v4037_v63 = vadd.f32 %v4036_v4, %v7459_v8  ;;  %v4149_v48 = vpop.f32.mrf.mxu1  ;;  %v4148_v3 = vadd.f32 %v4147_v13, %v4035_v18 }
 0x2eb   :  { %v4038_v21 = vpop.f32.mrf.mxu0  ;;  %v7585_v36 = vrot.slane %v4380_v58, %v7769_v17 }
 0x2ec   :  { %v4310_v19 = vpack.c.bf16 %v4274_v57, %v4270_v1  ;;  %v4275_v52 = vmax.f32 %v4144_v45, %v4211_v59  ;;  %v4150_v24 = vadd.f32 %v4149_v48, %v4037_v63  ;;  %v4151_v61 = vpop.f32.mrf.mxu1  ;;  %v4039_v22 = vadd.f32 %v4038_v21, %v7464_v38  ;;  %v6376_v38 = vld [vmem:[%s7678_s6 + $0x48] sm:$0xff]  }
 0x2ed   :  { %v4040_v39 = vpop.f32.mrf.mxu0  ;;  %v4214_v0 = vmul.f32 0.25, %v4148_v3  ;;  %5786 = vmatprep.subr.bf16.mxu0 %v6376_v38  ;;  %5844 = vmatprep.subr.bf16.mxu1 %v6376_v38 }
 0x2ee   :  { %v4041_v15 = vadd.f32 %v4040_v39, %v3928_v51  ;;  %v4311_v30 = vpack.c.bf16 %v4275_v52, %v4271_v40  ;;  %v4152_v31 = vadd.f32 %v4151_v61, %v4039_v22  ;;  %v4153_v54 = vpop.f32.mrf.mxu1  ;;  %v4215_v8 = vmul.f32 0.25, %v4150_v24  ;;  %5787 = vmatpush3.bf16.msra.mxu0 %v6377_v43  ;;  %5852 = vmatpush3.bf16.msra.mxu1 %v6377_v43 }
 0x2ef   :  { %v4278_v12 = vmax.f32 %v4148_v3, %v4214_v0  ;;  %5788 = vmatprep.subr.bf16.mxu0 %v6378_v25  ;;  %5845 = vmatprep.subr.bf16.mxu1 %v6378_v25 }
 0x2f0   :  { %v4154_v2 = vadd.f32 %v4153_v54, %v4041_v15  ;;  %4917 = vmatprep.mubr.bf16.mxu1 %v4311_v30  ;;  %v4218_v42 = vmul.f32 0.25, %v4152_v31  ;;  %v4279_v50 = vmax.f32 %v4150_v24, %v4215_v8 }
 0x2f1   :  { %4918 = vmatmul.mubr.bf16.gmra.mxu1 %v4310_v19 }
 0x2f2   :  { %v4219_v20 = vmul.f32 0.25, %v4154_v2  ;;  %v4282_v29 = vmax.f32 %v4152_v31, %v4218_v42  ;;  %5789 = vmatpush3.bf16.msra.mxu0 %v6379_v47  ;;  %5853 = vmatpush3.bf16.msra.mxu1 %v6379_v47 }
 0x2f4   :  { %v4283_v44 = vmax.f32 %v4154_v2, %v4219_v20  ;;  %v4314_v35 = vpack.c.bf16 %v4282_v29, %v4278_v12 }
 0x2f6   :  { %v4315_v49 = vpack.c.bf16 %v4283_v44, %v4279_v50 }
 0x2f8   :  { %4927 = vmatprep.mubr.bf16.mxu1 %v4315_v49 }
 0x2f9   :  { %4928 = vmatmul.mubr.bf16.gmra.mxu1 %v4314_v35 }
 0x300   :  { %v4746_v27 = vpop.f32.mrf.mxu0 }
 0x301   :  { %v4747_v14 = vadd.f32 %v4746_v27, %v7585_v36 }
 0x302   :  { %v4748_v60 = vpop.f32.mrf.mxu0 }
 0x303   :  { %v4749_v16 = vadd.f32 %v4748_v60, %v7581_v37 }
 0x304   :  { %v4750_v32 = vpop.f32.mrf.mxu0 }
 0x305   :  { %v4751_v18 = vadd.f32 %v4750_v32, %v7585_v36 }
 0x306   :  { %v4752_v53 = vpop.f32.mrf.mxu0 }
 0x307   :  { %v4753_v57 = vadd.f32 %v4752_v53, %v7581_v37 }
 0x308   :  { %v4756_v33 = vpop.f32.mrf.mxu0 }
 0x309   :  { %v4757_v61 = vadd.f32 %v4756_v33, %v7585_v36 }
 0x30a   :  { %v4758_v62 = vpop.f32.mrf.mxu0 }
 0x30b   :  { %v4759_v52 = vadd.f32 %v4758_v62, %v7581_v37 }
 0x30c   :  { %v4760_v34 = vpop.f32.mrf.mxu0 }
 0x30d   :  { %v4761_v0 = vadd.f32 %v4760_v34, %v7585_v36 }
 0x30e   :  { %v4762_v55 = vpop.f32.mrf.mxu0 }
 0x30f   :  { %v4763_v20 = vadd.f32 %v4762_v55, %v7581_v37 }
 0x310   :  { %v4766_v9 = vpop.f32.mrf.mxu0 }
 0x311   :  { %v4767_v60 = vadd.f32 %v4766_v9, %v7585_v36 }
 0x312   :  { %v4768_v28 = vpop.f32.mrf.mxu0 }
 0x313   :  { %v4769_v47 = vadd.f32 %v4768_v28, %v7581_v37 }
 0x314   :  { %v4770_v46 = vpop.f32.mrf.mxu0 }
 0x315   :  { %v4771_v62 = vadd.f32 %v4770_v46, %v7585_v36 }
 0x316   :  { %v7566_v41 = vpop.f32.mrf.mxu0 }
 0x318   :  { %v7568_v11 = vpop.f32.mrf.mxu0 }
 0x31a   :  { %v7570_v7 = vpop.f32.mrf.mxu0 }
 0x31c   :  { %v7572_v10 = vpop.f32.mrf.mxu0 }
 0x31e   :  { %v7577_v5 = vpop.f32.mrf.mxu0 }
 0x320   :  { %v7587_v26 = vpop.f32.mrf.mxu0 }
 0x322   :  { %v7592_v13 = vpop.f32.mrf.mxu0 }
 0x324   :  { %v7595_v63 = vpop.f32.mrf.mxu0 }
 0x326   :  { %v7599_v22 = vpop.f32.mrf.mxu0 }
 0x328   :  { %v7603_v50 = vpop.f32.mrf.mxu0 }
 0x32a   :  { %v7607_v32 = vpop.f32.mrf.mxu0 }
 0x381   :  { %v4859_v23 = vpop.f32.mrf.mxu1 }
 0x382   :  { %v4860_v1 = vadd.f32 %v4859_v23, %v4747_v14  ;;  %v4773_v14 = vadd.f32 %v7566_v41, %v7581_v37  ;;  %v4777_v41 = vadd.f32 %v7568_v11, %v7585_v36 }
 0x383   :  { %v4861_v45 = vpop.f32.mrf.mxu1 }
 0x384   :  { %v4862_v4 = vadd.f32 %v4861_v45, %v4749_v16  ;;  %v4938_v21 = vmul.f32 0.25, %v4860_v1 }
 0x385   :  { %v4863_v6 = vpop.f32.mrf.mxu1 }
 0x386   :  { %v4864_v56 = vadd.f32 %v4863_v6, %v4751_v18  ;;  %v4939_v48 = vmul.f32 0.25, %v4862_v4  ;;  %v4970_v31 = vmax.f32 %v4860_v1, %v4938_v21  ;;  %v7612_v18 = vpop.f32.mrf.mxu0 }
 0x387   :  { %v4865_v59 = vpop.f32.mrf.mxu1 }
 0x388   :  { %v4940_v51 = vmul.f32 0.25, %v4864_v56  ;;  %v4866_v3 = vadd.f32 %v4865_v59, %v4753_v57  ;;  %v4971_v39 = vmax.f32 %v4862_v4, %v4939_v48  ;;  %v4779_v59 = vadd.f32 %v7570_v7, %v7581_v37 }
 0x389   :  { %v4869_v19 = vpop.f32.mrf.mxu1 }
 0x38a   :  { %v4941_v40 = vmul.f32 0.25, %v4866_v3  ;;  %v4972_v24 = vmax.f32 %v4864_v56, %v4940_v51  ;;  %v4870_v8 = vadd.f32 %v4869_v19, %v4757_v61  ;;  %v4802_v51 = vpop.f32.mrf.mxu0 }
 0x38b   :  { %v4871_v30 = vpop.f32.mrf.mxu1 }
 0x38c   :  { %v4973_v15 = vmax.f32 %v4866_v3, %v4941_v40  ;;  %v4872_v54 = vadd.f32 %v4871_v30, %v4759_v52  ;;  %v5002_v12 = vpack.c.bf16 %v4972_v24, %v4970_v31  ;;  %v4942_v43 = vmul.f32 0.25, %v4870_v8  ;;  %v7622_v31 = vpop.f32.mrf.mxu0 }
 0x38d   :  { %v4873_v2 = vpop.f32.mrf.mxu1  ;;  %v4781_v40 = vadd.f32 %v7572_v10, %v7585_v36  ;;  %v4783_v30 = vadd.f32 %v7577_v5, %v7581_v37  ;;  %v4787_v5 = vadd.f32 %v7587_v26, %v7585_v36 }
 0x38e   :  { %v5003_v42 = vpack.c.bf16 %v4973_v15, %v4971_v39  ;;  %v4874_v29 = vadd.f32 %v4873_v2, %v4761_v0  ;;  %v4943_v35 = vmul.f32 0.25, %v4872_v54  ;;  %v4974_v17 = vmax.f32 %v4870_v8, %v4942_v43 }
 0x38f   :  { %v4875_v44 = vpop.f32.mrf.mxu1 }
 0x390   :  { %5185 = vmatprep.mubr.bf16.mxu0 %v5003_v42  ;;  %v4944_v49 = vmul.f32 0.25, %v4874_v29  ;;  %v4876_v38 = vadd.f32 %v4875_v44, %v4763_v20  ;;  %v4975_v34 = vmax.f32 %v4872_v54, %v4943_v35  ;;  %v4808_v44 = vpop.f32.mrf.mxu0 }
 0x391   :  { %5186 = vmatmul.mubr.bf16.vlgmr.msra.gmra.mxu0 %v5002_v12  ;;  %v4879_v25 = vpop.f32.mrf.mxu1  ;;  %v4789_v12 = vadd.f32 %v7592_v13, %v7581_v37 }
 0x392   :  { %v4945_v27 = vmul.f32 0.25, %v4876_v38  ;;  %v4976_v53 = vmax.f32 %v4874_v29, %v4944_v49  ;;  %v4880_v23 = vadd.f32 %v4879_v25, %v4767_v60 }
 0x393   :  { %v4881_v33 = vpop.f32.mrf.mxu1 }
 0x394   :  { %v4977_v55 = vmax.f32 %v4876_v38, %v4945_v27  ;;  %v4882_v58 = vadd.f32 %v4881_v33, %v4769_v47  ;;  %v5004_v9 = vpack.c.bf16 %v4976_v53, %v4974_v17  ;;  %v4946_v46 = vmul.f32 0.25, %v4880_v23 }
 0x395   :  { %v4883_v16 = vpop.f32.mrf.mxu1  ;;  %v4791_v38 = vadd.f32 %v7595_v63, %v7585_v36  ;;  %v4793_v33 = vadd.f32 %v7599_v22, %v7581_v37 }
 0x396   :  { %v4884_v45 = vadd.f32 %v4883_v16, %v4771_v62  ;;  %v5005_v28 = vpack.c.bf16 %v4977_v55, %v4975_v34  ;;  %v4947_v1 = vmul.f32 0.25, %v4882_v58  ;;  %v4978_v61 = vmax.f32 %v4880_v23, %v4946_v46  ;;  %v4810_v34 = vpop.f32.mrf.mxu0 }
 0x397   :  { %v4885_v4 = vpop.f32.mrf.mxu1 }
 0x398   :  { %v4948_v6 = vmul.f32 0.25, %v4884_v45  ;;  %v4886_v57 = vadd.f32 %v4885_v4, %v4773_v14  ;;  %5193 = vmatprep.mubr.bf16.mxu0 %v5005_v28  ;;  %v4979_v19 = vmax.f32 %v4882_v58, %v4947_v1  ;;  %v4799_v14 = vadd.f32 %v7607_v32, %v7581_v37  ;;  %v4812_v22 = vpop.f32.mrf.mxu0 }
 0x399   :  { %v4889_v56 = vpop.f32.mrf.mxu1  ;;  %5194 = vmatmul.mubr.bf16.gmra.mxu0 %v5004_v9  ;;  %v4797_v28 = vadd.f32 %v7603_v50, %v7585_v36  ;;  %v4801_v1 = vadd.f32 %v7612_v18, %v7585_v36  ;;  %v4809_v18 = vadd.f32 %v4808_v44, %v7581_v37 }
 0x39a   :  { %v4949_v48 = vmul.f32 0.25, %v4886_v57  ;;  %v4980_v3 = vmax.f32 %v4884_v45, %v4948_v6  ;;  %v4890_v39 = vadd.f32 %v4889_v56, %v4777_v41  ;;  %v4803_v41 = vadd.f32 %v4802_v51, %v7581_v37 }
 0x39b   :  { %v4891_v21 = vpop.f32.mrf.mxu1 }
 0x39c   :  { %v4981_v52 = vmax.f32 %v4886_v57, %v4949_v48  ;;  %v4892_v24 = vadd.f32 %v4891_v21, %v4779_v59  ;;  %v5006_v11 = vpack.c.bf16 %v4980_v3, %v4978_v61  ;;  %v4950_v10 = vmul.f32 0.25, %v4890_v39  ;;  %v4816_v21 = vpop.f32.mrf.mxu0 }
 0x39d   :  { %v4893_v15 = vpop.f32.mrf.mxu1 }
 0x39e   :  { %v4894_v7 = vadd.f32 %v4893_v15, %v4781_v40  ;;  %v5007_v0 = vpack.c.bf16 %v4981_v52, %v4979_v19  ;;  %v4951_v8 = vmul.f32 0.25, %v4892_v24  ;;  %v4982_v27 = vmax.f32 %v4890_v39, %v4950_v10 }
 0x39f   :  { %v4895_v54 = vpop.f32.mrf.mxu1 }
 0x3a0   :  { %v4952_v2 = vmul.f32 0.25, %v4894_v7  ;;  %v4896_v42 = vadd.f32 %v4895_v54, %v4783_v30  ;;  %5201 = vmatprep.mubr.bf16.mxu0 %v5007_v0  ;;  %v4983_v43 = vmax.f32 %v4892_v24, %v4951_v8  ;;  %v4807_v30 = vadd.f32 %v7622_v31, %v7585_v36 }
 0x3a1   :  { %v4899_v20 = vpop.f32.mrf.mxu1  ;;  %5202 = vmatmul.mubr.bf16.gmra.mxu0 %v5006_v11  ;;  %v4811_v11 = vadd.f32 %v4810_v34, %v7585_v36 }
 0x3a2   :  { %v4953_v29 = vmul.f32 0.25, %v4896_v42  ;;  %v4984_v35 = vmax.f32 %v4894_v7, %v4952_v2  ;;  %v4900_v60 = vadd.f32 %v4899_v20, %v4787_v5  ;;  %v4818_v7 = vpop.f32.mrf.mxu0 }
 0x3a3   :  { %v4901_v49 = vpop.f32.mrf.mxu1 }
 0x3a4   :  { %v4985_v25 = vmax.f32 %v4896_v42, %v4953_v29  ;;  %v4902_v47 = vadd.f32 %v4901_v49, %v4789_v12  ;;  %v5008_v55 = vpack.c.bf16 %v4984_v35, %v4982_v27  ;;  %v4954_v16 = vmul.f32 0.25, %v4900_v60  ;;  %v4820_v44 = vpop.f32.mrf.mxu0 }
 0x3a5   :  { %v4903_v53 = vpop.f32.mrf.mxu1  ;;  %v4813_v12 = vadd.f32 %v4812_v22, %v7581_v37  ;;  %v4819_v27 = vadd.f32 %v4818_v7, %v7581_v37  ;;  %v4821_v34 = vadd.f32 %v4820_v44, %v7585_v36 }
 0x3a6   :  { %v4904_v13 = vadd.f32 %v4903_v53, %v4791_v38  ;;  %v5009_v62 = vpack.c.bf16 %v4985_v25, %v4983_v43  ;;  %v4955_v58 = vmul.f32 0.25, %v4902_v47  ;;  %v4986_v56 = vmax.f32 %v4900_v60, %v4954_v16 }
 0x3a7   :  { %v4905_v26 = vpop.f32.mrf.mxu1  ;;  %v4817_v53 = vadd.f32 %v4816_v21, %v7585_v36 }
 0x3a8   :  { %v4956_v17 = vmul.f32 0.25, %v4904_v13  ;;  %v4906_v23 = vadd.f32 %v4905_v26, %v4793_v33  ;;  %5209 = vmatprep.mubr.bf16.mxu0 %v5009_v62  ;;  %v4987_v6 = vmax.f32 %v4902_v47, %v4955_v58  ;;  %v4822_v33 = vpop.f32.mrf.mxu0 }
 0x3a9   :  { %v4909_v63 = vpop.f32.mrf.mxu1  ;;  %5210 = vmatmul.mubr.bf16.gmra.mxu0 %v5008_v55 }
 0x3aa   :  { %v4957_v45 = vmul.f32 0.25, %v4906_v23  ;;  %v4988_v9 = vmax.f32 %v4904_v13, %v4956_v17  ;;  %v4910_v59 = vadd.f32 %v4909_v63, %v4797_v28  ;;  %v4823_v63 = vadd.f32 %v4822_v33, %v7581_v37 }
 0x3ab   :  { %v4911_v4 = vpop.f32.mrf.mxu1 }
 0x3ac   :  { %v4989_v57 = vmax.f32 %v4906_v23, %v4957_v45  ;;  %v4912_v46 = vadd.f32 %v4911_v4, %v4799_v14  ;;  %v5010_v40 = vpack.c.bf16 %v4988_v9, %v4986_v56  ;;  %v4958_v61 = vmul.f32 0.25, %v4910_v59 }
 0x3ad   :  { %v4913_v48 = vpop.f32.mrf.mxu1 }
 0x3ae   :  { %v4914_v3 = vadd.f32 %v4913_v48, %v4801_v1  ;;  %v5011_v32 = vpack.c.bf16 %v4989_v57, %v4987_v6  ;;  %v4959_v50 = vmul.f32 0.25, %v4912_v46  ;;  %v4990_v42 = vmax.f32 %v4910_v59, %v4958_v61 }
 0x3af   :  { %v4915_v19 = vpop.f32.mrf.mxu1 }
 0x3b0   :  { %v4960_v52 = vmul.f32 0.25, %v4914_v3  ;;  %v4916_v24 = vadd.f32 %v4915_v19, %v4803_v41  ;;  %5217 = vmatprep.mubr.bf16.mxu1 %v5011_v32  ;;  %v4991_v54 = vmax.f32 %v4912_v46, %v4959_v50  ;;  %v7651_v32 = vld [vmem:[%s7679_s7] ss:$0 sm:$0xff] }
 0x3b1   :  { %v4919_v39 = vpop.f32.mrf.mxu1  ;;  %5218 = vmatmul.mubr.bf16.vlgmr.msra.gmra.mxu1 %v5010_v40 }
 0x3b2   :  { %v4961_v15 = vmul.f32 0.25, %v4916_v24  ;;  %v4992_v51 = vmax.f32 %v4914_v3, %v4960_v52  ;;  %v4920_v10 = vadd.f32 %v4919_v39, %v4807_v30 }
 0x3b3   :  { %v4921_v0 = vpop.f32.mrf.mxu1 }
 0x3b4   :  { %v4993_v8 = vmax.f32 %v4916_v24, %v4961_v15  ;;  %v4922_v2 = vadd.f32 %v4921_v0, %v4809_v18  ;;  %v5012_v35 = vpack.c.bf16 %v4992_v51, %v4990_v42  ;;  %v4962_v25 = vmul.f32 0.25, %v4920_v10 }
 0x3b5   :  { %v4923_v20 = vpop.f32.mrf.mxu1 }
 0x3b6   :  { %v4924_v29 = vadd.f32 %v4923_v20, %v4811_v11  ;;  %v5013_v5 = vpack.c.bf16 %v4993_v8, %v4991_v54  ;;  %v4963_v38 = vmul.f32 0.25, %v4922_v2  ;;  %v4994_v17 = vmax.f32 %v4920_v10, %v4962_v25 }
 0x3b7   :  { %v4925_v49 = vpop.f32.mrf.mxu1 }
 0x3b8   :  { %v4964_v31 = vmul.f32 0.25, %v4924_v29  ;;  %v4926_v43 = vadd.f32 %v4925_v49, %v4813_v12  ;;  %5225 = vmatprep.mubr.bf16.mxu1 %v5013_v5  ;;  %v4995_v55 = vmax.f32 %v4922_v2, %v4963_v38 }
 0x3b9   :  { %v4929_v47 = vpop.f32.mrf.mxu1  ;;  %5226 = vmatmul.mubr.bf16.gmra.mxu1 %v5012_v35 }
 0x3ba   :  { %v4965_v60 = vmul.f32 0.25, %v4926_v43  ;;  %v4996_v13 = vmax.f32 %v4924_v29, %v4964_v31  ;;  %v4930_v23 = vadd.f32 %v4929_v47, %v4817_v53 }
 0x3bb   :  { %v4931_v62 = vpop.f32.mrf.mxu1 }
 0x3bc   :  { %v4997_v26 = vmax.f32 %v4926_v43, %v4965_v60  ;;  %v4932_v58 = vadd.f32 %v4931_v62, %v4819_v27  ;;  %v5014_v28 = vpack.c.bf16 %v4996_v13, %v4994_v17  ;;  %v4966_v6 = vmul.f32 0.25, %v4930_v23 }
 0x3bd   :  { %v4933_v16 = vpop.f32.mrf.mxu1 }
 0x3be   :  { %v4934_v14 = vadd.f32 %v4933_v16, %v4821_v34  ;;  %v5015_v45 = vpack.c.bf16 %v4997_v26, %v4995_v55  ;;  %v4967_v9 = vmul.f32 0.25, %v4932_v58  ;;  %v4998_v59 = vmax.f32 %v4930_v23, %v4966_v6 }
 0x3bf   :  { %v4935_v22 = vpop.f32.mrf.mxu1 }
 0x3c0   :  { %v4968_v4 = vmul.f32 0.25, %v4934_v14  ;;  %v4936_v1 = vadd.f32 %v4935_v22, %v4823_v63  ;;  %5233 = vmatprep.mubr.bf16.mxu1 %v5015_v45  ;;  %v4999_v46 = vmax.f32 %v4932_v58, %v4967_v9 }
 0x3c1   :  { %5234 = vmatmul.mubr.bf16.gmra.mxu1 %v5014_v28 }
 0x3c2   :  { %v4969_v57 = vmul.f32 0.25, %v4936_v1  ;;  %v5000_v36 = vmax.f32 %v4934_v14, %v4968_v4 }
 0x3c4   :  { %v5001_v56 = vmax.f32 %v4936_v1, %v4969_v57  ;;  %v5016_v41 = vpack.c.bf16 %v5000_v36, %v4998_v59 }
 0x3c6   :  { %v5017_v48 = vpack.c.bf16 %v5001_v56, %v4999_v46 }
 0x3c8   :  { %5241 = vmatprep.mubr.bf16.mxu1 %v5017_v48 }
 0x3c9   :  { %5242 = vmatmul.mubr.bf16.gmra.mxu1 %v5016_v41 }
 0x451   :  { %v5790_v37 = vpop.f32.mrf.mxu0 }
 0x453   :  { %v5791_v3 = vpop.f32.mrf.mxu0 }
 0x454   :  { %v5792_v21 = vadd.f32 %v5791_v3, %v5790_v37 }
 0x455   :  { %v5793_v40 = vpop.f32.mrf.mxu0 }
 0x456   :  { %v5188_v19 = vadd.f32 %v5792_v21, %v7651_v32 }
 0x457   :  { %v5794_v50 = vpop.f32.mrf.mxu0 }
 0x458   :  { %v5795_v52 = vadd.f32 %v5794_v50, %v5793_v40  ;;  %5250 = vxpose.xlu0.b32.start [1/16] (narrow) %v5188_v19, 8 }
 0x459   :  { %v5796_v24 = vpop.f32.mrf.mxu0 }
 0x45a   :  { %v5191_v61 = vadd.f32 %v5795_v52, %v7651_v32 }
 0x45b   :  { %v5797_v39 = vpop.f32.mrf.mxu0 }
 0x45c   :  { %5251 = vxpose.xlu0.b32.cont [2/16] (narrow) %v5191_v61, 8  ;;  %v5798_v18 = vadd.f32 %v5797_v39, %v5796_v24 }
 0x45d   :  { %v5799_v15 = vpop.f32.mrf.mxu0 }
 0x45e   :  { %v5196_v30 = vadd.f32 %v5798_v18, %v7651_v32 }
 0x45f   :  { %v5800_v7 = vpop.f32.mrf.mxu0 }
 0x460   :  { %v5801_v51 = vadd.f32 %v5800_v7, %v5799_v15  ;;  %5252 = vxpose.xlu0.b32.cont [3/16] (narrow) %v5196_v30, 8 }
 0x461   :  { %v5802_v0 = vpop.f32.mrf.mxu0 }
 0x462   :  { %v5199_v11 = vadd.f32 %v5801_v51, %v7651_v32 }
 0x463   :  { %v5803_v54 = vpop.f32.mrf.mxu0 }
 0x464   :  { %v5804_v8 = vadd.f32 %v5803_v54, %v5802_v0  ;;  %5253 = vxpose.xlu0.b32.cont [4/16] (narrow) %v5199_v11, 8 }
 0x465   :  { %v5805_v2 = vpop.f32.mrf.mxu0 }
 0x466   :  { %v5204_v42 = vadd.f32 %v5804_v8, %v7651_v32 }
 0x467   :  { %v5806_v10 = vpop.f32.mrf.mxu0 }
 0x468   :  { %v5807_v20 = vadd.f32 %v5806_v10, %v5805_v2  ;;  %5254 = vxpose.xlu0.b32.cont [5/16] (narrow) %v5204_v42, 8 }
 0x469   :  { %v5808_v12 = vpop.f32.mrf.mxu0 }
 0x46a   :  { %v5207_v29 = vadd.f32 %v5807_v20, %v7651_v32 }
 0x46b   :  { %v5809_v5 = vpop.f32.mrf.mxu0 }
 0x46c   :  { %v5810_v44 = vadd.f32 %v5809_v5, %v5808_v12  ;;  %5255 = vxpose.xlu0.b32.cont [6/16] (narrow) %v5207_v29, 8 }
 0x46d   :  { %v5811_v35 = vpop.f32.mrf.mxu0 }
 0x46e   :  { %v5212_v49 = vadd.f32 %v5810_v44, %v7651_v32 }
 0x46f   :  { %v5812_v38 = vpop.f32.mrf.mxu0 }
 0x470   :  { %v5813_v31 = vadd.f32 %v5812_v38, %v5811_v35  ;;  %5256 = vxpose.xlu0.b32.cont [7/16] (narrow) %v5212_v49, 8 }
 0x471   :  { %v5814_v43 = vpop.f32.mrf.mxu1 }
 0x472   :  { %v5215_v25 = vadd.f32 %v5813_v31, %v7651_v32 }
 0x473   :  { %v5815_v47 = vpop.f32.mrf.mxu1 }
 0x474   :  { %v5816_v27 = vadd.f32 %v5815_v47, %v5814_v43  ;;  %5257 = vxpose.xlu0.b32.cont [8/16] (narrow) %v5215_v25, 8 }
 0x475   :  { %v5817_v60 = vpop.f32.mrf.mxu1 }
 0x476   :  { %v5220_v53 = vadd.f32 %v5816_v27, %v7651_v32 }
 0x477   :  { %v5818_v33 = vpop.f32.mrf.mxu1 }
 0x478   :  { %v5819_v13 = vadd.f32 %v5818_v33, %v5817_v60  ;;  %5258 = vxpose.xlu0.b32.cont [9/16] (narrow) %v5220_v53, 8 }
 0x479   :  { %v5820_v62 = vpop.f32.mrf.mxu1 }
 0x47a   :  { %v5223_v34 = vadd.f32 %v5819_v13, %v7651_v32 }
 0x47b   :  { %v5821_v55 = vpop.f32.mrf.mxu1 }
 0x47c   :  { %v5822_v26 = vadd.f32 %v5821_v55, %v5820_v62  ;;  %5259 = vxpose.xlu0.b32.cont [10/16] (narrow) %v5223_v34, 8 }
 0x47d   :  { %v5823_v58 = vpop.f32.mrf.mxu1 }
 0x47e   :  { %v5228_v17 = vadd.f32 %v5822_v26, %v7651_v32 }
 0x47f   :  { %v5824_v23 = vpop.f32.mrf.mxu1 }
 0x480   :  { %v5825_v16 = vadd.f32 %v5824_v23, %v5823_v58  ;;  %5260 = vxpose.xlu0.b32.cont [11/16] (narrow) %v5228_v17, 8 }
 0x481   :  { %v5826_v63 = vpop.f32.mrf.mxu1 }
 0x482   :  { %v5231_v14 = vadd.f32 %v5825_v16, %v7651_v32 }
 0x483   :  { %v5827_v45 = vpop.f32.mrf.mxu1 }
 0x484   :  { %v5828_v28 = vadd.f32 %v5827_v45, %v5826_v63  ;;  %5261 = vxpose.xlu0.b32.cont [12/16] (narrow) %v5231_v14, 8 }
 0x485   :  { %v5829_v22 = vpop.f32.mrf.mxu1 }
 0x486   :  { %v5236_v9 = vadd.f32 %v5828_v28, %v7651_v32 }
 0x487   :  { %v5830_v4 = vpop.f32.mrf.mxu1 }
 0x488   :  { %v5831_v1 = vadd.f32 %v5830_v4, %v5829_v22  ;;  %5262 = vxpose.xlu0.b32.cont [13/16] (narrow) %v5236_v9, 8 }
 0x489   :  { %v5832_v6 = vpop.f32.mrf.mxu1 }
 0x48a   :  { %v5239_v57 = vadd.f32 %v5831_v1, %v7651_v32 }
 0x48b   :  { %v5833_v36 = vpop.f32.mrf.mxu1 }
 0x48c   :  { %v5834_v46 = vadd.f32 %v5833_v36, %v5832_v6  ;;  %5263 = vxpose.xlu0.b32.cont [14/16] (narrow) %v5239_v57, 8 }
 0x48d   :  { %v5835_v56 = vpop.f32.mrf.mxu1 }
 0x48e   :  { %v5244_v59 = vadd.f32 %v5834_v46, %v7651_v32 }
 0x48f   :  { %v5836_v48 = vpop.f32.mrf.mxu1 }
 0x490   :  { %v5837_v41 = vadd.f32 %v5836_v48, %v5835_v56  ;;  %5264 = vxpose.xlu0.b32.cont [15/16] (narrow) %v5244_v59, 8 }
 0x492   :  { %v5247_v37 = vadd.f32 %v5837_v41, %v7651_v32 }
 0x494   :  { %5265 = vxpose.xlu0.b32.end [16/16] (narrow) %v5247_v37, 8 }
 0x4d4   :  { %v5266_v3 = vpop.trf.xlu0 }
 0x4d5   :  { %v5282_v21 = vmul.f32 0.5, %v5266_v3 }
 0x4d7   :  { %6380 = vtanh.f32 %v5282_v21 }
 0x4e4   :  { %v6381_v40 = vpop.eup %6380 }
 0x4e5   :  { %v5284_v19 = vmul.f32 0.5, %v6381_v40 }
 0x4e7   :  { %v5285_v50 = vadd.f32 0.5, %v5284_v19 }
 0x4e9   :  { %5286 = vst [vmem:[%s7680_s8] sm:$0x1] %v5285_v50 }
 0x4ea   :  { %5291 = vsyncpa [#allocation3], 1 }
 0x4eb   :  { %5292 = vsyncpa [#allocation5], 1 }

</bundles_post_ra>
